<compile_context>
chip_gen: v7x
topology: tpu7x:2x2x1
jax: 0.10.0
libtpu: 0.0.40
codegen_flags: <defaults>
</compile_context>

<pallas_src>
import functools
import math

import jax
import jax.numpy as jnp
from jax import lax
from jax.experimental import pallas as pl
from jax.experimental.pallas import tpu as pltpu

LRELU_SLOPE = 0.1          # nn.LeakyReLU(0.1) in the reference module


# --------------------------- Pallas kernels --------------------------------
def _fused_mm_kernel(*refs, n_ops, act, has_res):
    """out = [lrelu](sum_i A_i @ W_i) [+ res]  with f32 accumulation."""
    a_refs = refs[:n_ops]
    w_refs = refs[n_ops:2 * n_ops]
    res_ref = refs[2 * n_ops] if has_res else None
    o_ref = refs[-1]

    acc = jnp.dot(a_refs[0][...], w_refs[0][...],
                  preferred_element_type=jnp.float32)
    for i in range(1, n_ops):
        acc = acc + jnp.dot(a_refs[i][...], w_refs[i][...],
                            preferred_element_type=jnp.float32)
    if act:
        acc = jnp.where(acc >= 0, acc, LRELU_SLOPE * acc)
    if has_res:
        acc = acc + res_ref[...].astype(jnp.float32)
    o_ref[...] = acc.astype(o_ref.dtype)


def _pick_bm(m):
    if m >= 4096:
        return 512
    if m >= 512:
        return 256                 # >= 2 grid steps for M in [512, 4096)
    return max(8, (-(-m // 2) + 7) // 8 * 8)


def fused_pointwise(a_list, w_list, res=None, act=True, out_dtype=jnp.float32):
    """Fused 1x1-conv: act(sum_i A_i @ W_i) + res, tiled over M."""
    m = a_list[0].shape[0]
    n = w_list[0].shape[1]
    bm = min(_pick_bm(m), m)
    grid = (pl.cdiv(m, bm),)

    in_specs = [pl.BlockSpec((bm, a.shape[1]), lambda i: (i, 0)) for a in a_list]
    in_specs += [pl.BlockSpec(w.shape, lambda i: (0, 0)) for w in w_list]
    args = list(a_list) + list(w_list)
    if res is not None:
        in_specs.append(pl.BlockSpec((bm, n), lambda i: (i, 0)))
        args.append(res)

    return pl.pallas_call(
        functools.partial(_fused_mm_kernel, n_ops=len(a_list), act=act,
                          has_res=res is not None),
        out_shape=jax.ShapeDtypeStruct((m, n), out_dtype),
        grid=grid,
        in_specs=in_specs,
        out_specs=pl.BlockSpec((bm, n), lambda i: (i, 0)),
        compiler_params=pltpu.CompilerParams(
            dimension_semantics=("parallel",)),
    )(*args)


def _epi_kernel(x3_ref, w3_ref, o_ref, *, taps, rows_out, shift):
    """Stride-A EPI conv: in-kernel tap accumulation over shifted slices.

    x3_ref : (rows_pad, taps*ch)  padded, resident in VMEM
    w3_ref : (taps, taps*ch, ch)  packed weight
    o_ref  : (rows_out, ch)
    """
    acc = jnp.zeros((rows_out, o_ref.shape[-1]), jnp.float32)
    for d in range(taps):                       # static unroll
        a_d = x3_ref[pl.ds(d * shift, rows_out), :]
        acc = acc + jnp.dot(a_d, w3_ref[d],
                            preferred_element_type=jnp.float32)
    acc = jnp.where(acc >= 0, acc, LRELU_SLOPE * acc)
    o_ref[...] = acc.astype(o_ref.dtype)


def epi_conv(x3, w3, rows_out, shift):
    """x3: (b, rows_pad, A*ch) bf16, w3: (A, A*ch, ch) bf16 -> (b, rows_out, ch)."""
    b, rows_pad, k = x3.shape
    taps, _, n = w3.shape
    return pl.pallas_call(
        functools.partial(_epi_kernel, taps=taps, rows_out=rows_out,
                          shift=shift),
        out_shape=jax.ShapeDtypeStruct((b, rows_out, n), jnp.bfloat16),
        grid=(b,),
        in_specs=[pl.BlockSpec((None, rows_pad, k), lambda i: (i, 0, 0)),
                  pl.BlockSpec((taps, k, n), lambda i: (0, 0, 0))],
        out_specs=pl.BlockSpec((None, rows_out, n), lambda i: (i, 0, 0)),
        compiler_params=pltpu.CompilerParams(
            dimension_semantics=("parallel",)),
    )(x3, w3)


# ----------------------- parameter init / packing --------------------------
def init_params(key, channels, angRes):
    """PyTorch-style uniform init + one-time packing of MXU-ready bf16 weights."""
    A, ch = angRes, channels

    def conv_w(k, out_c, in_c, kh, kw):
        bound = 1.0 / math.sqrt(in_c * kh * kw)
        return jax.random.uniform(k, (out_c, in_c, kh, kw), jnp.float32,
                                  -bound, bound)

    ks = jax.random.split(key, 5)
    raw = {
        "epi_h": conv_w(ks[0], ch, ch, 1, A * A),     # kernel (1, A*A)
        "epi_v": conv_w(ks[1], ch, ch, A * A, 1),     # kernel (A*A, 1)
        "eup":   conv_w(ks[2], A * ch, ch, 1, 1),
        "conv1": conv_w(ks[3], ch, 3 * ch, 1, 1),
        "conv2": conv_w(ks[4], ch, 2 * ch, 1, 1),
    }

    def pack_epi(w_oct):                 # (O, C, A*A) -> (A_taps, A*C, O)
        w4 = w_oct.reshape(ch, ch, A, A)              # (o, c, d, r), t = d*A + r
        return jnp.transpose(w4, (2, 3, 1, 0)).reshape(A, A * ch, ch) \
                  .astype(jnp.bfloat16)

    w1 = raw["conv1"][:, :, 0, 0].T.astype(jnp.bfloat16)   # (3ch, ch)
    w2 = raw["conv2"][:, :, 0, 0].T.astype(jnp.bfloat16)   # (2ch, ch)
    packed = {
        "epi_v": pack_epi(raw["epi_v"][:, :, :, 0]),
        "epi_h": pack_epi(raw["epi_h"][:, :, 0, :]),
        "eup":   raw["eup"][:, :, 0, 0].T.astype(jnp.bfloat16),   # (ch, A*ch)
        "w1_a": w1[:ch], "w1_b": w1[ch:2 * ch], "w1_c": w1[2 * ch:],
        "w2_a": w2[:ch], "w2_b": w2[ch:],
    }
    return raw, packed


# ------------------------------- forward -----------------------------------
def a_hv_fuse_forward(packed, xa, x_h, x_v, *, angRes):
    """A_HV_Fuse.forward.  xa:(b,ch,h,w) x_h:(b,ch,A*h,w) x_v:(b,ch,h,A*w)."""
    A = angRes
    b, ch, h, w = xa.shape
    off = (A - 1) // 2
    bf = jnp.bfloat16

    # TODO(synk): the NCHW<->channel-last transposes, zero-pads and the
    # PixelShuffle1D re-indexing below remain XLA glue (pure data movement).
    xa_nhwc = jnp.transpose(xa, (0, 2, 3, 1))                 # (b,h,w,ch)
    xh_nhwc = jnp.transpose(x_h, (0, 2, 3, 1))                # (b,A*h,w,ch)
    xv_nhwc = jnp.transpose(x_v, (0, 2, 3, 1))                # (b,h,A*w,ch)

    xa2d = xa_nhwc.reshape(b * h * w, ch)                     # f32 residuals
    xh2d = xh_nhwc.reshape(b * A * h * w, ch)
    xv2d = xv_nhwc.reshape(b * h * A * w, ch)
    xa_bf, xh_bf, xv_bf = xa2d.astype(bf), xh2d.astype(bf), xv2d.astype(bf)

    # ---- EPIConv_v(x_h): (A*A,1) kernel, stride (A,1) -> ang2 rows (b,i,j) ----
    z = xh_nhwc.astype(bf).reshape(b, h, A, w, ch).transpose(0, 1, 3, 2, 4)
    z = jnp.pad(z, ((0, 0), (off, off), (0, 0), (0, 0), (0, 0)))
    x3_h = z.reshape(b, (h + A - 1) * w, A * ch)
    ang2_2d = epi_conv(x3_h, packed["epi_v"], rows_out=h * w,
                       shift=w).reshape(b * h * w, ch)

    # ---- EPIConv_h(x_v): same kernel in transposed space -> rows (b,j,i) ----
    z = jnp.transpose(xv_nhwc.astype(bf), (0, 2, 1, 3))       # (b,A*w,h,ch)
    z = z.reshape(b, w, A, h, ch).transpose(0, 1, 3, 2, 4)
    z = jnp.pad(z, ((0, 0), (off, off), (0, 0), (0, 0), (0, 0)))
    x3_v = z.reshape(b, (w + A - 1) * h, A * ch)
    ang3_t = epi_conv(x3_v, packed["epi_h"], rows_out=w * h, shift=h)
    ang3_2d = ang3_t.reshape(b, w, h, ch).transpose(0, 2, 1, 3) \
                    .reshape(b * h * w, ch)

    # ---- EUP projection computed ONCE; eh / ev are re-indexings of it ----
    eproj = fused_pointwise([xa_bf], [packed["eup"]], res=None, act=False,
                            out_dtype=bf)                     # (b*h*w, A*ch)
    e5 = eproj.reshape(b, h, w, A, ch)
    eh_2d = e5.reshape(b * h * w * A, ch)                          # rows (b,i,j,f)
    ev_2d = e5.transpose(0, 1, 3, 2, 4).reshape(b * h * A * w, ch)  # rows (b,i,f,j)

    # ---- out_a = lrelu(conv1([xa,ang2,ang3])) + xa : split-K, fused residual ----
    out_a2d = fused_pointwise([xa_bf, ang2_2d, ang3_2d],
                              [packed["w1_a"], packed["w1_b"], packed["w1_c"]],
                              res=xa2d, act=True, out_dtype=jnp.float32)
    out_a = out_a2d.reshape(b, h, w, ch).transpose(0, 3, 1, 2)

    # ---- out_h / out_v share conv2: single pallas_call, merged along M ----
    a1 = jnp.concatenate([ev_2d, eh_2d], axis=0)
    a2 = jnp.concatenate([xh_bf, xv_bf], axis=0)
    res = jnp.concatenate([xh2d, xv2d], axis=0)
    out_hv = fused_pointwise([a1, a2], [packed["w2_a"], packed["w2_b"]],
                             res=res, act=True, out_dtype=jnp.float32)
    mh = b * A * h * w
    out_h = out_hv[:mh].reshape(b, A * h, w, ch).transpose(0, 3, 1, 2)
    out_v = out_hv[mh:].reshape(b, h, A * w, ch).transpose(0, 3, 1, 2)
    return out_a, out_h, out_v


# ------------------------- pure-JAX f32 reference --------------------------
def a_hv_fuse_reference(raw, xa, x_h, x_v, angRes):
    A = angRes
    pad = A * (A - 1) // 2
    dn = ("NCHW", "OIHW", "NCHW")
    lrelu = lambda t: jnp.where(t >= 0, t, LRELU_SLOPE * t)

    def conv(x, wgt, stride, padding):
        return lax.conv_general_dilated(x, wgt, stride, padding,
                                        dimension_numbers=dn)

    def ps1d(x, r):
        bb, fc, hh, ww = x.shape
        c = fc // r
        return x.reshape(bb, r, c, hh, ww).transpose(0, 2, 3, 4, 1) \
                .reshape(bb, c, hh, ww * r)

    ang2 = lrelu(conv(x_h, raw["epi_v"], (A, 1), ((pad, pad), (0, 0))))
    ang3 = lrelu(conv(x_v, raw["epi_h"], (1, A), ((0, 0), (pad, pad))))
    eh = ps1d(conv(xa, raw["eup"], (1, 1), ((0, 0), (0, 0))), A)
    ev = jnp.transpose(
        ps1d(conv(jnp.transpose(xa, (0, 1, 3, 2)), raw["eup"], (1, 1),
                  ((0, 0), (0, 0))), A), (0, 1, 3, 2))
    c1 = lambda x: conv(x, raw["conv1"], (1, 1), ((0, 0), (0, 0)))
    c2 = lambda x: conv(x, raw["conv2"], (1, 1), ((0, 0), (0, 0)))
    out_a = lrelu(c1(jnp.concatenate([xa, ang2, ang3], 1))) + xa
    out_h = lrelu(c2(jnp.concatenate([ev, x_h], 1))) + x_h
    out_v = lrelu(c2(jnp.concatenate([eh, x_v], 1))) + x_v
    return out_a, out_h, out_v


# ----------------------------------------------------------------------------
if __name__ == "__main__":
    angRes = 5                      # fixed by the module structure
    channels = 32
    b, h, w = 2, 16, 16

    key = jax.random.PRNGKey(0)
    k1, k2, k3, kp = jax.random.split(key, 4)
    xa = jax.random.normal(k1, (b, channels, h, w), jnp.float32)
    x_h = jax.random.normal(k2, (b, channels, angRes * h, w), jnp.float32)
    x_v = jax.random.normal(k3, (b, channels, h, angRes * w), jnp.float32)

    raw, packed = init_params(kp, channels, angRes)

    fwd = jax.jit(functools.partial(a_hv_fuse_forward, angRes=angRes))
    out_a, out_h, out_v = jax.block_until_ready(fwd(packed, xa, x_h, x_v))

    assert out_a.shape == xa.shape, out_a.shape
    assert out_h.shape == x_h.shape, out_h.shape
    assert out_v.shape == x_v.shape, out_v.shape
    assert bool(jnp.all(jnp.isfinite(out_a)))
    assert bool(jnp.all(jnp.isfinite(out_h)))
    assert bool(jnp.all(jnp.isfinite(out_v)))

    # compare against an f32 reference (bf16 MXU operands -> loose tolerance)
    ref_a, ref_h, ref_v = a_hv_fuse_reference(raw, xa, x_h, x_v, angRes)
    for got, ref, name in ((out_a, ref_a, "out_a"), (out_h, ref_h, "out_h"),
                           (out_v, ref_v, "out_v")):
        err = float(jnp.max(jnp.abs(got - ref)))
        assert err < 1e-1, (name, err)

    print("KERNEL_OK")
</pallas_src>

<mosaic_0001>
module attributes {stable_mosaic.version = 11 : i64} {
  func.func @_fused_mm_kernel(%arg0: i32, %arg1: memref<256x32xbf16, #tpu.memory_space<vmem>>, %arg2: memref<32x160xbf16, #tpu.memory_space<vmem>>, %arg3: memref<256x160xbf16, #tpu.memory_space<vmem>>) attributes {dimension_semantics = [#tpu.dimension_semantics<parallel>], iteration_bounds = array<i64: 2>, scalar_prefetch = 0 : i64, scratch_operands = 0 : i64, tpu.core_type = #tpu.core_type<tc>, window_params = [{transform_indices = @transform_0, window_bounds = array<i64: 256, 32>}, {pipeline_mode = #tpu.pipeline_mode<synchronous>, transform_indices = @transform_1, window_bounds = array<i64: 32, 160>}, {transform_indices = @transform_2, window_bounds = array<i64: 256, 160>}]} {
    %c0 = arith.constant 0 : index
    %c0_0 = arith.constant 0 : index
    %0 = vector.load %arg1[%c0, %c0_0] : memref<256x32xbf16, #tpu.memory_space<vmem>>, vector<256x32xbf16>
    %c0_1 = arith.constant 0 : index
    %c0_2 = arith.constant 0 : index
    %1 = vector.load %arg2[%c0_1, %c0_2] : memref<32x160xbf16, #tpu.memory_space<vmem>>, vector<32x160xbf16>
    %cst = arith.constant dense<0.000000e+00> : vector<256x160xf32>
    %2 = tpu.matmul %0, %1, %cst {dimension_numbers = #tpu.dot_dimension_numbers<[1], [0], [0], [1], [0, 0, 1, 1], [], []>} : vector<256x32xbf16>, vector<32x160xbf16>, vector<256x160xf32> -> vector<256x160xf32>
    %3 = arith.truncf %2 : vector<256x160xf32> to vector<256x160xbf16>
    %c0_3 = arith.constant 0 : index
    %c0_4 = arith.constant 0 : index
    %4 = vector.load %arg3[%c0_3, %c0_4] : memref<256x160xbf16, #tpu.memory_space<vmem>>, vector<256x160xbf16>
    tpu.vector_store %arg3[%c0_3, %c0_4], %3 {strides = array<i32>} : memref<256x160xbf16, #tpu.memory_space<vmem>>, vector<256x160xbf16>,
    return
  }
  func.func @transform_0(%arg0: i32) -> (i32, i32) {
    %c0_i32 = arith.constant 0 : i32
    %c0_i32_0 = arith.constant 0 : i32
    return %arg0, %c0_i32 : i32, i32
  }
  func.func @transform_1(%arg0: i32) -> (i32, i32) {
    %c0_i32 = arith.constant 0 : i32
    %c0_i32_0 = arith.constant 0 : i32
    %c0_i32_1 = arith.constant 0 : i32
    return %c0_i32, %c0_i32_0 : i32, i32
  }
  func.func @transform_2(%arg0: i32) -> (i32, i32) {
    %c0_i32 = arith.constant 0 : i32
    %c0_i32_0 = arith.constant 0 : i32
    return %arg0, %c0_i32 : i32, i32
  }
}

module attributes {stable_mosaic.version = 11 : i64} {
  func.func @_epi_kernel(%arg0: i32, %arg1: memref<1x320x160xbf16, #tpu.memory_space<vmem>>, %arg2: memref<5x160x32xbf16, #tpu.memory_space<vmem>>, %arg3: memref<1x256x32xbf16, #tpu.memory_space<vmem>>) attributes {dimension_semantics = [#tpu.dimension_semantics<parallel>], iteration_bounds = array<i64: 2>, scalar_prefetch = 0 : i64, scratch_operands = 0 : i64, tpu.core_type = #tpu.core_type<tc>, window_params = [{transform_indices = @transform_0, window_bounds = array<i64: 1, 320, 160>}, {pipeline_mode = #tpu.pipeline_mode<synchronous>, transform_indices = @transform_1, window_bounds = array<i64: 5, 160, 32>}, {transform_indices = @transform_2, window_bounds = array<i64: 1, 256, 32>}]} {
    %cst = arith.constant 0.000000e+00 : f32
    %0 = vector.broadcast %cst : f32 to vector<256x32xf32>
    %c0 = arith.constant 0 : index
    %c0_0 = arith.constant 0 : index
    %c0_1 = arith.constant 0 : index
    %1 = vector.load %arg1[%c0, %c0_0, %c0_1] : memref<1x320x160xbf16, #tpu.memory_space<vmem>>, vector<1x256x160xbf16>
    %2 = vector.shape_cast %1 : vector<1x256x160xbf16> to vector<256x160xbf16>
    %c0_2 = arith.constant 0 : index
    %c0_3 = arith.constant 0 : index
    %c0_4 = arith.constant 0 : index
    %3 = vector.load %arg2[%c0_2, %c0_3, %c0_4] : memref<5x160x32xbf16, #tpu.memory_space<vmem>>, vector<1x160x32xbf16>
    %4 = vector.shape_cast %3 : vector<1x160x32xbf16> to vector<160x32xbf16>
    %cst_5 = arith.constant dense<0.000000e+00> : vector<256x32xf32>
    %5 = tpu.matmul %2, %4, %cst_5 {dimension_numbers = #tpu.dot_dimension_numbers<[1], [0], [0], [1], [0, 0, 1, 1], [], []>} : vector<256x160xbf16>, vector<160x32xbf16>, vector<256x32xf32> -> vector<256x32xf32>
    %6 = arith.addf %0, %5 : vector<256x32xf32>
    %c0_6 = arith.constant 0 : index
    %c16 = arith.constant 16 : index
    %c0_7 = arith.constant 0 : index
    %7 = vector.load %arg1[%c0_6, %c16, %c0_7] : memref<1x320x160xbf16, #tpu.memory_space<vmem>>, vector<1x256x160xbf16>
    %8 = vector.shape_cast %7 : vector<1x256x160xbf16> to vector<256x160xbf16>
    %c1 = arith.constant 1 : index
    %c0_8 = arith.constant 0 : index
    %c0_9 = arith.constant 0 : index
    %9 = vector.load %arg2[%c1, %c0_8, %c0_9] : memref<5x160x32xbf16, #tpu.memory_space<vmem>>, vector<1x160x32xbf16>
    %10 = vector.shape_cast %9 : vector<1x160x32xbf16> to vector<160x32xbf16>
    %cst_10 = arith.constant dense<0.000000e+00> : vector<256x32xf32>
    %11 = tpu.matmul %8, %10, %cst_10 {dimension_numbers = #tpu.dot_dimension_numbers<[1], [0], [0], [1], [0, 0, 1, 1], [], []>} : vector<256x160xbf16>, vector<160x32xbf16>, vector<256x32xf32> -> vector<256x32xf32>
    %12 = arith.addf %6, %11 : vector<256x32xf32>
    %c0_11 = arith.constant 0 : index
    %c32 = arith.constant 32 : index
    %c0_12 = arith.constant 0 : index
    %13 = vector.load %arg1[%c0_11, %c32, %c0_12] : memref<1x320x160xbf16, #tpu.memory_space<vmem>>, vector<1x256x160xbf16>
    %14 = vector.shape_cast %13 : vector<1x256x160xbf16> to vector<256x160xbf16>
    %c2 = arith.constant 2 : index
    %c0_13 = arith.constant 0 : index
    %c0_14 = arith.constant 0 : index
    %15 = vector.load %arg2[%c2, %c0_13, %c0_14] : memref<5x160x32xbf16, #tpu.memory_space<vmem>>, vector<1x160x32xbf16>
    %16 = vector.shape_cast %15 : vector<1x160x32xbf16> to vector<160x32xbf16>
    %cst_15 = arith.constant dense<0.000000e+00> : vector<256x32xf32>
    %17 = tpu.matmul %14, %16, %cst_15 {dimension_numbers = #tpu.dot_dimension_numbers<[1], [0], [0], [1], [0, 0, 1, 1], [], []>} : vector<256x160xbf16>, vector<160x32xbf16>, vector<256x32xf32> -> vector<256x32xf32>
    %18 = arith.addf %12, %17 : vector<256x32xf32>
    %c0_16 = arith.constant 0 : index
    %c48 = arith.constant 48 : index
    %c0_17 = arith.constant 0 : index
    %19 = vector.load %arg1[%c0_16, %c48, %c0_17] : memref<1x320x160xbf16, #tpu.memory_space<vmem>>, vector<1x256x160xbf16>
    %20 = vector.shape_cast %19 : vector<1x256x160xbf16> to vector<256x160xbf16>
    %c3 = arith.constant 3 : index
    %c0_18 = arith.constant 0 : index
    %c0_19 = arith.constant 0 : index
    %21 = vector.load %arg2[%c3, %c0_18, %c0_19] : memref<5x160x32xbf16, #tpu.memory_space<vmem>>, vector<1x160x32xbf16>
    %22 = vector.shape_cast %21 : vector<1x160x32xbf16> to vector<160x32xbf16>
    %cst_20 = arith.constant dense<0.000000e+00> : vector<256x32xf32>
    %23 = tpu.matmul %20, %22, %cst_20 {dimension_numbers = #tpu.dot_dimension_numbers<[1], [0], [0], [1], [0, 0, 1, 1], [], []>} : vector<256x160xbf16>, vector<160x32xbf16>, vector<256x32xf32> -> vector<256x32xf32>
    %24 = arith.addf %18, %23 : vector<256x32xf32>
    %c0_21 = arith.constant 0 : index
    %c64 = arith.constant 64 : index
    %c0_22 = arith.constant 0 : index
    %25 = vector.load %arg1[%c0_21, %c64, %c0_22] : memref<1x320x160xbf16, #tpu.memory_space<vmem>>, vector<1x256x160xbf16>
    %26 = vector.shape_cast %25 : vector<1x256x160xbf16> to vector<256x160xbf16>
    %c4 = arith.constant 4 : index
    %c0_23 = arith.constant 0 : index
    %c0_24 = arith.constant 0 : index
    %27 = vector.load %arg2[%c4, %c0_23, %c0_24] : memref<5x160x32xbf16, #tpu.memory_space<vmem>>, vector<1x160x32xbf16>
    %28 = vector.shape_cast %27 : vector<1x160x32xbf16> to vector<160x32xbf16>
    %cst_25 = arith.constant dense<0.000000e+00> : vector<256x32xf32>
    %29 = tpu.matmul %26, %28, %cst_25 {dimension_numbers = #tpu.dot_dimension_numbers<[1], [0], [0], [1], [0, 0, 1, 1], [], []>} : vector<256x160xbf16>, vector<160x32xbf16>, vector<256x32xf32> -> vector<256x32xf32>
    %30 = arith.addf %24, %29 : vector<256x32xf32>
    %cst_26 = arith.constant 0.000000e+00 : f32
    %31 = vector.broadcast %cst_26 : f32 to vector<256x32xf32>
    %32 = arith.cmpf oge, %30, %31 : vector<256x32xf32>
    %cst_27 = arith.constant 1.000000e-01 : f32
    %33 = vector.broadcast %cst_27 : f32 to vector<256x32xf32>
    %34 = arith.mulf %33, %30 : vector<256x32xf32>
    %35 = arith.select %32, %30, %34 : vector<256x32xi1>, vector<256x32xf32>
    %36 = arith.truncf %35 : vector<256x32xf32> to vector<256x32xbf16>
    %c0_28 = arith.constant 0 : index
    %c0_29 = arith.constant 0 : index
    %c0_30 = arith.constant 0 : index
    %37 = vector.load %arg3[%c0_28, %c0_29, %c0_30] : memref<1x256x32xbf16, #tpu.memory_space<vmem>>, vector<1x256x32xbf16>
    %38 = vector.shape_cast %37 : vector<1x256x32xbf16> to vector<256x32xbf16>
    %39 = vector.shape_cast %36 : vector<256x32xbf16> to vector<1x256x32xbf16>
    tpu.vector_store %arg3[%c0_28, %c0_29, %c0_30], %39 {strides = array<i32>} : memref<1x256x32xbf16, #tpu.memory_space<vmem>>, vector<1x256x32xbf16>,
    return
  }
  func.func @transform_0(%arg0: i32) -> (i32, i32, i32) {
    %c0_i32 = arith.constant 0 : i32
    %c0_i32_0 = arith.constant 0 : i32
    %c0_i32_1 = arith.constant 0 : i32
    return %arg0, %c0_i32, %c0_i32_0 : i32, i32, i32
  }
  func.func @transform_1(%arg0: i32) -> (i32, i32, i32) {
    %c0_i32 = arith.constant 0 : i32
    %c0_i32_0 = arith.constant 0 : i32
    %c0_i32_1 = arith.constant 0 : i32
    %c0_i32_2 = arith.constant 0 : i32
    return %c0_i32, %c0_i32_0, %c0_i32_1 : i32, i32, i32
  }
  func.func @transform_2(%arg0: i32) -> (i32, i32, i32) {
    %c0_i32 = arith.constant 0 : i32
    %c0_i32_0 = arith.constant 0 : i32
    %c0_i32_1 = arith.constant 0 : i32
    return %arg0, %c0_i32, %c0_i32_0 : i32, i32, i32
  }
}

module attributes {stable_mosaic.version = 11 : i64} {
  func.func @_fused_mm_kernel(%arg0: i32, %arg1: memref<256x32xbf16, #tpu.memory_space<vmem>>, %arg2: memref<256x32xbf16, #tpu.memory_space<vmem>>, %arg3: memref<256x32xbf16, #tpu.memory_space<vmem>>, %arg4: memref<32x32xbf16, #tpu.memory_space<vmem>>, %arg5: memref<32x32xbf16, #tpu.memory_space<vmem>>, %arg6: memref<32x32xbf16, #tpu.memory_space<vmem>>, %arg7: memref<256x32xf32, #tpu.memory_space<vmem>>, %arg8: memref<256x32xf32, #tpu.memory_space<vmem>>) attributes {dimension_semantics = [#tpu.dimension_semantics<parallel>], iteration_bounds = array<i64: 2>, scalar_prefetch = 0 : i64, scratch_operands = 0 : i64, tpu.core_type = #tpu.core_type<tc>, window_params = [{transform_indices = @transform_0, window_bounds = array<i64: 256, 32>}, {transform_indices = @transform_1, window_bounds = array<i64: 256, 32>}, {transform_indices = @transform_2, window_bounds = array<i64: 256, 32>}, {pipeline_mode = #tpu.pipeline_mode<synchronous>, transform_indices = @transform_3, window_bounds = array<i64: 32, 32>}, {pipeline_mode = #tpu.pipeline_mode<synchronous>, transform_indices = @transform_4, window_bounds = array<i64: 32, 32>}, {pipeline_mode = #tpu.pipeline_mode<synchronous>, transform_indices = @transform_5, window_bounds = array<i64: 32, 32>}, {transform_indices = @transform_6, window_bounds = array<i64: 256, 32>}, {transform_indices = @transform_7, window_bounds = array<i64: 256, 32>}]} {
    %c0 = arith.constant 0 : index
    %c0_0 = arith.constant 0 : index
    %0 = vector.load %arg1[%c0, %c0_0] : memref<256x32xbf16, #tpu.memory_space<vmem>>, vector<256x32xbf16>
    %c0_1 = arith.constant 0 : index
    %c0_2 = arith.constant 0 : index
    %1 = vector.load %arg4[%c0_1, %c0_2] : memref<32x32xbf16, #tpu.memory_space<vmem>>, vector<32x32xbf16>
    %cst = arith.constant dense<0.000000e+00> : vector<256x32xf32>
    %2 = tpu.matmul %0, %1, %cst {dimension_numbers = #tpu.dot_dimension_numbers<[1], [0], [0], [1], [0, 0, 1, 1], [], []>} : vector<256x32xbf16>, vector<32x32xbf16>, vector<256x32xf32> -> vector<256x32xf32>
    %c0_3 = arith.constant 0 : index
    %c0_4 = arith.constant 0 : index
    %3 = vector.load %arg2[%c0_3, %c0_4] : memref<256x32xbf16, #tpu.memory_space<vmem>>, vector<256x32xbf16>
    %c0_5 = arith.constant 0 : index
    %c0_6 = arith.constant 0 : index
    %4 = vector.load %arg5[%c0_5, %c0_6] : memref<32x32xbf16, #tpu.memory_space<vmem>>, vector<32x32xbf16>
    %cst_7 = arith.constant dense<0.000000e+00> : vector<256x32xf32>
    %5 = tpu.matmul %3, %4, %cst_7 {dimension_numbers = #tpu.dot_dimension_numbers<[1], [0], [0], [1], [0, 0, 1, 1], [], []>} : vector<256x32xbf16>, vector<32x32xbf16>, vector<256x32xf32> -> vector<256x32xf32>
    %6 = arith.addf %2, %5 : vector<256x32xf32>
    %c0_8 = arith.constant 0 : index
    %c0_9 = arith.constant 0 : index
    %7 = vector.load %arg3[%c0_8, %c0_9] : memref<256x32xbf16, #tpu.memory_space<vmem>>, vector<256x32xbf16>
    %c0_10 = arith.constant 0 : index
    %c0_11 = arith.constant 0 : index
    %8 = vector.load %arg6[%c0_10, %c0_11] : memref<32x32xbf16, #tpu.memory_space<vmem>>, vector<32x32xbf16>
    %cst_12 = arith.constant dense<0.000000e+00> : vector<256x32xf32>
    %9 = tpu.matmul %7, %8, %cst_12 {dimension_numbers = #tpu.dot_dimension_numbers<[1], [0], [0], [1], [0, 0, 1, 1], [], []>} : vector<256x32xbf16>, vector<32x32xbf16>, vector<256x32xf32> -> vector<256x32xf32>
    %10 = arith.addf %6, %9 : vector<256x32xf32>
    %cst_13 = arith.constant 0.000000e+00 : f32
    %11 = vector.broadcast %cst_13 : f32 to vector<256x32xf32>
    %12 = arith.cmpf oge, %10, %11 : vector<256x32xf32>
    %cst_14 = arith.constant 1.000000e-01 : f32
    %13 = vector.broadcast %cst_14 : f32 to vector<256x32xf32>
    %14 = arith.mulf %13, %10 : vector<256x32xf32>
    %15 = arith.select %12, %10, %14 : vector<256x32xi1>, vector<256x32xf32>
    %c0_15 = arith.constant 0 : index
    %c0_16 = arith.constant 0 : index
    %16 = vector.load %arg7[%c0_15, %c0_16] : memref<256x32xf32, #tpu.memory_space<vmem>>, vector<256x32xf32>
    %17 = arith.addf %15, %16 : vector<256x32xf32>
    %c0_17 = arith.constant 0 : index
    %c0_18 = arith.constant 0 : index
    %18 = vector.load %arg8[%c0_17, %c0_18] : memref<256x32xf32, #tpu.memory_space<vmem>>, vector<256x32xf32>
    tpu.vector_store %arg8[%c0_17, %c0_18], %17 {strides = array<i32>} : memref<256x32xf32, #tpu.memory_space<vmem>>, vector<256x32xf32>,
    return
  }
  func.func @transform_0(%arg0: i32) -> (i32, i32) {
    %c0_i32 = arith.constant 0 : i32
    %c0_i32_0 = arith.constant 0 : i32
    return %arg0, %c0_i32 : i32, i32
  }
  func.func @transform_1(%arg0: i32) -> (i32, i32) {
    %c0_i32 = arith.constant 0 : i32
    %c0_i32_0 = arith.constant 0 : i32
    return %arg0, %c0_i32 : i32, i32
  }
  func.func @transform_2(%arg0: i32) -> (i32, i32) {
    %c0_i32 = arith.constant 0 : i32
    %c0_i32_0 = arith.constant 0 : i32
    return %arg0, %c0_i32 : i32, i32
  }
  func.func @transform_3(%arg0: i32) -> (i32, i32) {
    %c0_i32 = arith.constant 0 : i32
    %c0_i32_0 = arith.constant 0 : i32
    %c0_i32_1 = arith.constant 0 : i32
    return %c0_i32, %c0_i32_0 : i32, i32
  }
  func.func @transform_4(%arg0: i32) -> (i32, i32) {
    %c0_i32 = arith.constant 0 : i32
    %c0_i32_0 = arith.constant 0 : i32
    %c0_i32_1 = arith.constant 0 : i32
    return %c0_i32, %c0_i32_0 : i32, i32
  }
  func.func @transform_5(%arg0: i32) -> (i32, i32) {
    %c0_i32 = arith.constant 0 : i32
    %c0_i32_0 = arith.constant 0 : i32
    %c0_i32_1 = arith.constant 0 : i32
    return %c0_i32, %c0_i32_0 : i32, i32
  }
  func.func @transform_6(%arg0: i32) -> (i32, i32) {
    %c0_i32 = arith.constant 0 : i32
    %c0_i32_0 = arith.constant 0 : i32
    return %arg0, %c0_i32 : i32, i32
  }
  func.func @transform_7(%arg0: i32) -> (i32, i32) {
    %c0_i32 = arith.constant 0 : i32
    %c0_i32_0 = arith.constant 0 : i32
    return %arg0, %c0_i32 : i32, i32
  }
}

module attributes {stable_mosaic.version = 11 : i64} {
  func.func @_fused_mm_kernel(%arg0: i32, %arg1: memref<512x32xbf16, #tpu.memory_space<vmem>>, %arg2: memref<512x32xbf16, #tpu.memory_space<vmem>>, %arg3: memref<32x32xbf16, #tpu.memory_space<vmem>>, %arg4: memref<32x32xbf16, #tpu.memory_space<vmem>>, %arg5: memref<512x32xf32, #tpu.memory_space<vmem>>, %arg6: memref<512x32xf32, #tpu.memory_space<vmem>>) attributes {dimension_semantics = [#tpu.dimension_semantics<parallel>], iteration_bounds = array<i64: 10>, scalar_prefetch = 0 : i64, scratch_operands = 0 : i64, tpu.core_type = #tpu.core_type<tc>, window_params = [{transform_indices = @transform_0, window_bounds = array<i64: 512, 32>}, {transform_indices = @transform_1, window_bounds = array<i64: 512, 32>}, {pipeline_mode = #tpu.pipeline_mode<synchronous>, transform_indices = @transform_2, window_bounds = array<i64: 32, 32>}, {pipeline_mode = #tpu.pipeline_mode<synchronous>, transform_indices = @transform_3, window_bounds = array<i64: 32, 32>}, {transform_indices = @transform_4, window_bounds = array<i64: 512, 32>}, {transform_indices = @transform_5, window_bounds = array<i64: 512, 32>}]} {
    %c0 = arith.constant 0 : index
    %c0_0 = arith.constant 0 : index
    %0 = vector.load %arg1[%c0, %c0_0] : memref<512x32xbf16, #tpu.memory_space<vmem>>, vector<512x32xbf16>
    %c0_1 = arith.constant 0 : index
    %c0_2 = arith.constant 0 : index
    %1 = vector.load %arg3[%c0_1, %c0_2] : memref<32x32xbf16, #tpu.memory_space<vmem>>, vector<32x32xbf16>
    %cst = arith.constant dense<0.000000e+00> : vector<512x32xf32>
    %2 = tpu.matmul %0, %1, %cst {dimension_numbers = #tpu.dot_dimension_numbers<[1], [0], [0], [1], [0, 0, 1, 1], [], []>} : vector<512x32xbf16>, vector<32x32xbf16>, vector<512x32xf32> -> vector<512x32xf32>
    %c0_3 = arith.constant 0 : index
    %c0_4 = arith.constant 0 : index
    %3 = vector.load %arg2[%c0_3, %c0_4] : memref<512x32xbf16, #tpu.memory_space<vmem>>, vector<512x32xbf16>
    %c0_5 = arith.constant 0 : index
    %c0_6 = arith.constant 0 : index
    %4 = vector.load %arg4[%c0_5, %c0_6] : memref<32x32xbf16, #tpu.memory_space<vmem>>, vector<32x32xbf16>
    %cst_7 = arith.constant dense<0.000000e+00> : vector<512x32xf32>
    %5 = tpu.matmul %3, %4, %cst_7 {dimension_numbers = #tpu.dot_dimension_numbers<[1], [0], [0], [1], [0, 0, 1, 1], [], []>} : vector<512x32xbf16>, vector<32x32xbf16>, vector<512x32xf32> -> vector<512x32xf32>
    %6 = arith.addf %2, %5 : vector<512x32xf32>
    %cst_8 = arith.constant 0.000000e+00 : f32
    %7 = vector.broadcast %cst_8 : f32 to vector<512x32xf32>
    %8 = arith.cmpf oge, %6, %7 : vector<512x32xf32>
    %cst_9 = arith.constant 1.000000e-01 : f32
    %9 = vector.broadcast %cst_9 : f32 to vector<512x32xf32>
    %10 = arith.mulf %9, %6 : vector<512x32xf32>
    %11 = arith.select %8, %6, %10 : vector<512x32xi1>, vector<512x32xf32>
    %c0_10 = arith.constant 0 : index
    %c0_11 = arith.constant 0 : index
    %12 = vector.load %arg5[%c0_10, %c0_11] : memref<512x32xf32, #tpu.memory_space<vmem>>, vector<512x32xf32>
    %13 = arith.addf %11, %12 : vector<512x32xf32>
    %c0_12 = arith.constant 0 : index
    %c0_13 = arith.constant 0 : index
    %14 = vector.load %arg6[%c0_12, %c0_13] : memref<512x32xf32, #tpu.memory_space<vmem>>, vector<512x32xf32>
    tpu.vector_store %arg6[%c0_12, %c0_13], %13 {strides = array<i32>} : memref<512x32xf32, #tpu.memory_space<vmem>>, vector<512x32xf32>,
    return
  }
  func.func @transform_0(%arg0: i32) -> (i32, i32) {
    %c0_i32 = arith.constant 0 : i32
    %c0_i32_0 = arith.constant 0 : i32
    return %arg0, %c0_i32 : i32, i32
  }
  func.func @transform_1(%arg0: i32) -> (i32, i32) {
    %c0_i32 = arith.constant 0 : i32
    %c0_i32_0 = arith.constant 0 : i32
    return %arg0, %c0_i32 : i32, i32
  }
  func.func @transform_2(%arg0: i32) -> (i32, i32) {
    %c0_i32 = arith.constant 0 : i32
    %c0_i32_0 = arith.constant 0 : i32
    %c0_i32_1 = arith.constant 0 : i32
    return %c0_i32, %c0_i32_0 : i32, i32
  }
  func.func @transform_3(%arg0: i32) -> (i32, i32) {
    %c0_i32 = arith.constant 0 : i32
    %c0_i32_0 = arith.constant 0 : i32
    %c0_i32_1 = arith.constant 0 : i32
    return %c0_i32, %c0_i32_0 : i32, i32
  }
  func.func @transform_4(%arg0: i32) -> (i32, i32) {
    %c0_i32 = arith.constant 0 : i32
    %c0_i32_0 = arith.constant 0 : i32
    return %arg0, %c0_i32 : i32, i32
  }
  func.func @transform_5(%arg0: i32) -> (i32, i32) {
    %c0_i32 = arith.constant 0 : i32
    %c0_i32_0 = arith.constant 0 : i32
    return %arg0, %c0_i32 : i32, i32
  }
}

</mosaic_0001>

<bundles_post_ra>
// kernel: a_hv_fuse_forward.7
= control target key start
LH: loop header
LB: loop body
LE: loop exit
PB: predicated region body
PF: predicated region fallthrough
CT: control target
= control target key end

     0   :  { %7 = vsyncpa [#allocation3], 0  ;;  %s1062_s9 = smov 0   ;;  %s1261_s0 = inlined_call_operand.vmem [shape: bf16[512,32], index: 0, kind: input, shape index: {}]   ;;  %s1262_s1 = inlined_call_operand.hbm [shape: bf16[32,160], index: 1, kind: input, shape index: {}]   ;;  %s1263_s2 = inlined_call_operand.vmem [shape: bf16[512,160], index: 2, kind: output, shape index: {}]  }
   0x1 LB: > { %s840_s10 = sadd.s32 4294967295, %s1041_s9   ;;  %p842_p0 = scmp.ge.s32.totalorder %s1041_s9, 1  ;;  %s1041_s9 = sphi %s1062_s9, %s13_s9  }
   0x2   : > { %p91_p1 = scmp.lt.s32.totalorder %s1041_s9, 3  ;;  %s1043_s11 = smov [#allocation2]  }
   0x3   : > { %s103_s12 = sshll.u32 %s1043_s11, 4  ;;  %p1076_p3 = scmp.eq.s32.totalorder %s840_s10, 0  ;;  %s104_s12 = int_to_ptr.vmem [resolvable:$true] %s103_s12 }
   0x4   : > { %p1070_p2 = pnand %p842_p0, %p91_p1  ;;  %s1003_s18 = scalar_lea.hbm %s1262_s1, 512 }
   0x5   : > { %s1268_s14 = scalar_select %p1076_p3, 1, 0 }
   0x6   : > { %s1267_s13 = scalar_select %p1070_p2, 1, 0 }
   0x7   : > { %p963_p4 = pneg %p1070_p2  ;;  %p1004_p6 = scmp.ne.s32.totalorder %s1262_s1, %s1003_s18 }
   0x8   : > { %p1010_p10 = scmp.lt.u32.totalorder %s1003_s18, %s1262_s1 }
   0x9   : > { %p1084_p5 = pnand %p1076_p3, %p963_p4 }
   0xb   : > { %p1005_p7 = pneg %p1084_p5 }
   0xd   : > { %p1006_p8 = pnand %p1005_p7, %p1004_p6 }
   0xf   : > { %p1007_p9 = pneg %p1006_p8 }
  0x11   : > { %p1012_p11 = pnand %p1010_p10, %p1007_p9 }
  0x13   : > { %1015 = shalt.err (!%p1012_p11)
}
  0x14   : > { %s1016_s23 = scalar_lea.vmem %s104_s12, 512  ;;  %p1024_p1 = scmp.lt.s32.totalorder %s104_s12, %s104_s12 }
  0x15   : > { %p1017_p12 = scmp.ne.s32.totalorder %s104_s12, %s1016_s23  ;;  %p1025_p4 = scmp.lt.s32.totalorder %s1016_s23, %s1016_s23 }
  0x17   : > { %p1019_p13 = pnand %p1017_p12, %p1005_p7  ;;  %p1026_p3 = por %p1025_p4, %p1024_p1 }
  0x19   : > { %p1020_p0 = pneg %p1019_p13 }
  0x1b   : > { %p1027_p2 = pnand %p1026_p3, %p1020_p0 }
  0x1d   : > { %1030 = shalt.err (!%p1027_p2)
}
  0x1e   : > { %s1044_s24 = smov 128   ;;  %s1045_s25 = smov 8  }
  0x1f   : > { %966 = dma.hbm_to_vmem [thread:$0]  (!%p1084_p5), %s1262_s1, 512, %s104_s12, [#allocation3], %s1044_s24, %s1044_s24, %s1045_s25  }
  0x20   : > { %p1270_p6 = scmp.ne.s32.totalorder %s1267_s13, 0 }
  0x21   : > { %p1271_p8 = scmp.ne.s32.totalorder (!%p1270_p6), %s1268_s14, 0 }
  0x22   : > { %128 = sbr.rel (%p1270_p6) target bundleno = 326 (0x146), region = 28 }
  0x29   : > { %1036 = dma.done.wait (%p1271_p8), [#allocation3], 512  }
  0x2a   : > { %1038 = vsyncadd (%p1271_p8), [#allocation3], 4294966784  ;;  %s847_s28 = sshll.u32 %s840_s10, 5  ;;  %v1046_v0 = vmov 0   ;;  %v981_v1 = vld [vmem:[#allocation2 + $0x4] ss:$8 sps:$4 sm:$0xff]  }
  0x2b   : > { %382 = vmatprep.mubr.bf16.mxu0 %v1046_v0  ;;  %462 = vmatprep.mubr.bf16.mxu1 %v1046_v0  ;;  %p152_p2 = scmp.lt.s32.totalorder %s847_s28, 63  ;;  %v983_v2 = vld [vmem:[#allocation2] ss:$8 sps:$4 sm:$0xff]   ;;  %v984_v3 = vld [vmem:[#allocation2 + $0x14] ss:$8 sps:$4 sm:$0xff]   ;;  %vm301_vm0 = vcmask 261120  }
  0x2c   : > { %350 = vmatprep.subr.bf16.mxu0 %v981_v1  ;;  %955 = vmatprep.subr.bf16.mxu1 %v981_v1  ;;  %v986_v4 = vld [vmem:[#allocation2 + $0x10] ss:$8 sps:$4 sm:$0xff]   ;;  %vm735_vm1 = vcmask 1043456   ;;  %vm736_vm2 = vcmask 261124  }
  0x2d   : > { %s1275_s28 = smov (!%p152_p2, %s847_s28), 63  ;;  %351 = vmatpush1.bf16.msra.mxu0 %v983_v2  ;;  %957 = vmatpush1.bf16.msra.mxu1 %v983_v2  ;;  %vm1158_vm3 = vmor %vm736_vm2, %vm735_vm1 }
  0x2e   : > { %s848_s29 = sshll.u32 %s1275_s28, 2  ;;  %352 = vmatprep.subr.bf16.mxu0 %v984_v3  ;;  %956 = vmatprep.subr.bf16.mxu1 %v984_v3  ;;  %s922_s5 = sshll.u32 %s1275_s28, 3 }
  0x2f   : > { %s1118_s4 = scalar_lea.vmem %s1261_s0, %s848_s29  ;;  %s1156_s8 = scalar_lea.vmem %s1263_s2, %s922_s5 }
  0x30   : > { %v987_v5 = vld [vmem:[%s1118_s4] sm:$0xff]   ;;  %v989_v7 = vld [vmem:[%s1118_s4 + $0x8] sm:$0xff]   ;;  %v991_v9 = vld [vmem:[%s1118_s4 + $0x10] sm:$0xff]  }
  0x31   : > { %v988_v6 = vld [vmem:[%s1118_s4 + $0x40] sm:$0xff]   ;;  %353 = vmatpush1.bf16.msra.mxu0 %v986_v4  ;;  %958 = vmatpush1.bf16.msra.mxu1 %v986_v4  ;;  %v990_v8 = vld [vmem:[%s1118_s4 + $0x48] sm:$0xff]   ;;  %v992_v10 = vld [vmem:[%s1118_s4 + $0x50] sm:$0xff]  }
  0x32   : > { %v993_v11 = vld [vmem:[%s1118_s4 + $0x18] sm:$0xff]   ;;  %v995_v13 = vld [vmem:[%s1118_s4 + $0x20] sm:$0xff]   ;;  %v997_v15 = vld [vmem:[%s1118_s4 + $0x28] sm:$0xff]  }
  0x33   : > { %v994_v12 = vld [vmem:[%s1118_s4 + $0x58] sm:$0xff]   ;;  %v996_v14 = vld [vmem:[%s1118_s4 + $0x60] sm:$0xff]   ;;  %v998_v16 = vld [vmem:[%s1118_s4 + $0x68] sm:$0xff]  }
  0x34   : > { %872 = vmatmul.mubr.msk.bf16.vlgmr.msra.gmra.mrb[0].mxu0 %vm301_vm0, %v987_v5  ;;  %880 = vmatmul.mubr.msk.bf16.vlgmr.msra.gmra.mrb[0].mxu1 %vm301_vm0, %v988_v6  ;;  %v999_v17 = vld [vmem:[%s1118_s4 + $0x30] sm:$0xff]   ;;  %v1001_v19 = vld [vmem:[%s1118_s4 + $0x38] sm:$0xff]  }
  0x35   : > { %392 = vmatprep.mubr.bf16.mxu0 %v1046_v0  ;;  %472 = vmatprep.mubr.bf16.mxu1 %v1046_v0  ;;  %v1000_v18 = vld [vmem:[%s1118_s4 + $0x70] sm:$0xff]   ;;  %v1002_v20 = vld [vmem:[%s1118_s4 + $0x78] sm:$0xff]  }
  0x3c   : > { %873 = vmatmul.mubr.msk.bf16.gmra.mrb[4].mxu0 %vm301_vm0, %v989_v7  ;;  %881 = vmatmul.mubr.msk.bf16.gmra.mrb[4].mxu1 %vm301_vm0, %v990_v8 }
  0x3d   : > { %402 = vmatprep.mubr.bf16.mxu0 %v1046_v0  ;;  %482 = vmatprep.mubr.bf16.mxu1 %v1046_v0 }
  0x44   : > { %874 = vmatmul.mubr.msk.bf16.gmra.mrb[8].mxu0 %vm301_vm0, %v991_v9  ;;  %882 = vmatmul.mubr.msk.bf16.gmra.mrb[8].mxu1 %vm301_vm0, %v992_v10 }
  0x45   : > { %412 = vmatprep.mubr.bf16.mxu0 %v1046_v0  ;;  %492 = vmatprep.mubr.bf16.mxu1 %v1046_v0 }
  0x4c   : > { %875 = vmatmul.mubr.msk.bf16.gmra.mrb[12].mxu0 %vm301_vm0, %v993_v11  ;;  %883 = vmatmul.mubr.msk.bf16.gmra.mrb[12].mxu1 %vm301_vm0, %v994_v12 }
  0x4d   : > { %422 = vmatprep.mubr.bf16.mxu0 %v1046_v0  ;;  %502 = vmatprep.mubr.bf16.mxu1 %v1046_v0 }
  0x54   : > { %876 = vmatmul.mubr.msk.bf16.gmra.mrb[16].mxu0 %vm301_vm0, %v995_v13  ;;  %884 = vmatmul.mubr.msk.bf16.gmra.mrb[16].mxu1 %vm301_vm0, %v996_v14 }
  0x55   : > { %432 = vmatprep.mubr.bf16.mxu0 %v1046_v0  ;;  %512 = vmatprep.mubr.bf16.mxu1 %v1046_v0 }
  0x5c   : > { %877 = vmatmul.mubr.msk.bf16.gmra.mrb[20].mxu0 %vm301_vm0, %v997_v15  ;;  %885 = vmatmul.mubr.msk.bf16.gmra.mrb[20].mxu1 %vm301_vm0, %v998_v16 }
  0x5d   : > { %442 = vmatprep.mubr.bf16.mxu0 %v1046_v0  ;;  %522 = vmatprep.mubr.bf16.mxu1 %v1046_v0 }
  0x64   : > { %878 = vmatmul.mubr.msk.bf16.gmra.mrb[24].mxu0 %vm301_vm0, %v999_v17  ;;  %886 = vmatmul.mubr.msk.bf16.gmra.mrb[24].mxu1 %vm301_vm0, %v1000_v18 }
  0x65   : > { %452 = vmatprep.mubr.bf16.mxu0 %v1046_v0  ;;  %532 = vmatprep.mubr.bf16.mxu1 %v1046_v0 }
  0x6c   : > { %879 = vmatmul.mubr.msk.bf16.gmra.mrb[28].mxu0 %vm301_vm0, %v1001_v19  ;;  %887 = vmatmul.mubr.msk.bf16.gmra.mrb[28].mxu1 %vm301_vm0, %v1002_v20 }
 0x107   : > { %v384_v21 = vpop.f32.mrb[0].mxu0  ;;  %v464_v22 = vpop.f32.mrb[0].mxu1 }
 0x108   : > { %v386_v23 = vpop.f32.mrb[1].mxu0  ;;  %v466_v25 = vpop.f32.mrb[1].mxu1 }
 0x109   : > { %v923_v26 = vpack.c.bf16 %v386_v23, %v384_v21  ;;  %v939_v27 = vpack.c.bf16 %v466_v25, %v464_v22  ;;  %v388_v28 = vpop.f32.mrb[2].mxu0  ;;  %v468_v29 = vpop.f32.mrb[2].mxu1 }
 0x10a   : > { %v390_v30 = vpop.f32.mrb[3].mxu0  ;;  %v470_v31 = vpop.f32.mrb[3].mxu1 }
 0x10b   : > { %738 = vst.msk [vmem:[%s1156_s8] sm:$0xff] %vm1158_vm3, %v923_v26  ;;  %754 = vst.msk [vmem:[%s1156_s8 + $0x80] sm:$0xff] %vm1158_vm3, %v939_v27  ;;  %v924_v32 = vpack.c.bf16 %v390_v30, %v388_v28  ;;  %v940_v33 = vpack.c.bf16 %v470_v31, %v468_v29 }
 0x10d   : > { %739 = vst.msk [vmem:[%s1156_s8 + $0x8] sm:$0xff] %vm1158_vm3, %v924_v32  ;;  %755 = vst.msk [vmem:[%s1156_s8 + $0x88] sm:$0xff] %vm1158_vm3, %v940_v33 }
 0x10f   : > { %v394_v34 = vpop.f32.mrb[4].mxu0  ;;  %v474_v35 = vpop.f32.mrb[4].mxu1 }
 0x110   : > { %v396_v36 = vpop.f32.mrb[5].mxu0  ;;  %v476_v37 = vpop.f32.mrb[5].mxu1 }
 0x111   : > { %v925_v38 = vpack.c.bf16 %v396_v36, %v394_v34  ;;  %v941_v39 = vpack.c.bf16 %v476_v37, %v474_v35  ;;  %v398_v40 = vpop.f32.mrb[6].mxu0  ;;  %v478_v41 = vpop.f32.mrb[6].mxu1 }
 0x112   : > { %v400_v42 = vpop.f32.mrb[7].mxu0  ;;  %v480_v43 = vpop.f32.mrb[7].mxu1 }
 0x113   : > { %740 = vst.msk [vmem:[%s1156_s8 + $0x10] sm:$0xff] %vm1158_vm3, %v925_v38  ;;  %756 = vst.msk [vmem:[%s1156_s8 + $0x90] sm:$0xff] %vm1158_vm3, %v941_v39  ;;  %v926_v44 = vpack.c.bf16 %v400_v42, %v398_v40  ;;  %v942_v45 = vpack.c.bf16 %v480_v43, %v478_v41 }
 0x115   : > { %741 = vst.msk [vmem:[%s1156_s8 + $0x18] sm:$0xff] %vm1158_vm3, %v926_v44  ;;  %757 = vst.msk [vmem:[%s1156_s8 + $0x98] sm:$0xff] %vm1158_vm3, %v942_v45 }
 0x117   : > { %v404_v46 = vpop.f32.mrb[8].mxu0  ;;  %v484_v47 = vpop.f32.mrb[8].mxu1 }
 0x118   : > { %v406_v48 = vpop.f32.mrb[9].mxu0  ;;  %v486_v49 = vpop.f32.mrb[9].mxu1 }
 0x119   : > { %v927_v50 = vpack.c.bf16 %v406_v48, %v404_v46  ;;  %v943_v51 = vpack.c.bf16 %v486_v49, %v484_v47  ;;  %v408_v52 = vpop.f32.mrb[10].mxu0  ;;  %v488_v53 = vpop.f32.mrb[10].mxu1 }
 0x11a   : > { %v410_v54 = vpop.f32.mrb[11].mxu0  ;;  %v490_v55 = vpop.f32.mrb[11].mxu1 }
 0x11b   : > { %742 = vst.msk [vmem:[%s1156_s8 + $0x20] sm:$0xff] %vm1158_vm3, %v927_v50  ;;  %758 = vst.msk [vmem:[%s1156_s8 + $0xa0] sm:$0xff] %vm1158_vm3, %v943_v51  ;;  %v928_v56 = vpack.c.bf16 %v410_v54, %v408_v52  ;;  %v944_v57 = vpack.c.bf16 %v490_v55, %v488_v53 }
 0x11d   : > { %743 = vst.msk [vmem:[%s1156_s8 + $0x28] sm:$0xff] %vm1158_vm3, %v928_v56  ;;  %759 = vst.msk [vmem:[%s1156_s8 + $0xa8] sm:$0xff] %vm1158_vm3, %v944_v57 }
 0x11f   : > { %v414_v58 = vpop.f32.mrb[12].mxu0  ;;  %v494_v59 = vpop.f32.mrb[12].mxu1 }
 0x120   : > { %v416_v60 = vpop.f32.mrb[13].mxu0  ;;  %v496_v61 = vpop.f32.mrb[13].mxu1 }
 0x121   : > { %v929_v62 = vpack.c.bf16 %v416_v60, %v414_v58  ;;  %v945_v63 = vpack.c.bf16 %v496_v61, %v494_v59  ;;  %v418_v0 = vpop.f32.mrb[14].mxu0  ;;  %v498_v1 = vpop.f32.mrb[14].mxu1 }
 0x122   : > { %v420_v2 = vpop.f32.mrb[15].mxu0  ;;  %v500_v3 = vpop.f32.mrb[15].mxu1 }
 0x123   : > { %744 = vst.msk [vmem:[%s1156_s8 + $0x30] sm:$0xff] %vm1158_vm3, %v929_v62  ;;  %760 = vst.msk [vmem:[%s1156_s8 + $0xb0] sm:$0xff] %vm1158_vm3, %v945_v63  ;;  %v930_v4 = vpack.c.bf16 %v420_v2, %v418_v0  ;;  %v946_v5 = vpack.c.bf16 %v500_v3, %v498_v1 }
 0x125   : > { %745 = vst.msk [vmem:[%s1156_s8 + $0x38] sm:$0xff] %vm1158_vm3, %v930_v4  ;;  %761 = vst.msk [vmem:[%s1156_s8 + $0xb8] sm:$0xff] %vm1158_vm3, %v946_v5 }
 0x127   : > { %v424_v6 = vpop.f32.mrb[16].mxu0  ;;  %v504_v7 = vpop.f32.mrb[16].mxu1 }
 0x128   : > { %v426_v8 = vpop.f32.mrb[17].mxu0  ;;  %v506_v9 = vpop.f32.mrb[17].mxu1 }
 0x129   : > { %v931_v10 = vpack.c.bf16 %v426_v8, %v424_v6  ;;  %v947_v11 = vpack.c.bf16 %v506_v9, %v504_v7  ;;  %v428_v12 = vpop.f32.mrb[18].mxu0  ;;  %v508_v13 = vpop.f32.mrb[18].mxu1 }
 0x12a   : > { %v430_v14 = vpop.f32.mrb[19].mxu0  ;;  %v510_v15 = vpop.f32.mrb[19].mxu1 }
 0x12b   : > { %746 = vst.msk [vmem:[%s1156_s8 + $0x40] sm:$0xff] %vm1158_vm3, %v931_v10  ;;  %762 = vst.msk [vmem:[%s1156_s8 + $0xc0] sm:$0xff] %vm1158_vm3, %v947_v11  ;;  %v932_v16 = vpack.c.bf16 %v430_v14, %v428_v12  ;;  %v948_v17 = vpack.c.bf16 %v510_v15, %v508_v13 }
 0x12d   : > { %747 = vst.msk [vmem:[%s1156_s8 + $0x48] sm:$0xff] %vm1158_vm3, %v932_v16  ;;  %763 = vst.msk [vmem:[%s1156_s8 + $0xc8] sm:$0xff] %vm1158_vm3, %v948_v17 }
 0x12f   : > { %v434_v18 = vpop.f32.mrb[20].mxu0  ;;  %v514_v19 = vpop.f32.mrb[20].mxu1 }
 0x130   : > { %v436_v20 = vpop.f32.mrb[21].mxu0  ;;  %v516_v21 = vpop.f32.mrb[21].mxu1 }
 0x131   : > { %v933_v22 = vpack.c.bf16 %v436_v20, %v434_v18  ;;  %v949_v23 = vpack.c.bf16 %v516_v21, %v514_v19  ;;  %v438_v25 = vpop.f32.mrb[22].mxu0  ;;  %v518_v26 = vpop.f32.mrb[22].mxu1 }
 0x132   : > { %v440_v27 = vpop.f32.mrb[23].mxu0  ;;  %v520_v28 = vpop.f32.mrb[23].mxu1 }
 0x133   : > { %748 = vst.msk [vmem:[%s1156_s8 + $0x50] sm:$0xff] %vm1158_vm3, %v933_v22  ;;  %764 = vst.msk [vmem:[%s1156_s8 + $0xd0] sm:$0xff] %vm1158_vm3, %v949_v23  ;;  %v934_v29 = vpack.c.bf16 %v440_v27, %v438_v25  ;;  %v950_v30 = vpack.c.bf16 %v520_v28, %v518_v26 }
 0x135   : > { %749 = vst.msk [vmem:[%s1156_s8 + $0x58] sm:$0xff] %vm1158_vm3, %v934_v29  ;;  %765 = vst.msk [vmem:[%s1156_s8 + $0xd8] sm:$0xff] %vm1158_vm3, %v950_v30 }
 0x137   : > { %v444_v31 = vpop.f32.mrb[24].mxu0  ;;  %v524_v32 = vpop.f32.mrb[24].mxu1 }
 0x138   : > { %v446_v33 = vpop.f32.mrb[25].mxu0  ;;  %v526_v34 = vpop.f32.mrb[25].mxu1 }
 0x139   : > { %v935_v35 = vpack.c.bf16 %v446_v33, %v444_v31  ;;  %v951_v36 = vpack.c.bf16 %v526_v34, %v524_v32  ;;  %v448_v37 = vpop.f32.mrb[26].mxu0  ;;  %v528_v38 = vpop.f32.mrb[26].mxu1 }
 0x13a   : > { %v450_v39 = vpop.f32.mrb[27].mxu0  ;;  %v530_v40 = vpop.f32.mrb[27].mxu1 }
 0x13b   : > { %750 = vst.msk [vmem:[%s1156_s8 + $0x60] sm:$0xff] %vm1158_vm3, %v935_v35  ;;  %766 = vst.msk [vmem:[%s1156_s8 + $0xe0] sm:$0xff] %vm1158_vm3, %v951_v36  ;;  %v936_v41 = vpack.c.bf16 %v450_v39, %v448_v37  ;;  %v952_v42 = vpack.c.bf16 %v530_v40, %v528_v38 }
 0x13d   : > { %751 = vst.msk [vmem:[%s1156_s8 + $0x68] sm:$0xff] %vm1158_vm3, %v936_v41  ;;  %767 = vst.msk [vmem:[%s1156_s8 + $0xe8] sm:$0xff] %vm1158_vm3, %v952_v42 }
 0x13f   : > { %v454_v43 = vpop.f32.mrb[28].mxu0  ;;  %v534_v44 = vpop.f32.mrb[28].mxu1 }
 0x140   : > { %v456_v45 = vpop.f32.mrb[29].mxu0  ;;  %v536_v46 = vpop.f32.mrb[29].mxu1 }
 0x141   : > { %v937_v47 = vpack.c.bf16 %v456_v45, %v454_v43  ;;  %v953_v48 = vpack.c.bf16 %v536_v46, %v534_v44  ;;  %v458_v49 = vpop.f32.mrb[30].mxu0  ;;  %v538_v50 = vpop.f32.mrb[30].mxu1 }
 0x142   : > { %v460_v51 = vpop.f32.mrb[31].mxu0  ;;  %v540_v52 = vpop.f32.mrb[31].mxu1 }
 0x143   : > { %752 = vst.msk [vmem:[%s1156_s8 + $0x70] sm:$0xff] %vm1158_vm3, %v937_v47  ;;  %768 = vst.msk [vmem:[%s1156_s8 + $0xf0] sm:$0xff] %vm1158_vm3, %v953_v48  ;;  %v938_v53 = vpack.c.bf16 %v460_v51, %v458_v49  ;;  %v954_v54 = vpack.c.bf16 %v540_v52, %v538_v50 }
 0x145   : > { %753 = vst.msk [vmem:[%s1156_s8 + $0x78] sm:$0xff] %vm1158_vm3, %v938_v53  ;;  %769 = vst.msk [vmem:[%s1156_s8 + $0xf8] sm:$0xff] %vm1158_vm3, %v954_v54 }
 0x146 PF: > { %s13_s9 = sadd.s32 1, %s1041_s9  }
 0x147   : > { %p10_p3 = scmp.ge.s32.totalorder %s13_s9, 4  }
 0x149   :  { %12 = sbr.rel (!%p10_p3) target bundleno = 1 (0x1), region = 63 }
 0x150   :  { %794 = vsyncpa [#allocation3], 1 }
 0x151   :  { %796 = vsyncpa [#allocation3 + $0x1], 1 }

// kernel: a_hv_fuse_forward.6
= control target key start
LH: loop header
LB: loop body
LE: loop exit
PB: predicated region body
PF: predicated region fallthrough
CT: control target
= control target key end

     0   :  { %s3476_s9 = smov 0   ;;  %s4192_s0 = inlined_call_operand.vmem [shape: bf16[2,320,160], index: 0, kind: input, shape index: {}]   ;;  %s4193_s1 = inlined_call_operand.vmem [shape: bf16[5,160,32], index: 1, kind: input, shape index: {}]   ;;  %s4194_s2 = inlined_call_operand.vmem [shape: bf16[2,256,32], index: 2, kind: output, shape index: {}]  }
   0x1 LB: > { %s2673_s10 = sadd.s32 4294967295, %s3458_s9   ;;  %p2677_p0 = scmp.ge.s32.totalorder %s3458_s9, 1  ;;  %s3458_s9 = sphi %s3476_s9, %s12_s9  }
   0x2   : > { %p112_p1 = scmp.lt.s32.totalorder %s3458_s9, 3 }
   0x4   : > { %p113_p2 = pnand %p2677_p0, %p112_p1 }
   0x5   : > { %v3342_v0 = vld [vmem:[%s4193_s1 + $0x50] sm:$0xff] (!%p113_p2)   ;;  %v3460_v1 = vmov (!%p113_p2), 0   ;;  %v3492_v2 = vld [vmem:[%s4193_s1 + $0xa0] sm:$0xff] (!%p113_p2)   ;;  %v3344_v3 = vld [vmem:[%s4193_s1 + $0x58] sm:$0xff] (!%p113_p2)   ;;  %p134_p3 = scmp.lt.s32.totalorder (!%p113_p2), %s2673_s10, 1  ;;  %vm424_vm0 = vcmask (!%p113_p2), 261120  }
   0x6   : > { %116 = sbr.rel (%p113_p2) target bundleno = 581 (0x245), region = 28  ;;  %473 = vmatprep.subr.bf16.mxu1 (!%p113_p2), %v3460_v1  ;;  %1172 = vmatprep.subr.bf16.mxu0 (!%p113_p2), %v3460_v1  ;;  %v3502_v4 = vld [vmem:[%s4193_s1 + $0xa8] sm:$0xff] (!%p113_p2)   ;;  %v3346_v5 = vld [vmem:[%s4193_s1 + $0x60] sm:$0xff] (!%p113_p2)   ;;  %v3513_v6 = vld [vmem:[%s4193_s1 + $0xb0] sm:$0xff] (!%p113_p2)   ;;  %vm2585_vm2 = vcmask (!%p113_p2), 257024  }
   0x7   : > { %474 = vmatpush1.bf16.msra.mxu1 (!%p113_p2), %v3342_v0  ;;  %1173 = vmatpush1.bf16.msra.mxu0 (!%p113_p2), %v3492_v2  ;;  %v3348_v7 = vld [vmem:[%s4193_s1 + $0x68] sm:$0xff] (!%p113_p2)   ;;  %v3526_v8 = vld [vmem:[%s4193_s1 + $0xb8] sm:$0xff] (!%p113_p2)   ;;  %v3350_v9 = vld [vmem:[%s4193_s1 + $0x70] sm:$0xff] (!%p113_p2)  }
   0x8   : > { %475 = vmatprep.subr.bf16.mxu1 (!%p113_p2), %v3460_v1  ;;  %1174 = vmatprep.subr.bf16.mxu0 (!%p113_p2), %v3460_v1  ;;  %v3538_v10 = vld [vmem:[%s4193_s1 + $0xc0] sm:$0xff] (!%p113_p2)   ;;  %v3352_v11 = vld [vmem:[%s4193_s1 + $0x78] sm:$0xff] (!%p113_p2)   ;;  %v3554_v12 = vld [vmem:[%s4193_s1 + $0xc8] sm:$0xff] (!%p113_p2)  }
   0x9   : > { %v3354_v14 = vld [vmem:[%s4193_s1 + $0x80] sm:$0xff] (!%p113_p2)   ;;  %v3571_v16 = vld [vmem:[%s4193_s1 + $0xd0] sm:$0xff] (!%p113_p2)   ;;  %v3356_v17 = vld [vmem:[%s4193_s1 + $0x88] sm:$0xff] (!%p113_p2)  }
   0xa   : > { %v3586_v18 = vld [vmem:[%s4193_s1 + $0xd8] sm:$0xff] (!%p113_p2)   ;;  %v3358_v19 = vld [vmem:[%s4193_s1 + $0x90] sm:$0xff] (!%p113_p2)   ;;  %v3597_v20 = vld [vmem:[%s4193_s1 + $0xe0] sm:$0xff] (!%p113_p2)  }
   0xb   : > { %476 = vmatpush1.bf16.msra.mxu1 (!%p113_p2), %v3344_v3  ;;  %1175 = vmatpush1.bf16.msra.mxu0 (!%p113_p2), %v3502_v4  ;;  %v3360_v21 = vld [vmem:[%s4193_s1 + $0x98] sm:$0xff] (!%p113_p2)   ;;  %v3608_v22 = vld [vmem:[%s4193_s1 + $0xe8] sm:$0xff] (!%p113_p2)   ;;  %v3368_v25 = vld [vmem:[%s4193_s1] sm:$0xff] (!%p113_p2)  }
   0xc   : > { %477 = vmatprep.subr.bf16.mxu1 (!%p113_p2), %v3460_v1  ;;  %1176 = vmatprep.subr.bf16.mxu0 (!%p113_p2), %v3460_v1  ;;  %v3369_v26 = vld [vmem:[%s4193_s1 + $0xf0] sm:$0xff] (!%p113_p2)   ;;  %v3374_v28 = vld [vmem:[%s4193_s1 + $0x8] sm:$0xff] (!%p113_p2)   ;;  %v3373_v29 = vld [vmem:[%s4193_s1 + $0xf8] sm:$0xff] (!%p113_p2)  }
   0xd   : > { %s4196_s10 = smov (!%p134_p3, %s2673_s10), 1  ;;  %v3375_v31 = vld [vmem:[%s4193_s1 + $0x100] sm:$0xff]   ;;  %v3383_v33 = vld [vmem:[%s4193_s1 + $0x10] sm:$0xff]   ;;  %v3379_v34 = vld [vmem:[%s4193_s1 + $0x108] sm:$0xff]  }
   0xe   : > { %s3332_s29 = smul.u32 320, %s4196_s10  ;;  %v3391_v35 = vld [vmem:[%s4193_s1 + $0x18] sm:$0xff]   ;;  %v3384_v38 = vld [vmem:[%s4193_s1 + $0x110] sm:$0xff]   ;;  %v3398_v39 = vld [vmem:[%s4193_s1 + $0x20] sm:$0xff]  }
   0xf   : > { %478 = vmatpush1.bf16.msra.mxu1 %v3346_v5  ;;  %1177 = vmatpush1.bf16.msra.mxu0 %v3513_v6  ;;  %v3388_v40 = vld [vmem:[%s4193_s1 + $0x118] sm:$0xff]   ;;  %v3404_v41 = vld [vmem:[%s4193_s1 + $0x28] sm:$0xff]   ;;  %v3393_v44 = vld [vmem:[%s4193_s1 + $0x120] sm:$0xff]  }
  0x10   : > { %479 = vmatprep.subr.bf16.mxu1 %v3460_v1  ;;  %1178 = vmatprep.subr.bf16.mxu0 %v3460_v1  ;;  %s3547_s8 = scalar_lea.vmem %s4192_s0, %s3332_s29  ;;  %v3409_v45 = vld [vmem:[%s4193_s1 + $0x30] sm:$0xff]   ;;  %v3394_v46 = vld [vmem:[%s4193_s1 + $0x128] sm:$0xff]   ;;  %v3417_v48 = vld [vmem:[%s4193_s1 + $0x38] sm:$0xff]  }
  0x11   : > { %v3558_v13 = vld [vmem:[%s3547_s8 + $0x14] ss:$8 sps:$4 sm:$0xff]   ;;  %v3564_v15 = vld [vmem:[%s3547_s8 + $0x24] ss:$8 sps:$4 sm:$0xff]   ;;  %v3612_v23 = vld [vmem:[%s3547_s8 + $0x10] ss:$8 sps:$4 sm:$0xff]  }
  0x12   : > { %2743 = vmatprep.mubr.msk.bf16.mxu1 %vm424_vm0, %v3558_v13  ;;  %2849 = vmatprep.mubr.msk.bf16.mxu0 %vm424_vm0, %v3564_v15  ;;  %v3615_v24 = vld [vmem:[%s3547_s8 + $0x20] ss:$8 sps:$4 sm:$0xff]   ;;  %v3627_v27 = vld [vmem:[%s3547_s8 + $0x34] ss:$8 sps:$4 sm:$0xff]   ;;  %v3643_v30 = vld [vmem:[%s3547_s8 + $0x30] ss:$8 sps:$4 sm:$0xff]  }
  0x13   : > { %480 = vmatpush1.bf16.msra.mxu1 %v3348_v7  ;;  %1179 = vmatpush1.bf16.msra.mxu0 %v3526_v8  ;;  %v3650_v32 = vld [vmem:[%s3547_s8 + $0x44] ss:$8 sps:$4 sm:$0xff]   ;;  %v3672_v36 = vld [vmem:[%s3547_s8 + $0x40] ss:$8 sps:$4 sm:$0xff]   ;;  %v3675_v37 = vld [vmem:[%s3547_s8 + $0x54] ss:$8 sps:$4 sm:$0xff]  }
  0x14   : > { %481 = vmatprep.subr.bf16.mxu1 %v3460_v1  ;;  %1180 = vmatprep.subr.bf16.mxu0 %v3460_v1  ;;  %v3700_v42 = vld [vmem:[%s3547_s8 + $0x50] ss:$8 sps:$4 sm:$0xff]   ;;  %v3703_v43 = vld [vmem:[%s3547_s8 + $0x64] ss:$8 sps:$4 sm:$0xff]   ;;  %v3723_v47 = vld [vmem:[%s3547_s8 + $0x60] ss:$8 sps:$4 sm:$0xff]  }
  0x15   : > { %v3730_v49 = vld [vmem:[%s3547_s8 + $0x74] ss:$8 sps:$4 sm:$0xff]   ;;  %v3425_v51 = vld [vmem:[%s4193_s1 + $0x40] sm:$0xff]   ;;  %v3430_v53 = vld [vmem:[%s4193_s1 + $0x48] sm:$0xff]  }
  0x16   : > { %v3399_v50 = vld [vmem:[%s4193_s1 + $0x130] sm:$0xff]   ;;  %v3403_v52 = vld [vmem:[%s4193_s1 + $0x138] sm:$0xff]   ;;  %v3759_v55 = vld [vmem:[%s3547_s8 + $0x84] ss:$8 sps:$4 sm:$0xff]  }
  0x17   : > { %482 = vmatpush1.bf16.msra.mxu1 %v3350_v9  ;;  %1181 = vmatpush1.bf16.msra.mxu0 %v3538_v10  ;;  %v3756_v54 = vld [vmem:[%s3547_s8 + $0x70] ss:$8 sps:$4 sm:$0xff]   ;;  %v3770_v56 = vld [vmem:[%s3547_s8 + $0x80] ss:$8 sps:$4 sm:$0xff]   ;;  %v3773_v57 = vld [vmem:[%s3547_s8 + $0x94] ss:$8 sps:$4 sm:$0xff]  }
  0x18   : > { %483 = vmatprep.subr.bf16.mxu1 %v3460_v1  ;;  %1182 = vmatprep.subr.bf16.mxu0 %v3460_v1  ;;  %v3782_v58 = vld [vmem:[%s3547_s8 + $0x90] ss:$8 sps:$4 sm:$0xff]   ;;  %v3791_v59 = vld [vmem:[%s3547_s8 + $0xa4] ss:$8 sps:$4 sm:$0xff]   ;;  %v3807_v62 = vld [vmem:[%s3547_s8 + $0xa0] ss:$8 sps:$4 sm:$0xff]  }
  0x19   : > { %v3405_v60 = vld [vmem:[%s4193_s1 + $0x140] sm:$0xff]   ;;  %v3410_v61 = vld [vmem:[%s4193_s1 + $0x148] sm:$0xff]   ;;  %v3810_v63 = vld [vmem:[%s3547_s8 + $0xb4] ss:$8 sps:$4 sm:$0xff]  }
  0x1a   : > { %v3418_v0 = vld [vmem:[%s4193_s1 + $0x150] sm:$0xff]   ;;  %v3426_v3 = vld [vmem:[%s4193_s1 + $0x158] sm:$0xff]   ;;  %v3830_v7 = vld [vmem:[%s3547_s8 + $0xc4] ss:$8 sps:$4 sm:$0xff]  }
  0x1b   : > { %484 = vmatpush1.bf16.msra.mxu1 %v3352_v11  ;;  %1183 = vmatpush1.bf16.msra.mxu0 %v3554_v12  ;;  %v3827_v5 = vld [vmem:[%s3547_s8 + $0xb0] ss:$8 sps:$4 sm:$0xff]   ;;  %v3431_v9 = vld [vmem:[%s4193_s1 + $0x160] sm:$0xff]   ;;  %v3438_v11 = vld [vmem:[%s4193_s1 + $0x168] sm:$0xff]  }
  0x1c   : > { %485 = vmatprep.subr.bf16.mxu1 %v3460_v1  ;;  %1184 = vmatprep.subr.bf16.mxu0 %v3460_v1 }
  0x1f   : > { %486 = vmatpush1.bf16.msra.mxu1 %v3354_v14  ;;  %1185 = vmatpush1.bf16.msra.mxu0 %v3571_v16  ;;  %v3847_v14 = vld [vmem:[%s3547_s8 + $0xc0] ss:$8 sps:$4 sm:$0xff]  }
  0x20   : > { %487 = vmatprep.subr.bf16.mxu1 %v3460_v1  ;;  %1186 = vmatprep.subr.bf16.mxu0 %v3460_v1 }
  0x23   : > { %488 = vmatpush1.bf16.msra.mxu1 %v3356_v17  ;;  %1187 = vmatpush1.bf16.msra.mxu0 %v3586_v18  ;;  %v3850_v17 = vld [vmem:[%s3547_s8 + $0xd4] ss:$8 sps:$4 sm:$0xff]  }
  0x24   : > { %489 = vmatprep.subr.bf16.mxu1 %v3460_v1  ;;  %1188 = vmatprep.subr.bf16.mxu0 %v3460_v1 }
  0x27   : > { %490 = vmatpush1.bf16.msra.mxu1 %v3358_v19  ;;  %1189 = vmatpush1.bf16.msra.mxu0 %v3597_v20  ;;  %v3439_v19 = vld [vmem:[%s4193_s1 + $0x170] sm:$0xff]  }
  0x28   : > { %491 = vmatprep.subr.bf16.mxu1 %v3460_v1  ;;  %1190 = vmatprep.subr.bf16.mxu0 %v3460_v1 }
  0x2b   : > { %492 = vmatpush1.bf16.msra.mxu1 %v3360_v21  ;;  %1191 = vmatpush1.bf16.msra.mxu0 %v3608_v22  ;;  %v3440_v21 = vld [vmem:[%s4193_s1 + $0x178] sm:$0xff]  }
  0x2c   : > { %706 = vmatprep.subr.bf16.mxu1 %v3460_v1  ;;  %1670 = vmatprep.subr.bf16.mxu0 %v3460_v1 }
  0x2e   : > { %506 = vmatmul.mubr.bf16.vlgmr.msra.gmra.mrb[0].mxu1 %v3612_v23  ;;  %1205 = vmatmul.mubr.bf16.vlgmr.msra.gmra.mrb[0].mxu0 %v3615_v24 }
  0x2f   : > { %707 = vmatpush1.bf16.msra.mxu1 %v3368_v25  ;;  %1671 = vmatpush1.bf16.msra.mxu0 %v3369_v26  ;;  %v3867_v25 = vld [vmem:[%s3547_s8 + $0xd0] ss:$8 sps:$4 sm:$0xff]   ;;  %v3870_v26 = vld [vmem:[%s3547_s8 + $0xe4] ss:$8 sps:$4 sm:$0xff]  }
  0x30   : > { %2744 = vmatprep.mubr.msk.bf16.mxu1 %vm424_vm0, %v3564_v15  ;;  %2850 = vmatprep.mubr.msk.bf16.mxu0 %vm424_vm0, %v3627_v27 }
  0x31   : > { %1672 = vmatprep.subr.bf16.mxu0 %v3460_v1  ;;  %708 = vmatprep.subr.bf16.mxu1 %v3460_v1 }
  0x33   : > { %709 = vmatpush1.bf16.msra.mxu1 %v3374_v28  ;;  %1673 = vmatpush1.bf16.msra.mxu0 %v3373_v29  ;;  %v3441_v28 = vld [vmem:[%s4193_s1 + $0x180] sm:$0xff]   ;;  %v3445_v29 = vld [vmem:[%s4193_s1 + $0x188] sm:$0xff]  }
  0x34   : > { %710 = vmatprep.subr.bf16.mxu1 %v3460_v1  ;;  %1674 = vmatprep.subr.bf16.mxu0 %v3460_v1 }
  0x36   : > { %514 = vmatmul.mubr.bf16.gmra.mrb[4].mxu1 %v3615_v24  ;;  %1213 = vmatmul.mubr.bf16.gmra.mrb[4].mxu0 %v3643_v30 }
  0x37   : > { %2745 = vmatprep.mubr.msk.bf16.mxu1 %vm424_vm0, %v3627_v27  ;;  %1675 = vmatpush1.bf16.msra.mxu0 %v3375_v31  ;;  %v3887_v31 = vld [vmem:[%s3547_s8 + $0xe0] ss:$8 sps:$4 sm:$0xff]  }
  0x38   : > { %2851 = vmatprep.mubr.msk.bf16.mxu0 %vm424_vm0, %v3650_v32  ;;  %1676 = vmatprep.subr.bf16.mxu0 %v3460_v1 }
  0x39   : > { %711 = vmatpush1.bf16.msra.mxu1 %v3383_v33  ;;  %v3890_v33 = vld [vmem:[%s3547_s8 + $0xf4] ss:$8 sps:$4 sm:$0xff]  }
  0x3a   : > { %712 = vmatprep.subr.bf16.mxu1 %v3460_v1 }
  0x3b   : > { %1677 = vmatpush1.bf16.msra.mxu0 %v3379_v34  ;;  %v3899_v34 = vld [vmem:[%s3547_s8 + $0xf0] ss:$8 sps:$4 sm:$0xff]  }
  0x3c   : > { %1678 = vmatprep.subr.bf16.mxu0 %v3460_v1 }
  0x3d   : > { %713 = vmatpush1.bf16.msra.mxu1 %v3391_v35  ;;  %v3902_v35 = vld [vmem:[%s3547_s8 + $0x104] ss:$8 sps:$4 sm:$0xff]  }
  0x3e   : > { %522 = vmatmul.mubr.bf16.gmra.mrb[8].mxu1 %v3643_v30  ;;  %714 = vmatprep.subr.bf16.mxu1 %v3460_v1 }
  0x3f   : > { %1221 = vmatmul.mubr.bf16.gmra.mrb[8].mxu0 %v3672_v36  ;;  %2746 = vmatprep.mubr.msk.bf16.mxu1 %vm424_vm0, %v3650_v32 }
  0x40   : > { %2852 = vmatprep.mubr.msk.bf16.mxu0 %vm424_vm0, %v3675_v37  ;;  %1679 = vmatpush1.bf16.msra.mxu0 %v3384_v38  ;;  %v3911_v38 = vld [vmem:[%s3547_s8 + $0x100] ss:$8 sps:$4 sm:$0xff]  }
  0x41   : > { %1680 = vmatprep.subr.bf16.mxu0 %v3460_v1  ;;  %715 = vmatpush1.bf16.msra.mxu1 %v3398_v39  ;;  %v3437_v39 = vld [vmem:[%s3547_s8 + $0x4] ss:$8 sps:$4 sm:$0xff]  }
  0x42   : > { %716 = vmatprep.subr.bf16.mxu1 %v3460_v1 }
  0x44   : > { %1681 = vmatpush1.bf16.msra.mxu0 %v3388_v40  ;;  %v3435_v40 = vld [vmem:[%s3547_s8] ss:$8 sps:$4 sm:$0xff]  }
  0x45   : > { %1682 = vmatprep.subr.bf16.mxu0 %v3460_v1  ;;  %717 = vmatpush1.bf16.msra.mxu1 %v3404_v41 }
  0x46   : > { %530 = vmatmul.mubr.bf16.gmra.mrb[12].mxu1 %v3672_v36  ;;  %718 = vmatprep.subr.bf16.mxu1 %v3460_v1 }
  0x47   : > { %1229 = vmatmul.mubr.bf16.gmra.mrb[12].mxu0 %v3700_v42  ;;  %2747 = vmatprep.mubr.msk.bf16.mxu1 %vm424_vm0, %v3675_v37 }
  0x48   : > { %2853 = vmatprep.mubr.msk.bf16.mxu0 %vm424_vm0, %v3703_v43  ;;  %1683 = vmatpush1.bf16.msra.mxu0 %v3393_v44 }
  0x49   : > { %1684 = vmatprep.subr.bf16.mxu0 %v3460_v1  ;;  %719 = vmatpush1.bf16.msra.mxu1 %v3409_v45 }
  0x4a   : > { %720 = vmatprep.subr.bf16.mxu1 %v3460_v1 }
  0x4c   : > { %1685 = vmatpush1.bf16.msra.mxu0 %v3394_v46 }
  0x4d   : > { %1686 = vmatprep.subr.bf16.mxu0 %v3460_v1  ;;  %721 = vmatpush1.bf16.msra.mxu1 %v3417_v48 }
  0x4e   : > { %538 = vmatmul.mubr.bf16.gmra.mrb[16].mxu1 %v3700_v42  ;;  %722 = vmatprep.subr.bf16.mxu1 %v3460_v1 }
  0x4f   : > { %1237 = vmatmul.mubr.bf16.gmra.mrb[16].mxu0 %v3723_v47  ;;  %2748 = vmatprep.mubr.msk.bf16.mxu1 %vm424_vm0, %v3703_v43 }
  0x50   : > { %2854 = vmatprep.mubr.msk.bf16.mxu0 %vm424_vm0, %v3730_v49  ;;  %1687 = vmatpush1.bf16.msra.mxu0 %v3399_v50 }
  0x51   : > { %1688 = vmatprep.subr.bf16.mxu0 %v3460_v1  ;;  %723 = vmatpush1.bf16.msra.mxu1 %v3425_v51 }
  0x52   : > { %724 = vmatprep.subr.bf16.mxu1 %v3460_v1 }
  0x54   : > { %1689 = vmatpush1.bf16.msra.mxu0 %v3403_v52 }
  0x55   : > { %2168 = vmatprep.subr.bf16.mxu0 %v3460_v1  ;;  %725 = vmatpush1.bf16.msra.mxu1 %v3430_v53 }
  0x56   : > { %546 = vmatmul.mubr.bf16.gmra.mrb[20].mxu1 %v3723_v47  ;;  %3088 = vmatprep.subr.bf16.mxu1 %v3460_v1 }
  0x57   : > { %1245 = vmatmul.mubr.bf16.gmra.mrb[20].mxu0 %v3756_v54  ;;  %2749 = vmatprep.mubr.msk.bf16.mxu1 %vm424_vm0, %v3730_v49 }
  0x58   : > { %2855 = vmatprep.mubr.msk.bf16.mxu0 %vm424_vm0, %v3759_v55 }
  0x5e   : > { %554 = vmatmul.mubr.bf16.gmra.mrb[24].mxu1 %v3756_v54 }
  0x5f   : > { %1253 = vmatmul.mubr.bf16.gmra.mrb[24].mxu0 %v3770_v56  ;;  %2750 = vmatprep.mubr.msk.bf16.mxu1 %vm424_vm0, %v3759_v55 }
  0x60   : > { %2856 = vmatprep.mubr.msk.bf16.mxu0 %vm424_vm0, %v3773_v57 }
  0x66   : > { %562 = vmatmul.mubr.bf16.gmra.mrb[28].mxu1 %v3770_v56 }
  0x67   : > { %1261 = vmatmul.mubr.bf16.gmra.mrb[28].mxu0 %v3782_v58  ;;  %2751 = vmatprep.mubr.msk.bf16.mxu1 %vm424_vm0, %v3773_v57 }
  0x68   : > { %2927 = vmatprep.mubr.msk.bf16.mxu0 %vm424_vm0, %v3627_v27 }
  0x6e   : > { %570 = vmatmul.mubr.bf16.gmra.mrb[32].mxu1 %v3782_v58 }
  0x6f   : > { %1703 = vmatmul.mubr.bf16.vlgmr.msra.gmra.mrb[0].mxu0 %v3643_v30  ;;  %2752 = vmatprep.mubr.msk.bf16.mxu1 %vm424_vm0, %v3791_v59 }
  0x70   : > { %2169 = vmatpush1.bf16.msra.mxu0 %v3405_v60  ;;  %2928 = vmatprep.mubr.msk.bf16.mxu0 %vm424_vm0, %v3650_v32 }
  0x71   : > { %2170 = vmatprep.subr.bf16.mxu0 %v3460_v1 }
  0x74   : > { %2171 = vmatpush1.bf16.msra.mxu0 %v3410_v61 }
  0x75   : > { %2172 = vmatprep.subr.bf16.mxu0 %v3460_v1 }
  0x76   : > { %578 = vmatmul.mubr.bf16.gmra.mrb[36].mxu1 %v3807_v62 }
  0x77   : > { %1711 = vmatmul.mubr.bf16.gmra.mrb[4].mxu0 %v3672_v36  ;;  %2753 = vmatprep.mubr.msk.bf16.mxu1 %vm424_vm0, %v3810_v63 }
  0x78   : > { %2929 = vmatprep.mubr.msk.bf16.mxu0 %vm424_vm0, %v3675_v37  ;;  %2173 = vmatpush1.bf16.msra.mxu0 %v3418_v0 }
  0x79   : > { %2174 = vmatprep.subr.bf16.mxu0 %v3460_v1 }
  0x7c   : > { %2175 = vmatpush1.bf16.msra.mxu0 %v3426_v3 }
  0x7d   : > { %2176 = vmatprep.subr.bf16.mxu0 %v3460_v1 }
  0x7e   : > { %586 = vmatmul.mubr.bf16.gmra.mrb[40].mxu1 %v3827_v5 }
  0x7f   : > { %1719 = vmatmul.mubr.bf16.gmra.mrb[8].mxu0 %v3700_v42  ;;  %2754 = vmatprep.mubr.msk.bf16.mxu1 %vm424_vm0, %v3830_v7 }
  0x80   : > { %2930 = vmatprep.mubr.msk.bf16.mxu0 %vm424_vm0, %v3703_v43  ;;  %2177 = vmatpush1.bf16.msra.mxu0 %v3431_v9 }
  0x81   : > { %2178 = vmatprep.subr.bf16.mxu0 %v3460_v1 }
  0x84   : > { %2179 = vmatpush1.bf16.msra.mxu0 %v3438_v11 }
  0x85   : > { %2180 = vmatprep.subr.bf16.mxu0 %v3460_v1 }
  0x86   : > { %594 = vmatmul.mubr.bf16.gmra.mrb[44].mxu1 %v3847_v14 }
  0x87   : > { %1727 = vmatmul.mubr.bf16.gmra.mrb[12].mxu0 %v3723_v47  ;;  %2755 = vmatprep.mubr.msk.bf16.mxu1 %vm424_vm0, %v3850_v17 }
  0x88   : > { %2931 = vmatprep.mubr.msk.bf16.mxu0 %vm424_vm0, %v3730_v49  ;;  %2181 = vmatpush1.bf16.msra.mxu0 %v3439_v19 }
  0x89   : > { %2182 = vmatprep.subr.bf16.mxu0 %v3460_v1 }
  0x8c   : > { %2183 = vmatpush1.bf16.msra.mxu0 %v3440_v21 }
  0x8d   : > { %2184 = vmatprep.subr.bf16.mxu0 %v3460_v1 }
  0x8e   : > { %602 = vmatmul.mubr.bf16.gmra.mrb[48].mxu1 %v3867_v25 }
  0x8f   : > { %1735 = vmatmul.mubr.bf16.gmra.mrb[16].mxu0 %v3756_v54  ;;  %2756 = vmatprep.mubr.msk.bf16.mxu1 %vm424_vm0, %v3870_v26 }
  0x90   : > { %2932 = vmatprep.mubr.msk.bf16.mxu0 %vm424_vm0, %v3759_v55  ;;  %2185 = vmatpush1.bf16.msra.mxu0 %v3441_v28 }
  0x91   : > { %2186 = vmatprep.subr.bf16.mxu0 %v3460_v1 }
  0x94   : > { %2187 = vmatpush1.bf16.msra.mxu0 %v3445_v29 }
  0x96   : > { %610 = vmatmul.mubr.bf16.gmra.mrb[52].mxu1 %v3887_v31 }
  0x97   : > { %1743 = vmatmul.mubr.bf16.gmra.mrb[20].mxu0 %v3770_v56  ;;  %2757 = vmatprep.mubr.msk.bf16.mxu1 %vm424_vm0, %v3890_v33 }
  0x98   : > { %2933 = vmatprep.mubr.msk.bf16.mxu0 %vm424_vm0, %v3773_v57 }
  0x9e   : > { %618 = vmatmul.mubr.bf16.gmra.mrb[56].mxu1 %v3899_v34 }
  0x9f   : > { %1751 = vmatmul.mubr.bf16.gmra.mrb[24].mxu0 %v3782_v58  ;;  %2758 = vmatprep.mubr.msk.bf16.mxu1 %vm424_vm0, %v3902_v35 }
  0xa0   : > { %2934 = vmatprep.mubr.msk.bf16.mxu0 %vm424_vm0, %v3791_v59 }
  0xa6   : > { %626 = vmatmul.mubr.bf16.gmra.mrb[60].mxu1 %v3911_v38 }
  0xa7   : > { %1759 = vmatmul.mubr.bf16.gmra.mrb[28].mxu0 %v3807_v62  ;;  %2771 = vmatprep.mubr.msk.bf16.mxu1 %vm424_vm0, %v3437_v39 }
  0xa8   : > { %2935 = vmatprep.mubr.msk.bf16.mxu0 %vm424_vm0, %v3810_v63 }
  0xae   : > { %739 = vmatmul.mubr.bf16.vlgmr.msra.gmra.mrb[0].mxu1 %v3435_v40 }
  0xaf   : > { %1767 = vmatmul.mubr.bf16.gmra.mrb[32].mxu0 %v3827_v5  ;;  %3098 = vmatpush1.bf16.msra.mxu1 %v3492_v2  ;;  %v3968_v2 = vld [vmem:[%s3547_s8 + $0x114] ss:$8 sps:$4 sm:$0xff]  }
  0xb0   : > { %2772 = vmatprep.mubr.msk.bf16.mxu1 %vm424_vm0, %v3558_v13  ;;  %2936 = vmatprep.mubr.msk.bf16.mxu0 %vm424_vm0, %v3830_v7 }
  0xb1   : > { %3089 = vmatprep.subr.bf16.mxu1 %v3460_v1 }
  0xb3   : > { %3099 = vmatpush1.bf16.msra.mxu1 %v3502_v4  ;;  %v3978_v4 = vld [vmem:[%s3547_s8 + $0x110] ss:$8 sps:$4 sm:$0xff]  }
  0xb4   : > { %3090 = vmatprep.subr.bf16.mxu1 %v3460_v1 }
  0xb6   : > { %747 = vmatmul.mubr.bf16.gmra.mrb[4].mxu1 %v3612_v23 }
  0xb7   : > { %1775 = vmatmul.mubr.bf16.gmra.mrb[36].mxu0 %v3847_v14  ;;  %2773 = vmatprep.mubr.msk.bf16.mxu1 %vm424_vm0, %v3564_v15 }
  0xb8   : > { %2937 = vmatprep.mubr.msk.bf16.mxu0 %vm424_vm0, %v3850_v17  ;;  %3100 = vmatpush1.bf16.msra.mxu1 %v3513_v6  ;;  %v3981_v6 = vld [vmem:[%s3547_s8 + $0x124] ss:$8 sps:$4 sm:$0xff]  }
  0xb9   : > { %3091 = vmatprep.subr.bf16.mxu1 %v3460_v1 }
  0xbc   : > { %3101 = vmatpush1.bf16.msra.mxu1 %v3526_v8  ;;  %v3449_v8 = vld [vmem:[%s3547_s8 + $0x134] ss:$8 sps:$4 sm:$0xff]  }
  0xbd   : > { %3092 = vmatprep.subr.bf16.mxu1 %v3460_v1 }
  0xbe   : > { %755 = vmatmul.mubr.bf16.gmra.mrb[8].mxu1 %v3615_v24 }
  0xbf   : > { %1783 = vmatmul.mubr.bf16.gmra.mrb[40].mxu0 %v3867_v25  ;;  %2774 = vmatprep.mubr.msk.bf16.mxu1 %vm424_vm0, %v3627_v27 }
  0xc0   : > { %2938 = vmatprep.mubr.msk.bf16.mxu0 %vm424_vm0, %v3870_v26  ;;  %3102 = vmatpush1.bf16.msra.mxu1 %v3538_v10  ;;  %v3451_v10 = vld [vmem:[%s3547_s8 + $0x130] ss:$8 sps:$4 sm:$0xff]  }
  0xc1   : > { %3093 = vmatprep.subr.bf16.mxu1 %v3460_v1 }
  0xc4   : > { %3103 = vmatpush1.bf16.msra.mxu1 %v3554_v12 }
  0xc5   : > { %3094 = vmatprep.subr.bf16.mxu1 %v3460_v1 }
  0xc6   : > { %763 = vmatmul.mubr.bf16.gmra.mrb[12].mxu1 %v3643_v30 }
  0xc7   : > { %1791 = vmatmul.mubr.bf16.gmra.mrb[44].mxu0 %v3887_v31  ;;  %2775 = vmatprep.mubr.msk.bf16.mxu1 %vm424_vm0, %v3650_v32 }
  0xc8   : > { %2939 = vmatprep.mubr.msk.bf16.mxu0 %vm424_vm0, %v3890_v33  ;;  %3104 = vmatpush1.bf16.msra.mxu1 %v3571_v16 }
  0xc9   : > { %3095 = vmatprep.subr.bf16.mxu1 %v3460_v1 }
  0xcc   : > { %3105 = vmatpush1.bf16.msra.mxu1 %v3586_v18 }
  0xcd   : > { %3096 = vmatprep.subr.bf16.mxu1 %v3460_v1 }
  0xce   : > { %771 = vmatmul.mubr.bf16.gmra.mrb[16].mxu1 %v3672_v36 }
  0xcf   : > { %1799 = vmatmul.mubr.bf16.gmra.mrb[48].mxu0 %v3899_v34  ;;  %2776 = vmatprep.mubr.msk.bf16.mxu1 %vm424_vm0, %v3675_v37 }
  0xd0   : > { %2940 = vmatprep.mubr.msk.bf16.mxu0 %vm424_vm0, %v3902_v35  ;;  %3106 = vmatpush1.bf16.msra.mxu1 %v3597_v20 }
  0xd1   : > { %3097 = vmatprep.subr.bf16.mxu1 %v3460_v1  ;;  %v3448_v1 = vld [vmem:[%s3547_s8 + $0x120] ss:$8 sps:$4 sm:$0xff]   ;;  %s3055_s8 = sshll.u32 %s4196_s10, 7 }
  0xd2   : > { %s4112_s16 = scalar_lea.vmem %s4194_s2, %s3055_s8 }
  0xd4   : > { %3107 = vmatpush1.bf16.msra.mxu1 %v3608_v22 }
  0xd6   : > { %779 = vmatmul.mubr.bf16.gmra.mrb[20].mxu1 %v3700_v42 }
  0xd7   : > { %1807 = vmatmul.mubr.bf16.gmra.mrb[52].mxu0 %v3911_v38  ;;  %2777 = vmatprep.mubr.msk.bf16.mxu1 %vm424_vm0, %v3703_v43 }
  0xd8   : > { %2941 = vmatprep.mubr.msk.bf16.mxu0 %vm424_vm0, %v3968_v2 }
  0xde   : > { %787 = vmatmul.mubr.bf16.gmra.mrb[24].mxu1 %v3723_v47 }
  0xdf   : > { %1815 = vmatmul.mubr.bf16.gmra.mrb[56].mxu0 %v3978_v4  ;;  %2778 = vmatprep.mubr.msk.bf16.mxu1 %vm424_vm0, %v3730_v49 }
  0xe0   : > { %2942 = vmatprep.mubr.msk.bf16.mxu0 %vm424_vm0, %v3981_v6 }
  0xe6   : > { %795 = vmatmul.mubr.bf16.gmra.mrb[28].mxu1 %v3756_v54 }
  0xe7   : > { %1823 = vmatmul.mubr.bf16.gmra.mrb[60].mxu0 %v3448_v1  ;;  %2779 = vmatprep.mubr.msk.bf16.mxu1 %vm424_vm0, %v3759_v55 }
  0xe8   : > { %3005 = vmatprep.mubr.msk.bf16.mxu0 %vm424_vm0, %v3650_v32 }
  0xee   : > { %803 = vmatmul.mubr.bf16.gmra.mrb[32].mxu1 %v3770_v56 }
  0xef   : > { %2201 = vmatmul.mubr.bf16.vlgmr.msra.gmra.mrb[0].mxu0 %v3672_v36  ;;  %2780 = vmatprep.mubr.msk.bf16.mxu1 %vm424_vm0, %v3773_v57 }
  0xf0   : > { %3006 = vmatprep.mubr.msk.bf16.mxu0 %vm424_vm0, %v3675_v37 }
  0xf6   : > { %811 = vmatmul.mubr.bf16.gmra.mrb[36].mxu1 %v3782_v58 }
  0xf7   : > { %2209 = vmatmul.mubr.bf16.gmra.mrb[4].mxu0 %v3700_v42  ;;  %2781 = vmatprep.mubr.msk.bf16.mxu1 %vm424_vm0, %v3791_v59 }
  0xf8   : > { %3007 = vmatprep.mubr.msk.bf16.mxu0 %vm424_vm0, %v3703_v43 }
  0xfe   : > { %819 = vmatmul.mubr.bf16.gmra.mrb[40].mxu1 %v3807_v62 }
  0xff   : > { %2217 = vmatmul.mubr.bf16.gmra.mrb[8].mxu0 %v3723_v47  ;;  %2782 = vmatprep.mubr.msk.bf16.mxu1 %vm424_vm0, %v3810_v63 }
 0x100   : > { %3008 = vmatprep.mubr.msk.bf16.mxu0 %vm424_vm0, %v3730_v49 }
 0x106   : > { %827 = vmatmul.mubr.bf16.gmra.mrb[44].mxu1 %v3827_v5 }
 0x107   : > { %2225 = vmatmul.mubr.bf16.gmra.mrb[12].mxu0 %v3756_v54  ;;  %2783 = vmatprep.mubr.msk.bf16.mxu1 %vm424_vm0, %v3830_v7 }
 0x108   : > { %3009 = vmatprep.mubr.msk.bf16.mxu0 %vm424_vm0, %v3759_v55 }
 0x10e   : > { %835 = vmatmul.mubr.bf16.gmra.mrb[48].mxu1 %v3847_v14 }
 0x10f   : > { %2233 = vmatmul.mubr.bf16.gmra.mrb[16].mxu0 %v3770_v56  ;;  %2784 = vmatprep.mubr.msk.bf16.mxu1 %vm424_vm0, %v3850_v17 }
 0x110   : > { %3010 = vmatprep.mubr.msk.bf16.mxu0 %vm424_vm0, %v3773_v57 }
 0x116   : > { %843 = vmatmul.mubr.bf16.gmra.mrb[52].mxu1 %v3867_v25 }
 0x117   : > { %2241 = vmatmul.mubr.bf16.gmra.mrb[20].mxu0 %v3782_v58  ;;  %2785 = vmatprep.mubr.msk.bf16.mxu1 %vm424_vm0, %v3870_v26 }
 0x118   : > { %3011 = vmatprep.mubr.msk.bf16.mxu0 %vm424_vm0, %v3791_v59 }
 0x11e   : > { %851 = vmatmul.mubr.bf16.gmra.mrb[56].mxu1 %v3887_v31 }
 0x11f   : > { %2249 = vmatmul.mubr.bf16.gmra.mrb[24].mxu0 %v3807_v62  ;;  %2786 = vmatprep.mubr.msk.bf16.mxu1 %vm424_vm0, %v3890_v33 }
 0x120   : > { %3012 = vmatprep.mubr.msk.bf16.mxu0 %vm424_vm0, %v3810_v63 }
 0x126   : > { %859 = vmatmul.mubr.bf16.gmra.mrb[60].mxu1 %v3899_v34 }
 0x127   : > { %2257 = vmatmul.mubr.bf16.gmra.mrb[28].mxu0 %v3827_v5  ;;  %2857 = vmatprep.mubr.msk.bf16.mxu1 %vm424_vm0, %v3791_v59 }
 0x128   : > { %3013 = vmatprep.mubr.msk.bf16.mxu0 %vm424_vm0, %v3830_v7 }
 0x12e   : > { %1269 = vmatmul.mubr.bf16.vlgmr.msra.gmra.mrb[32].mxu1 %v3807_v62 }
 0x12f   : > { %2265 = vmatmul.mubr.bf16.gmra.mrb[32].mxu0 %v3847_v14  ;;  %2858 = vmatprep.mubr.msk.bf16.mxu1 %vm424_vm0, %v3810_v63 }
 0x130   : > { %3014 = vmatprep.mubr.msk.bf16.mxu0 %vm424_vm0, %v3850_v17 }
 0x136   : > { %1277 = vmatmul.mubr.bf16.gmra.mrb[36].mxu1 %v3827_v5 }
 0x137   : > { %2273 = vmatmul.mubr.bf16.gmra.mrb[36].mxu0 %v3867_v25  ;;  %2859 = vmatprep.mubr.msk.bf16.mxu1 %vm424_vm0, %v3830_v7 }
 0x138   : > { %3015 = vmatprep.mubr.msk.bf16.mxu0 %vm424_vm0, %v3870_v26 }
 0x13e   : > { %1285 = vmatmul.mubr.bf16.gmra.mrb[40].mxu1 %v3847_v14 }
 0x13f   : > { %2281 = vmatmul.mubr.bf16.gmra.mrb[40].mxu0 %v3887_v31  ;;  %2860 = vmatprep.mubr.msk.bf16.mxu1 %vm424_vm0, %v3850_v17 }
 0x140   : > { %3016 = vmatprep.mubr.msk.bf16.mxu0 %vm424_vm0, %v3890_v33 }
 0x146   : > { %1293 = vmatmul.mubr.bf16.gmra.mrb[44].mxu1 %v3867_v25 }
 0x147   : > { %2289 = vmatmul.mubr.bf16.gmra.mrb[44].mxu0 %v3899_v34  ;;  %2861 = vmatprep.mubr.msk.bf16.mxu1 %vm424_vm0, %v3870_v26 }
 0x148   : > { %3017 = vmatprep.mubr.msk.bf16.mxu0 %vm424_vm0, %v3902_v35 }
 0x14e   : > { %1301 = vmatmul.mubr.bf16.gmra.mrb[48].mxu1 %v3887_v31 }
 0x14f   : > { %2297 = vmatmul.mubr.bf16.gmra.mrb[48].mxu0 %v3911_v38  ;;  %2862 = vmatprep.mubr.msk.bf16.mxu1 %vm424_vm0, %v3890_v33 }
 0x150   : > { %3018 = vmatprep.mubr.msk.bf16.mxu0 %vm424_vm0, %v3968_v2 }
 0x156   : > { %1309 = vmatmul.mubr.bf16.gmra.mrb[52].mxu1 %v3899_v34 }
 0x157   : > { %2305 = vmatmul.mubr.bf16.gmra.mrb[52].mxu0 %v3978_v4  ;;  %2863 = vmatprep.mubr.msk.bf16.mxu1 %vm424_vm0, %v3902_v35 }
 0x158   : > { %3019 = vmatprep.mubr.msk.bf16.mxu0 %vm424_vm0, %v3981_v6 }
 0x15e   : > { %1317 = vmatmul.mubr.bf16.gmra.mrb[56].mxu1 %v3911_v38 }
 0x15f   : > { %2313 = vmatmul.mubr.bf16.gmra.mrb[56].mxu0 %v3448_v1  ;;  %2864 = vmatprep.mubr.msk.bf16.mxu1 %vm424_vm0, %v3968_v2 }
 0x160   : > { %3020 = vmatprep.mubr.msk.bf16.mxu0 %vm424_vm0, %v3449_v8 }
 0x166   : > { %1325 = vmatmul.mubr.bf16.gmra.mrb[60].mxu1 %v3978_v4 }
 0x167   : > { %2321 = vmatmul.mubr.bf16.gmra.mrb[60].mxu0 %v3451_v10 }
 0x181   : > { %v740_v12 = vpop.f32.mrb[0].mxu1 }
 0x182   : > { %v742_v13 = vpop.f32.mrb[1].mxu1 }
 0x183   : > { %v743_v15 = vpop.f32.mrb[2].mxu1 }
 0x184   : > { %v745_v16 = vpop.f32.mrb[3].mxu1 }
 0x189   : > { %v748_v18 = vpop.f32.mrb[4].mxu1 }
 0x18a   : > { %v750_v20 = vpop.f32.mrb[5].mxu1 }
 0x18b   : > { %v751_v22 = vpop.f32.mrb[6].mxu1 }
 0x18c   : > { %v753_v23 = vpop.f32.mrb[7].mxu1 }
 0x191   : > { %v756_v24 = vpop.f32.mrb[8].mxu1 }
 0x192   : > { %v758_v27 = vpop.f32.mrb[9].mxu1 }
 0x193   : > { %v4086_v30 = vpop.f32.mrb[10].mxu1 }
 0x194   : > { %v761_v32 = vpop.f32.mrb[11].mxu1 }
 0x199   : > { %v4088_v36 = vpop.f32.mrb[12].mxu1 }
 0x19a   : > { %v766_v37 = vpop.f32.mrb[13].mxu1 }
 0x19b   : > { %v4090_v41 = vpop.f32.mrb[14].mxu1 }
 0x19c   : > { %v769_v42 = vpop.f32.mrb[15].mxu1 }
 0x1a1   : > { %v4092_v43 = vpop.f32.mrb[16].mxu1 }
 0x1a2   : > { %v774_v44 = vpop.f32.mrb[17].mxu1 }
 0x1a3   : > { %v4094_v45 = vpop.f32.mrb[18].mxu1 }
 0x1a4   : > { %v777_v46 = vpop.f32.mrb[19].mxu1 }
 0x1a9   : > { %v4096_v47 = vpop.f32.mrb[20].mxu1 }
 0x1aa   : > { %v782_v48 = vpop.f32.mrb[21].mxu1 }
 0x1ab   : > { %v4098_v49 = vpop.f32.mrb[22].mxu1 }
 0x1ac   : > { %v785_v50 = vpop.f32.mrb[23].mxu1 }
 0x1b1   : > { %v4100_v51 = vpop.f32.mrb[24].mxu1 }
 0x1b2   : > { %v790_v52 = vpop.f32.mrb[25].mxu1 }
 0x1b3   : > { %v4102_v53 = vpop.f32.mrb[26].mxu1 }
 0x1b4   : > { %v793_v54 = vpop.f32.mrb[27].mxu1 }
 0x1b9   : > { %v4104_v55 = vpop.f32.mrb[28].mxu1 }
 0x1ba   : > { %v798_v56 = vpop.f32.mrb[29].mxu1 }
 0x1bb   : > { %v4106_v57 = vpop.f32.mrb[30].mxu1 }
 0x1bc   : > { %v801_v58 = vpop.f32.mrb[31].mxu1 }
 0x1c2   : > { %v2202_v59 = vpop.f32.mrb[0].mxu0 }
 0x1c3   : > { %v3108_v60 = vadd.f32 %v2202_v59, %v740_v12  ;;  %v2204_v61 = vpop.f32.mrb[1].mxu0 }
 0x1c4   : > { %v2205_v62 = vpop.f32.mrb[2].mxu0 }
 0x1c5   : > { %vm2361_vm1 = vcmp.ge.f32.partialorder %v3108_v60, 0.0  ;;  %v2393_v63 = vmul.f32 0.1, %v3108_v60  ;;  %v3109_v0 = vadd.f32 %v2205_v62, %v743_v15  ;;  %v2207_v3 = vpop.f32.mrb[3].mxu0 }
 0x1c7   : > { %v2425_v5 = vsel %vm2361_vm1, %v3108_v60, %v2393_v63  ;;  %vm2362_vm3 = vcmp.ge.f32.partialorder %v3109_v0, 0.0  ;;  %v2394_v7 = vmul.f32 0.1, %v3109_v0 }
 0x1c8   : > { %v3056_v9 = vpack.c.bf16 %v2425_v5, %v2425_v5 }
 0x1c9   : > { %v2426_v11 = vsel %vm2362_vm3, %v3109_v0, %v2394_v7 }
 0x1ca   : > { %2586 = vst.msk [vmem:[%s4112_s16] sm:$0xf] %vm2585_vm2, %v3056_v9  ;;  %v3057_v14 = vpack.c.bf16 %v2426_v11, %v2426_v11  ;;  %v2210_v17 = vpop.f32.mrb[4].mxu0 }
 0x1cb   : > { %v3110_v19 = vadd.f32 %v2210_v17, %v748_v18  ;;  %v2212_v21 = vpop.f32.mrb[5].mxu0 }
 0x1cc   : > { %2587 = vst.msk [vmem:[%s4112_s16 + $0x4] sm:$0xf] %vm2585_vm2, %v3057_v14  ;;  %v2213_v25 = vpop.f32.mrb[6].mxu0 }
 0x1cd   : > { %vm2363_vm4 = vcmp.ge.f32.partialorder %v3110_v19, 0.0  ;;  %v2395_v26 = vmul.f32 0.1, %v3110_v19  ;;  %v3111_v28 = vadd.f32 %v2213_v25, %v751_v22  ;;  %v2215_v29 = vpop.f32.mrb[7].mxu0 }
 0x1cf   : > { %v2427_v31 = vsel %vm2363_vm4, %v3110_v19, %v2395_v26  ;;  %vm2364_vm5 = vcmp.ge.f32.partialorder %v3111_v28, 0.0  ;;  %v2396_v33 = vmul.f32 0.1, %v3111_v28 }
 0x1d0   : > { %v3058_v34 = vpack.c.bf16 %v2427_v31, %v2427_v31 }
 0x1d1   : > { %v2428_v35 = vsel %vm2364_vm5, %v3111_v28, %v2396_v33 }
 0x1d2   : > { %2588 = vst.msk [vmem:[%s4112_s16 + $0x8] sm:$0xf] %vm2585_vm2, %v3058_v34  ;;  %v3059_v38 = vpack.c.bf16 %v2428_v35, %v2428_v35  ;;  %v2218_v39 = vpop.f32.mrb[8].mxu0 }
 0x1d3   : > { %v3112_v40 = vadd.f32 %v2218_v39, %v756_v24  ;;  %v2220_v2 = vpop.f32.mrb[9].mxu0 }
 0x1d4   : > { %2589 = vst.msk [vmem:[%s4112_s16 + $0xc] sm:$0xf] %vm2585_vm2, %v3059_v38  ;;  %v2221_v4 = vpop.f32.mrb[10].mxu0 }
 0x1d5   : > { %vm2365_vm6 = vcmp.ge.f32.partialorder %v3112_v40, 0.0  ;;  %v2397_v6 = vmul.f32 0.1, %v3112_v40  ;;  %v3113_v1 = vadd.f32 %v2221_v4, %v4086_v30  ;;  %v2223_v8 = vpop.f32.mrb[11].mxu0 }
 0x1d7   : > { %v2429_v10 = vsel %vm2365_vm6, %v3112_v40, %v2397_v6  ;;  %vm2366_vm7 = vcmp.ge.f32.partialorder %v3113_v1, 0.0  ;;  %v2398_v12 = vmul.f32 0.1, %v3113_v1 }
 0x1d8   : > { %v3060_v13 = vpack.c.bf16 %v2429_v10, %v2429_v10 }
 0x1d9   : > { %v2430_v15 = vsel %vm2366_vm7, %v3113_v1, %v2398_v12 }
 0x1da   : > { %2590 = vst.msk [vmem:[%s4112_s16 + $0x10] sm:$0xf] %vm2585_vm2, %v3060_v13  ;;  %v3061_v16 = vpack.c.bf16 %v2430_v15, %v2430_v15  ;;  %v2226_v18 = vpop.f32.mrb[12].mxu0 }
 0x1db   : > { %v3114_v20 = vadd.f32 %v2226_v18, %v4088_v36  ;;  %v2228_v22 = vpop.f32.mrb[13].mxu0 }
 0x1dc   : > { %2591 = vst.msk [vmem:[%s4112_s16 + $0x14] sm:$0xf] %vm2585_vm2, %v3061_v16  ;;  %v2229_v23 = vpop.f32.mrb[14].mxu0 }
 0x1dd   : > { %vm2367_vm8 = vcmp.ge.f32.partialorder %v3114_v20, 0.0  ;;  %v2399_v24 = vmul.f32 0.1, %v3114_v20  ;;  %v3115_v27 = vadd.f32 %v2229_v23, %v4090_v41  ;;  %v2231_v30 = vpop.f32.mrb[15].mxu0 }
 0x1df   : > { %v2431_v32 = vsel %vm2367_vm8, %v3114_v20, %v2399_v24  ;;  %vm2368_vm9 = vcmp.ge.f32.partialorder %v3115_v27, 0.0  ;;  %v2400_v37 = vmul.f32 0.1, %v3115_v27 }
 0x1e0   : > { %v3062_v42 = vpack.c.bf16 %v2431_v32, %v2431_v32 }
 0x1e1   : > { %v2432_v44 = vsel %vm2368_vm9, %v3115_v27, %v2400_v37 }
 0x1e2   : > { %2592 = vst.msk [vmem:[%s4112_s16 + $0x18] sm:$0xf] %vm2585_vm2, %v3062_v42  ;;  %v3063_v46 = vpack.c.bf16 %v2432_v44, %v2432_v44  ;;  %v2234_v36 = vpop.f32.mrb[16].mxu0 }
 0x1e3   : > { %v3116_v48 = vadd.f32 %v2234_v36, %v4092_v43  ;;  %v2236_v50 = vpop.f32.mrb[17].mxu0 }
 0x1e4   : > { %2593 = vst.msk [vmem:[%s4112_s16 + $0x1c] sm:$0xf] %vm2585_vm2, %v3063_v46  ;;  %v2237_v52 = vpop.f32.mrb[18].mxu0 }
 0x1e5   : > { %vm2369_vm10 = vcmp.ge.f32.partialorder %v3116_v48, 0.0  ;;  %v2401_v41 = vmul.f32 0.1, %v3116_v48  ;;  %v3117_v54 = vadd.f32 %v2237_v52, %v4094_v45  ;;  %v2239_v56 = vpop.f32.mrb[19].mxu0 }
 0x1e7   : > { %v2433_v58 = vsel %vm2369_vm10, %v3116_v48, %v2401_v41  ;;  %vm2370_vm11 = vcmp.ge.f32.partialorder %v3117_v54, 0.0  ;;  %v2402_v59 = vmul.f32 0.1, %v3117_v54 }
 0x1e8   : > { %v3064_v60 = vpack.c.bf16 %v2433_v58, %v2433_v58 }
 0x1e9   : > { %v2434_v61 = vsel %vm2370_vm11, %v3117_v54, %v2402_v59 }
 0x1ea   : > { %2594 = vst.msk [vmem:[%s4112_s16 + $0x20] sm:$0xf] %vm2585_vm2, %v3064_v60  ;;  %v3065_v62 = vpack.c.bf16 %v2434_v61, %v2434_v61  ;;  %v2242_v43 = vpop.f32.mrb[20].mxu0 }
 0x1eb   : > { %v3118_v63 = vadd.f32 %v2242_v43, %v4096_v47  ;;  %v2244_v0 = vpop.f32.mrb[21].mxu0 }
 0x1ec   : > { %2595 = vst.msk [vmem:[%s4112_s16 + $0x24] sm:$0xf] %vm2585_vm2, %v3065_v62  ;;  %v2245_v3 = vpop.f32.mrb[22].mxu0 }
 0x1ed   : > { %vm2371_vm12 = vcmp.ge.f32.partialorder %v3118_v63, 0.0  ;;  %v2403_v45 = vmul.f32 0.1, %v3118_v63  ;;  %v3119_v5 = vadd.f32 %v2245_v3, %v4098_v49  ;;  %v2247_v7 = vpop.f32.mrb[23].mxu0 }
 0x1ef   : > { %v2435_v9 = vsel %vm2371_vm12, %v3118_v63, %v2403_v45  ;;  %vm2372_vm13 = vcmp.ge.f32.partialorder %v3119_v5, 0.0  ;;  %v2404_v11 = vmul.f32 0.1, %v3119_v5 }
 0x1f0   : > { %v3066_v14 = vpack.c.bf16 %v2435_v9, %v2435_v9 }
 0x1f1   : > { %v2436_v17 = vsel %vm2372_vm13, %v3119_v5, %v2404_v11 }
 0x1f2   : > { %2596 = vst.msk [vmem:[%s4112_s16 + $0x28] sm:$0xf] %vm2585_vm2, %v3066_v14  ;;  %v3067_v19 = vpack.c.bf16 %v2436_v17, %v2436_v17  ;;  %v2250_v47 = vpop.f32.mrb[24].mxu0 }
 0x1f3   : > { %v3120_v21 = vadd.f32 %v2250_v47, %v4100_v51  ;;  %v2252_v25 = vpop.f32.mrb[25].mxu0 }
 0x1f4   : > { %2597 = vst.msk [vmem:[%s4112_s16 + $0x2c] sm:$0xf] %vm2585_vm2, %v3067_v19  ;;  %v2253_v26 = vpop.f32.mrb[26].mxu0 }
 0x1f5   : > { %vm2373_vm14 = vcmp.ge.f32.partialorder %v3120_v21, 0.0  ;;  %v2405_v49 = vmul.f32 0.1, %v3120_v21  ;;  %v3121_v28 = vadd.f32 %v2253_v26, %v4102_v53  ;;  %v2255_v29 = vpop.f32.mrb[27].mxu0 }
 0x1f7   : > { %v2437_v31 = vsel %vm2373_vm14, %v3120_v21, %v2405_v49  ;;  %vm2374_vm15 = vcmp.ge.f32.partialorder %v3121_v28, 0.0  ;;  %v2406_v33 = vmul.f32 0.1, %v3121_v28 }
 0x1f8   : > { %v3068_v34 = vpack.c.bf16 %v2437_v31, %v2437_v31 }
 0x1f9   : > { %v2438_v35 = vsel %vm2374_vm15, %v3121_v28, %v2406_v33 }
 0x1fa   : > { %2598 = vst.msk [vmem:[%s4112_s16 + $0x30] sm:$0xf] %vm2585_vm2, %v3068_v34  ;;  %v3069_v38 = vpack.c.bf16 %v2438_v35, %v2438_v35  ;;  %v2258_v51 = vpop.f32.mrb[28].mxu0 }
 0x1fb   : > { %v3122_v39 = vadd.f32 %v2258_v51, %v4104_v55  ;;  %v2260_v40 = vpop.f32.mrb[29].mxu0 }
 0x1fc   : > { %2599 = vst.msk [vmem:[%s4112_s16 + $0x34] sm:$0xf] %vm2585_vm2, %v3069_v38  ;;  %v2261_v2 = vpop.f32.mrb[30].mxu0 }
 0x1fd   : > { %vm2375_vm0 = vcmp.ge.f32.partialorder %v3122_v39, 0.0  ;;  %v2407_v4 = vmul.f32 0.1, %v3122_v39  ;;  %v3123_v53 = vadd.f32 %v2261_v2, %v4106_v57  ;;  %v2263_v6 = vpop.f32.mrb[31].mxu0 }
 0x1ff   : > { %v2439_v1 = vsel %vm2375_vm0, %v3122_v39, %v2407_v4  ;;  %vm2376_vm1 = vcmp.ge.f32.partialorder %v3123_v53, 0.0  ;;  %v2408_v8 = vmul.f32 0.1, %v3123_v53 }
 0x200   : > { %v3070_v10 = vpack.c.bf16 %v2439_v1, %v2439_v1 }
 0x201   : > { %v2440_v12 = vsel %vm2376_vm1, %v3123_v53, %v2408_v8  ;;  %v1270_v13 = vpop.f32.mrb[32].mxu1 }
 0x202   : > { %2600 = vst.msk [vmem:[%s4112_s16 + $0x38] sm:$0xf] %vm2585_vm2, %v3070_v10  ;;  %v3071_v15 = vpack.c.bf16 %v2440_v12, %v2440_v12  ;;  %v2266_v55 = vpop.f32.mrb[32].mxu0  ;;  %v1272_v16 = vpop.f32.mrb[33].mxu1 }
 0x203   : > { %v3124_v18 = vadd.f32 %v2266_v55, %v1270_v13  ;;  %v2268_v20 = vpop.f32.mrb[33].mxu0  ;;  %v1273_v22 = vpop.f32.mrb[34].mxu1 }
 0x204   : > { %2601 = vst.msk [vmem:[%s4112_s16 + $0x3c] sm:$0xf] %vm2585_vm2, %v3071_v15  ;;  %v2269_v23 = vpop.f32.mrb[34].mxu0  ;;  %v1275_v57 = vpop.f32.mrb[35].mxu1 }
 0x205   : > { %vm2377_vm3 = vcmp.ge.f32.partialorder %v3124_v18, 0.0  ;;  %v2409_v24 = vmul.f32 0.1, %v3124_v18  ;;  %v3125_v27 = vadd.f32 %v2269_v23, %v1273_v22  ;;  %v2271_v30 = vpop.f32.mrb[35].mxu0 }
 0x207   : > { %v2441_v32 = vsel %vm2377_vm3, %v3124_v18, %v2409_v24  ;;  %vm2378_vm4 = vcmp.ge.f32.partialorder %v3125_v27, 0.0  ;;  %v2410_v37 = vmul.f32 0.1, %v3125_v27 }
 0x208   : > { %v3072_v42 = vpack.c.bf16 %v2441_v32, %v2441_v32 }
 0x209   : > { %v2442_v44 = vsel %vm2378_vm4, %v3125_v27, %v2410_v37  ;;  %v1278_v46 = vpop.f32.mrb[36].mxu1 }
 0x20a   : > { %2602 = vst.msk [vmem:[%s4112_s16 + $0x40] sm:$0xf] %vm2585_vm2, %v3072_v42  ;;  %v3073_v36 = vpack.c.bf16 %v2442_v44, %v2442_v44  ;;  %v2274_v48 = vpop.f32.mrb[36].mxu0  ;;  %v1280_v50 = vpop.f32.mrb[37].mxu1 }
 0x20b   : > { %v3126_v52 = vadd.f32 %v2274_v48, %v1278_v46  ;;  %v2276_v41 = vpop.f32.mrb[37].mxu0  ;;  %v1281_v54 = vpop.f32.mrb[38].mxu1 }
 0x20c   : > { %2603 = vst.msk [vmem:[%s4112_s16 + $0x44] sm:$0xf] %vm2585_vm2, %v3073_v36  ;;  %v2277_v56 = vpop.f32.mrb[38].mxu0  ;;  %v1283_v58 = vpop.f32.mrb[39].mxu1 }
 0x20d   : > { %vm2379_vm5 = vcmp.ge.f32.partialorder %v3126_v52, 0.0  ;;  %v2411_v59 = vmul.f32 0.1, %v3126_v52  ;;  %v3127_v60 = vadd.f32 %v2277_v56, %v1281_v54  ;;  %v2279_v61 = vpop.f32.mrb[39].mxu0 }
 0x20f   : > { %v2443_v62 = vsel %vm2379_vm5, %v3126_v52, %v2411_v59  ;;  %vm2380_vm6 = vcmp.ge.f32.partialorder %v3127_v60, 0.0  ;;  %v2412_v43 = vmul.f32 0.1, %v3127_v60 }
 0x210   : > { %v3074_v63 = vpack.c.bf16 %v2443_v62, %v2443_v62 }
 0x211   : > { %v2444_v0 = vsel %vm2380_vm6, %v3127_v60, %v2412_v43  ;;  %v1286_v3 = vpop.f32.mrb[40].mxu1 }
 0x212   : > { %2604 = vst.msk [vmem:[%s4112_s16 + $0x48] sm:$0xf] %vm2585_vm2, %v3074_v63  ;;  %v3075_v45 = vpack.c.bf16 %v2444_v0, %v2444_v0  ;;  %v2282_v5 = vpop.f32.mrb[40].mxu0  ;;  %v1288_v7 = vpop.f32.mrb[41].mxu1 }
 0x213   : > { %v3128_v9 = vadd.f32 %v2282_v5, %v1286_v3  ;;  %v2284_v11 = vpop.f32.mrb[41].mxu0  ;;  %v1289_v14 = vpop.f32.mrb[42].mxu1 }
 0x214   : > { %2605 = vst.msk [vmem:[%s4112_s16 + $0x4c] sm:$0xf] %vm2585_vm2, %v3075_v45  ;;  %v2285_v17 = vpop.f32.mrb[42].mxu0  ;;  %v1291_v19 = vpop.f32.mrb[43].mxu1 }
 0x215   : > { %vm2381_vm7 = vcmp.ge.f32.partialorder %v3128_v9, 0.0  ;;  %v2413_v47 = vmul.f32 0.1, %v3128_v9  ;;  %v3129_v21 = vadd.f32 %v2285_v17, %v1289_v14  ;;  %v2287_v25 = vpop.f32.mrb[43].mxu0 }
 0x217   : > { %v2445_v26 = vsel %vm2381_vm7, %v3128_v9, %v2413_v47  ;;  %vm2382_vm8 = vcmp.ge.f32.partialorder %v3129_v21, 0.0  ;;  %v2414_v49 = vmul.f32 0.1, %v3129_v21 }
 0x218   : > { %v3076_v28 = vpack.c.bf16 %v2445_v26, %v2445_v26 }
 0x219   : > { %v2446_v29 = vsel %vm2382_vm8, %v3129_v21, %v2414_v49  ;;  %v1294_v31 = vpop.f32.mrb[44].mxu1 }
 0x21a   : > { %2606 = vst.msk [vmem:[%s4112_s16 + $0x50] sm:$0xf] %vm2585_vm2, %v3076_v28  ;;  %v3077_v33 = vpack.c.bf16 %v2446_v29, %v2446_v29  ;;  %v2290_v34 = vpop.f32.mrb[44].mxu0  ;;  %v1296_v35 = vpop.f32.mrb[45].mxu1 }
 0x21b   : > { %v3130_v38 = vadd.f32 %v2290_v34, %v1294_v31  ;;  %v2292_v51 = vpop.f32.mrb[45].mxu0  ;;  %v1297_v39 = vpop.f32.mrb[46].mxu1 }
 0x21c   : > { %2607 = vst.msk [vmem:[%s4112_s16 + $0x54] sm:$0xf] %vm2585_vm2, %v3077_v33  ;;  %v2293_v40 = vpop.f32.mrb[46].mxu0  ;;  %v1299_v2 = vpop.f32.mrb[47].mxu1 }
 0x21d   : > { %vm2383_vm9 = vcmp.ge.f32.partialorder %v3130_v38, 0.0  ;;  %v2415_v4 = vmul.f32 0.1, %v3130_v38  ;;  %v3131_v53 = vadd.f32 %v2293_v40, %v1297_v39  ;;  %v2295_v6 = vpop.f32.mrb[47].mxu0 }
 0x21f   : > { %v2447_v1 = vsel %vm2383_vm9, %v3130_v38, %v2415_v4  ;;  %vm2384_vm10 = vcmp.ge.f32.partialorder %v3131_v53, 0.0  ;;  %v2416_v8 = vmul.f32 0.1, %v3131_v53 }
 0x220   : > { %v3078_v10 = vpack.c.bf16 %v2447_v1, %v2447_v1 }
 0x221   : > { %v2448_v12 = vsel %vm2384_vm10, %v3131_v53, %v2416_v8  ;;  %v1302_v13 = vpop.f32.mrb[48].mxu1 }
 0x222   : > { %2608 = vst.msk [vmem:[%s4112_s16 + $0x58] sm:$0xf] %vm2585_vm2, %v3078_v10  ;;  %v3079_v15 = vpack.c.bf16 %v2448_v12, %v2448_v12  ;;  %v2298_v55 = vpop.f32.mrb[48].mxu0  ;;  %v1304_v16 = vpop.f32.mrb[49].mxu1 }
 0x223   : > { %v3132_v18 = vadd.f32 %v2298_v55, %v1302_v13  ;;  %v2300_v20 = vpop.f32.mrb[49].mxu0  ;;  %v1305_v22 = vpop.f32.mrb[50].mxu1 }
 0x224   : > { %2609 = vst.msk [vmem:[%s4112_s16 + $0x5c] sm:$0xf] %vm2585_vm2, %v3079_v15  ;;  %v2301_v23 = vpop.f32.mrb[50].mxu0  ;;  %v1307_v57 = vpop.f32.mrb[51].mxu1 }
 0x225   : > { %vm2385_vm11 = vcmp.ge.f32.partialorder %v3132_v18, 0.0  ;;  %v2417_v24 = vmul.f32 0.1, %v3132_v18  ;;  %v3133_v27 = vadd.f32 %v2301_v23, %v1305_v22  ;;  %v2303_v30 = vpop.f32.mrb[51].mxu0 }
 0x227   : > { %v2449_v32 = vsel %vm2385_vm11, %v3132_v18, %v2417_v24  ;;  %vm2386_vm12 = vcmp.ge.f32.partialorder %v3133_v27, 0.0  ;;  %v2418_v37 = vmul.f32 0.1, %v3133_v27 }
 0x228   : > { %v3080_v42 = vpack.c.bf16 %v2449_v32, %v2449_v32 }
 0x229   : > { %v2450_v44 = vsel %vm2386_vm12, %v3133_v27, %v2418_v37  ;;  %v1310_v46 = vpop.f32.mrb[52].mxu1 }
 0x22a   : > { %2610 = vst.msk [vmem:[%s4112_s16 + $0x60] sm:$0xf] %vm2585_vm2, %v3080_v42  ;;  %v3081_v36 = vpack.c.bf16 %v2450_v44, %v2450_v44  ;;  %v2306_v48 = vpop.f32.mrb[52].mxu0  ;;  %v1312_v50 = vpop.f32.mrb[53].mxu1 }
 0x22b   : > { %v3134_v52 = vadd.f32 %v2306_v48, %v1310_v46  ;;  %v2308_v41 = vpop.f32.mrb[53].mxu0  ;;  %v1313_v54 = vpop.f32.mrb[54].mxu1 }
 0x22c   : > { %2611 = vst.msk [vmem:[%s4112_s16 + $0x64] sm:$0xf] %vm2585_vm2, %v3081_v36  ;;  %v2309_v56 = vpop.f32.mrb[54].mxu0  ;;  %v1315_v58 = vpop.f32.mrb[55].mxu1 }
 0x22d   : > { %vm2387_vm13 = vcmp.ge.f32.partialorder %v3134_v52, 0.0  ;;  %v2419_v59 = vmul.f32 0.1, %v3134_v52  ;;  %v3135_v60 = vadd.f32 %v2309_v56, %v1313_v54  ;;  %v2311_v61 = vpop.f32.mrb[55].mxu0 }
 0x22f   : > { %v2451_v62 = vsel %vm2387_vm13, %v3134_v52, %v2419_v59  ;;  %vm2388_vm14 = vcmp.ge.f32.partialorder %v3135_v60, 0.0  ;;  %v2420_v43 = vmul.f32 0.1, %v3135_v60 }
 0x230   : > { %v3082_v63 = vpack.c.bf16 %v2451_v62, %v2451_v62 }
 0x231   : > { %v2452_v0 = vsel %vm2388_vm14, %v3135_v60, %v2420_v43  ;;  %v1318_v3 = vpop.f32.mrb[56].mxu1 }
 0x232   : > { %2612 = vst.msk [vmem:[%s4112_s16 + $0x68] sm:$0xf] %vm2585_vm2, %v3082_v63  ;;  %v3083_v45 = vpack.c.bf16 %v2452_v0, %v2452_v0  ;;  %v2314_v5 = vpop.f32.mrb[56].mxu0  ;;  %v1320_v7 = vpop.f32.mrb[57].mxu1 }
 0x233   : > { %v3136_v9 = vadd.f32 %v2314_v5, %v1318_v3  ;;  %v2316_v11 = vpop.f32.mrb[57].mxu0  ;;  %v1321_v14 = vpop.f32.mrb[58].mxu1 }
 0x234   : > { %2613 = vst.msk [vmem:[%s4112_s16 + $0x6c] sm:$0xf] %vm2585_vm2, %v3083_v45  ;;  %v2317_v17 = vpop.f32.mrb[58].mxu0  ;;  %v1323_v19 = vpop.f32.mrb[59].mxu1 }
 0x235   : > { %vm2389_vm15 = vcmp.ge.f32.partialorder %v3136_v9, 0.0  ;;  %v2421_v47 = vmul.f32 0.1, %v3136_v9  ;;  %v3137_v21 = vadd.f32 %v2317_v17, %v1321_v14  ;;  %v2319_v25 = vpop.f32.mrb[59].mxu0 }
 0x237   : > { %v2453_v26 = vsel %vm2389_vm15, %v3136_v9, %v2421_v47  ;;  %vm2390_vm0 = vcmp.ge.f32.partialorder %v3137_v21, 0.0  ;;  %v2422_v49 = vmul.f32 0.1, %v3137_v21 }
 0x238   : > { %v3084_v28 = vpack.c.bf16 %v2453_v26, %v2453_v26 }
 0x239   : > { %v2454_v29 = vsel %vm2390_vm0, %v3137_v21, %v2422_v49  ;;  %v1326_v31 = vpop.f32.mrb[60].mxu1 }
 0x23a   : > { %2614 = vst.msk [vmem:[%s4112_s16 + $0x70] sm:$0xf] %vm2585_vm2, %v3084_v28  ;;  %v3085_v33 = vpack.c.bf16 %v2454_v29, %v2454_v29  ;;  %v2322_v34 = vpop.f32.mrb[60].mxu0  ;;  %v1328_v35 = vpop.f32.mrb[61].mxu1 }
 0x23b   : > { %v3138_v38 = vadd.f32 %v2322_v34, %v1326_v31  ;;  %v2324_v51 = vpop.f32.mrb[61].mxu0  ;;  %v1329_v39 = vpop.f32.mrb[62].mxu1 }
 0x23c   : > { %2615 = vst.msk [vmem:[%s4112_s16 + $0x74] sm:$0xf] %vm2585_vm2, %v3085_v33  ;;  %v2325_v40 = vpop.f32.mrb[62].mxu0  ;;  %v1331_v2 = vpop.f32.mrb[63].mxu1 }
 0x23d   : > { %vm2391_vm1 = vcmp.ge.f32.partialorder %v3138_v38, 0.0  ;;  %v2423_v4 = vmul.f32 0.1, %v3138_v38  ;;  %v3139_v53 = vadd.f32 %v2325_v40, %v1329_v39  ;;  %v2327_v6 = vpop.f32.mrb[63].mxu0 }
 0x23f   : > { %v2455_v1 = vsel %vm2391_vm1, %v3138_v38, %v2423_v4  ;;  %vm2392_vm3 = vcmp.ge.f32.partialorder %v3139_v53, 0.0  ;;  %v2424_v8 = vmul.f32 0.1, %v3139_v53 }
 0x240   : > { %v3086_v10 = vpack.c.bf16 %v2455_v1, %v2455_v1 }
 0x241   : > { %v2456_v12 = vsel %vm2392_vm3, %v3139_v53, %v2424_v8 }
 0x242   : > { %2616 = vst.msk [vmem:[%s4112_s16 + $0x78] sm:$0xf] %vm2585_vm2, %v3086_v10  ;;  %v3087_v13 = vpack.c.bf16 %v2456_v12, %v2456_v12 }
 0x244   : > { %2617 = vst.msk [vmem:[%s4112_s16 + $0x7c] sm:$0xf] %vm2585_vm2, %v3087_v13 }
 0x245 PF: > { %s12_s9 = sadd.s32 1, %s3458_s9  }
 0x246   : > { %p9_p4 = scmp.ge.s32.totalorder %s12_s9, 4  }
 0x248   :  { %11 = sbr.rel (!%p9_p4) target bundleno = 1 (0x1), region = 62 }

// kernel: a_hv_fuse_forward.8
= control target key start
LH: loop header
LB: loop body
LE: loop exit
PB: predicated region body
PF: predicated region fallthrough
CT: control target
= control target key end

     0   :  { %12 = vsyncpa [#allocation3], 0  ;;  %s2617_s0 = inlined_call_operand.vmem [shape: bf16[512,32], index: 0, kind: input, shape index: {}]   ;;  %s2618_s1 = inlined_call_operand.vmem [shape: bf16[512,32], index: 1, kind: input, shape index: {}]   ;;  %s2619_s2 = inlined_call_operand.vmem [shape: bf16[512,32], index: 2, kind: input, shape index: {}]   ;;  %s2620_s3 = inlined_call_operand.vmem [shape: bf16[32,32], index: 3, kind: input, shape index: {}]   ;;  %s2621_s4 = inlined_call_operand.vmem [shape: bf16[32,32], index: 4, kind: input, shape index: {}]   ;;  %s2622_s5 = inlined_call_operand.vmem [shape: bf16[32,32], index: 5, kind: input, shape index: {}]   ;;  %s2623_s6 = inlined_call_operand.vmem [shape: f32[512,32], index: 6, kind: input, shape index: {}]   ;;  %s2624_s7 = inlined_call_operand.hbm [shape: f32[512,32], index: 7, kind: output, shape index: {}]  }
   0x1   :  { %14 = vsyncpa [#allocation3 + $0x1], 0  ;;  %s2248_s24 = smov 0   ;;  %s2250_s25 = smov 0  }
   0x2   :  { %s2252_s26 = smov 0   ;;  %s2254_s27 = smov 0  }
   0x3 LB: > { %s2269_s28 = sadd.s32 4294967295, %s2203_s27   ;;  %s1695_s29 = sadd.s32 4294967294, %s2203_s27   ;;  %s2203_s27 = sphi %s2254_s27, %s2630_s27   ;;  %s2199_s26 = sphi %s2252_s26, %s2629_s26   ;;  %s2195_s25 = sphi %s2250_s25, %s2628_s25   ;;  %s2191_s24 = sphi %s2248_s24, %s2627_s24  }
   0x4   : > { %s2273_s30 = sadd.s32 1, %s2203_s27   ;;  %s194_s8 = sadd.s32 1, %s2199_s26 }
   0x5   : > { %s191_s9 = ssub.s32 %s2203_s27, %s2273_s30  ;;  %p204_p0 = scmp.ne.s32.totalorder %s2199_s26, %s2195_s25 }
   0x6   : > { %p192_p1 = scmp.eq.s32.totalorder %s191_s9, 0  ;;  %p205_p2 = scmp.eq.s32.totalorder %s2269_s28, 1 }
   0x7   : > { %p210_p3 = scmp.ne.s32.totalorder %s2195_s25, %s2191_s24  ;;  %p211_p4 = scmp.eq.s32.totalorder %s1695_s29, 1 }
   0x8   : > { %s2284_s10 = scalar_select %p192_p1, %s2199_s26, %s194_s8  }
   0x9   : > { %p2286_p5 = por %p205_p2, %p204_p0  ;;  %p2290_p6 = por %p211_p4, %p210_p3 }
   0xa   : > { %p1698_p7 = scmp.ge.s32.totalorder %s2203_s27, 1  ;;  %p274_p8 = scmp.lt.s32.totalorder %s2203_s27, 3 }
   0xc   : > { %p275_p9 = pnand %p1698_p7, %p274_p8 }
   0xd   : > { %v2087_v0 = vld [vmem:[%s2621_s4] sm:$0xff] (!%p275_p9)   ;;  %s1700_s15 = sshll.u32 (!%p275_p9), %s2269_s28, 5  ;;  %v2089_v2 = vld [vmem:[%s2621_s4 + $0x8] sm:$0xff] (!%p275_p9)   ;;  %vm511_vm0 = vcmask (!%p275_p9), 261120   ;;  %s318_s29 = sand.u32 (!%p275_p9), 1, %s2195_s25  }
   0xe   : > { %278 = sbr.rel (%p275_p9) target bundleno = 352 (0x160), region = 48  ;;  %v2088_v1 = vld [vmem:[%s2620_s3] sm:$0xff] (!%p275_p9)   ;;  %p322_p10 = scmp.lt.s32.totalorder (!%p275_p9), %s1700_s15, 63  ;;  %1870 = vmatprep.subr.bf16.mxu1 (!%p275_p9), %v2087_v0  ;;  %v2090_v3 = vld [vmem:[%s2620_s3 + $0x8] sm:$0xff] (!%p275_p9)  }
   0xf   : > { %1906 = vmatprep.subr.bf16.mxu0 (!%p275_p9), %v2088_v1  ;;  %1871 = vmatpush3.bf16.msra.mxu1 (!%p275_p9), %v2087_v0  ;;  %v2095_v4 = vld [vmem:[%s2622_s5] sm:$0xff] (!%p275_p9)   ;;  %v2104_v7 = vld [vmem:[%s2622_s5 + $0x8] sm:$0xff] (!%p275_p9)   ;;  %s1699_s14 = sshll.u32 (!%p275_p9), %s318_s29, 8  ;;  %s1815_s16 = sshll.u32 (!%p275_p9), %s2269_s28, 12 }
  0x10   : > { %1907 = vmatpush3.bf16.msra.mxu0 (!%p275_p9), %v2088_v1  ;;  %1872 = vmatprep.subr.bf16.mxu1 (!%p275_p9), %v2089_v2  ;;  %s2564_s28 = scalar_lea.hbm (!%p275_p9), %s2624_s7, %s1815_s16  ;;  %s2576_s20 = scalar_lea.sflag (!%p275_p9), [#allocation3], %s318_s29 }
  0x11   : > { %1908 = vmatprep.subr.bf16.mxu0 (!%p275_p9), %v2090_v3 }
  0x13   : > { %1873 = vmatpush3.bf16.msra.mxu1 (!%p275_p9), %v2089_v2 }
  0x14   : > { %1909 = vmatpush3.bf16.msra.mxu0 (!%p275_p9), %v2090_v3  ;;  %1978 = vmatprep.subr.bf16.mxu1 (!%p275_p9), %v2088_v1 }
  0x15   : > { %s2632_s15 = smov (!%p322_p10, %s1700_s15), 63  ;;  %1942 = vmatprep.subr.bf16.mxu0 %v2095_v4 }
  0x16   : > { %s2312_s22 = sshll.u32 %s2632_s15, 2 }
  0x17   : > { %s2321_s13 = scalar_lea.vmem %s2618_s1, %s2312_s22  ;;  %s2328_s17 = scalar_lea.vmem %s2617_s0, %s2312_s22 }
  0x18   : > { %v2091_v5 = vld [vmem:[%s2321_s13] sm:$0xff]   ;;  %v2093_v8 = vld [vmem:[%s2321_s13 + $0x8] sm:$0xff]   ;;  %v2096_v10 = vld [vmem:[%s2321_s13 + $0x10] sm:$0xff]   ;;  %s2357_s23 = scalar_lea.vmem %s2619_s2, %s2312_s22  ;;  %s1707_s22 = sshll.u32 %s2632_s15, 3 }
  0x19   : > { %v2092_v6 = vld [vmem:[%s2328_s17] sm:$0xff]   ;;  %1874 = vmatprep.mubr.msk.bf16.mxu1 %vm511_vm0, %v2091_v5  ;;  %v2094_v9 = vld [vmem:[%s2328_s17 + $0x8] sm:$0xff]   ;;  %v2097_v11 = vld [vmem:[%s2328_s17 + $0x10] sm:$0xff]   ;;  %s2463_s15 = scalar_lea.vmem [#allocation2], %s1699_s14 }
  0x1a   : > { %1910 = vmatprep.mubr.msk.bf16.mxu0 %vm511_vm0, %v2092_v6  ;;  %1875 = vmatmul.mubr.msk.bf16.vlgmr.msra.gmra.mrb[0].mxu1 %vm511_vm0, %v2093_v8  ;;  %v2098_v12 = vld [vmem:[%s2321_s13 + $0x18] sm:$0xff]   ;;  %v2100_v14 = vld [vmem:[%s2321_s13 + $0x20] sm:$0xff]   ;;  %v2102_v16 = vld [vmem:[%s2321_s13 + $0x28] sm:$0xff]  }
  0x1b   : > { %1911 = vmatmul.mubr.msk.bf16.vlgmr.msra.gmra.mrb[0].mxu0 %vm511_vm0, %v2094_v9  ;;  %1980 = vmatpush3.bf16.msra.mxu1 %v2088_v1  ;;  %v2099_v13 = vld [vmem:[%s2328_s17 + $0x18] sm:$0xff]   ;;  %v2101_v15 = vld [vmem:[%s2328_s17 + $0x20] sm:$0xff]   ;;  %v2103_v17 = vld [vmem:[%s2328_s17 + $0x28] sm:$0xff]  }
  0x1c   : > { %1943 = vmatpush3.bf16.msra.mxu0 %v2095_v4  ;;  %1878 = vmatprep.mubr.msk.bf16.mxu1 %vm511_vm0, %v2096_v10  ;;  %v2105_v18 = vld [vmem:[%s2321_s13 + $0x30] sm:$0xff]   ;;  %v2107_v20 = vld [vmem:[%s2321_s13 + $0x38] sm:$0xff]   ;;  %v2109_v22 = vld [vmem:[%s2321_s13 + $0x40] sm:$0xff]  }
  0x1d   : > { %1914 = vmatprep.mubr.msk.bf16.mxu0 %vm511_vm0, %v2097_v11  ;;  %1944 = vmatprep.subr.bf16.mxu0 %v2104_v7  ;;  %v2106_v19 = vld [vmem:[%s2328_s17 + $0x30] sm:$0xff]   ;;  %v2108_v21 = vld [vmem:[%s2328_s17 + $0x38] sm:$0xff]   ;;  %v2110_v23 = vld [vmem:[%s2357_s23] sm:$0xff]  }
  0x1e   : > { %1979 = vmatprep.subr.bf16.mxu1 %v2090_v3  ;;  %v2111_v24 = vld [vmem:[%s2321_s13 + $0x48] sm:$0xff]   ;;  %v2113_v26 = vld [vmem:[%s2321_s13 + $0x50] sm:$0xff]   ;;  %v2115_v28 = vld [vmem:[%s2321_s13 + $0x58] sm:$0xff]  }
  0x1f   : > { %1981 = vmatpush3.bf16.msra.mxu1 %v2090_v3  ;;  %v2112_v25 = vld [vmem:[%s2357_s23 + $0x8] sm:$0xff]   ;;  %v2114_v27 = vld [vmem:[%s2357_s23 + $0x10] sm:$0xff]   ;;  %v2116_v29 = vld [vmem:[%s2357_s23 + $0x18] sm:$0xff]  }
  0x20   : > { %1945 = vmatpush3.bf16.msra.mxu0 %v2104_v7  ;;  %v2117_v30 = vld [vmem:[%s2321_s13 + $0x60] sm:$0xff]   ;;  %v2119_v32 = vld [vmem:[%s2321_s13 + $0x68] sm:$0xff]   ;;  %v2121_v34 = vld [vmem:[%s2321_s13 + $0x70] sm:$0xff]  }
  0x21   : > { %v2118_v31 = vld [vmem:[%s2357_s23 + $0x20] sm:$0xff]   ;;  %v2120_v33 = vld [vmem:[%s2357_s23 + $0x28] sm:$0xff]   ;;  %v2122_v35 = vld [vmem:[%s2357_s23 + $0x30] sm:$0xff]  }
  0x22   : > { %1879 = vmatmul.mubr.msk.bf16.gmra.mrb[4].mxu1 %vm511_vm0, %v2098_v12  ;;  %v2123_v36 = vld [vmem:[%s2321_s13 + $0x78] sm:$0xff]   ;;  %v2125_v38 = vld [vmem:[%s2328_s17 + $0x40] sm:$0xff]   ;;  %v2127_v40 = vld [vmem:[%s2328_s17 + $0x48] sm:$0xff]   ;;  %s2455_s13 = scalar_lea.vmem %s2623_s6, %s1707_s22 }
  0x23   : > { %1915 = vmatmul.mubr.msk.bf16.gmra.mrb[4].mxu0 %vm511_vm0, %v2099_v13  ;;  %1882 = vmatprep.mubr.msk.bf16.mxu1 %vm511_vm0, %v2100_v14  ;;  %v2124_v37 = vld [vmem:[%s2357_s23 + $0x38] sm:$0xff]   ;;  %v2126_v39 = vld [vmem:[%s2357_s23 + $0x40] sm:$0xff]   ;;  %v2128_v41 = vld [vmem:[%s2357_s23 + $0x48] sm:$0xff]  }
  0x24   : > { %1918 = vmatprep.mubr.msk.bf16.mxu0 %vm511_vm0, %v2101_v15  ;;  %v2129_v42 = vld [vmem:[%s2328_s17 + $0x50] sm:$0xff]   ;;  %v2131_v44 = vld [vmem:[%s2328_s17 + $0x58] sm:$0xff]   ;;  %v2133_v46 = vld [vmem:[%s2328_s17 + $0x60] sm:$0xff]  }
  0x25   : > { %v2130_v43 = vld [vmem:[%s2357_s23 + $0x50] sm:$0xff]   ;;  %v2132_v45 = vld [vmem:[%s2357_s23 + $0x58] sm:$0xff]   ;;  %v2134_v47 = vld [vmem:[%s2357_s23 + $0x60] sm:$0xff]  }
  0x26   : > { %v2135_v48 = vld [vmem:[%s2328_s17 + $0x68] sm:$0xff]   ;;  %v2137_v50 = vld [vmem:[%s2328_s17 + $0x70] sm:$0xff]   ;;  %v2139_v52 = vld [vmem:[%s2328_s17 + $0x78] sm:$0xff]   ;;  %s1597_s17 = sshll.u32 %s2463_s15, 4  ;;  %s2566_s17 = int_to_ptr.vmem [resolvable:$true] %s1597_s17 }
  0x27   : > { %v2136_v49 = vld [vmem:[%s2357_s23 + $0x68] sm:$0xff]   ;;  %v2138_v51 = vld [vmem:[%s2357_s23 + $0x70] sm:$0xff]   ;;  %v2140_v53 = vld [vmem:[%s2357_s23 + $0x78] sm:$0xff]   ;;  %s2141_s21 = scalar_lea.vmem %s2566_s17, 4096  ;;  %s2205_s23 = smov [#allocation2]  }
  0x28   : > { %v1489_v12 = vld [vmem:[%s2455_s13 + $0x10] sm:$0xff]  ;;  %p2142_p11 = scmp.ne.s32.totalorder %s2566_s17, %s2141_s21  ;;  %s2145_s22 = sshll.u32 %s2205_s23, 4  ;;  %s2146_s22 = int_to_ptr.vmem [resolvable:$false] %s2145_s22 }
  0x29   : > { %s2147_s8 = scalar_lea.vmem %s2146_s22, 8192  ;;  %p2148_p0 = scmp.lt.s32.totalorder %s2566_s17, %s2146_s22 }
  0x2a   : > { %1883 = vmatmul.mubr.msk.bf16.gmra.mrb[8].mxu1 %vm511_vm0, %v2102_v16  ;;  %v1487_v16 = vld [vmem:[%s2455_s13] sm:$0xff]  ;;  %p2143_p12 = pnand %p2142_p11, %p2286_p5  ;;  %p2149_p1 = scmp.lt.s32.totalorder %s2147_s8, %s2141_s21 }
  0x2b   : > { %1919 = vmatmul.mubr.msk.bf16.gmra.mrb[8].mxu0 %vm511_vm0, %v2103_v17  ;;  %1886 = vmatprep.mubr.msk.bf16.mxu1 %vm511_vm0, %v2105_v18 }
  0x2c   : > { %1922 = vmatprep.mubr.msk.bf16.mxu0 %vm511_vm0, %v2106_v19  ;;  %p2144_p13 = pneg %p2143_p12  ;;  %p2150_p2 = por %p2149_p1, %p2148_p0 }
  0x2e   : > { %p2151_p3 = pnand %p2150_p2, %p2144_p13 }
  0x32   : > { %1887 = vmatmul.mubr.msk.bf16.gmra.mrb[12].mxu1 %vm511_vm0, %v2107_v20  ;;  %v1490_v20 = vld [vmem:[%s2455_s13 + $0x18] sm:$0xff] }
  0x33   : > { %1923 = vmatmul.mubr.msk.bf16.gmra.mrb[12].mxu0 %vm511_vm0, %v2108_v21  ;;  %1890 = vmatprep.mubr.msk.bf16.mxu1 %vm511_vm0, %v2109_v22 }
  0x34   : > { %1946 = vmatprep.mubr.msk.bf16.mxu0 %vm511_vm0, %v2110_v23 }
  0x3a   : > { %1891 = vmatmul.mubr.msk.bf16.gmra.mrb[16].mxu1 %vm511_vm0, %v2111_v24  ;;  %v1488_v24 = vld [vmem:[%s2455_s13 + $0x8] sm:$0xff] }
  0x3b   : > { %1947 = vmatmul.mubr.msk.bf16.vlgmr.msra.gmra.mrb[0].mxu0 %vm511_vm0, %v2112_v25  ;;  %1894 = vmatprep.mubr.msk.bf16.mxu1 %vm511_vm0, %v2113_v26 }
  0x3c   : > { %1950 = vmatprep.mubr.msk.bf16.mxu0 %vm511_vm0, %v2114_v27 }
  0x42   : > { %1895 = vmatmul.mubr.msk.bf16.gmra.mrb[20].mxu1 %vm511_vm0, %v2115_v28 }
  0x43   : > { %1951 = vmatmul.mubr.msk.bf16.gmra.mrb[4].mxu0 %vm511_vm0, %v2116_v29  ;;  %1898 = vmatprep.mubr.msk.bf16.mxu1 %vm511_vm0, %v2117_v30 }
  0x44   : > { %1954 = vmatprep.mubr.msk.bf16.mxu0 %vm511_vm0, %v2118_v31 }
  0x4a   : > { %1899 = vmatmul.mubr.msk.bf16.gmra.mrb[24].mxu1 %vm511_vm0, %v2119_v32 }
  0x4b   : > { %1955 = vmatmul.mubr.msk.bf16.gmra.mrb[8].mxu0 %vm511_vm0, %v2120_v33  ;;  %1902 = vmatprep.mubr.msk.bf16.mxu1 %vm511_vm0, %v2121_v34 }
  0x4c   : > { %1958 = vmatprep.mubr.msk.bf16.mxu0 %vm511_vm0, %v2122_v35 }
  0x52   : > { %1903 = vmatmul.mubr.msk.bf16.gmra.mrb[28].mxu1 %vm511_vm0, %v2123_v36  ;;  %v1493_v36 = vld [vmem:[%s2455_s13 + $0x30] sm:$0xff] }
  0x53   : > { %1959 = vmatmul.mubr.msk.bf16.gmra.mrb[12].mxu0 %vm511_vm0, %v2124_v37  ;;  %1926 = vmatprep.mubr.msk.bf16.mxu1 %vm511_vm0, %v2125_v38 }
  0x54   : > { %1962 = vmatprep.mubr.msk.bf16.mxu0 %vm511_vm0, %v2126_v39 }
  0x5a   : > { %1927 = vmatmul.mubr.msk.bf16.vlgmr.msra.gmra.mrb[16].mxu1 %vm511_vm0, %v2127_v40  ;;  %v1491_v40 = vld [vmem:[%s2455_s13 + $0x20] sm:$0xff] }
  0x5b   : > { %1963 = vmatmul.mubr.msk.bf16.gmra.mrb[16].mxu0 %vm511_vm0, %v2128_v41  ;;  %1930 = vmatprep.mubr.msk.bf16.mxu1 %vm511_vm0, %v2129_v42 }
  0x5c   : > { %1966 = vmatprep.mubr.msk.bf16.mxu0 %vm511_vm0, %v2130_v43 }
  0x62   : > { %1931 = vmatmul.mubr.msk.bf16.gmra.mrb[20].mxu1 %vm511_vm0, %v2131_v44  ;;  %v1494_v44 = vld [vmem:[%s2455_s13 + $0x38] sm:$0xff] }
  0x63   : > { %1967 = vmatmul.mubr.msk.bf16.gmra.mrb[20].mxu0 %vm511_vm0, %v2132_v45  ;;  %1934 = vmatprep.mubr.msk.bf16.mxu1 %vm511_vm0, %v2133_v46 }
  0x64   : > { %1970 = vmatprep.mubr.msk.bf16.mxu0 %vm511_vm0, %v2134_v47 }
  0x6a   : > { %1935 = vmatmul.mubr.msk.bf16.gmra.mrb[24].mxu1 %vm511_vm0, %v2135_v48  ;;  %v1492_v48 = vld [vmem:[%s2455_s13 + $0x28] sm:$0xff] }
  0x6b   : > { %1971 = vmatmul.mubr.msk.bf16.gmra.mrb[24].mxu0 %vm511_vm0, %v2136_v49  ;;  %1938 = vmatprep.mubr.msk.bf16.mxu1 %vm511_vm0, %v2137_v50 }
  0x6c   : > { %1974 = vmatprep.mubr.msk.bf16.mxu0 %vm511_vm0, %v2138_v51 }
  0x72   : > { %1939 = vmatmul.mubr.msk.bf16.gmra.mrb[28].mxu1 %vm511_vm0, %v2139_v52 }
  0x73   : > { %1975 = vmatmul.mubr.msk.bf16.gmra.mrb[28].mxu0 %vm511_vm0, %v2140_v53 }
  0xed   : > { %v1876_v54 = vpop.f32.mrb[0].mxu1 }
  0xee   : > { %v594_v55 = vpop.f32.mrb[1].mxu1 }
  0xef   : > { %v1877_v56 = vpop.f32.mrb[2].mxu1 }
  0xf0   : > { %v597_v57 = vpop.f32.mrb[3].mxu1 }
  0xf5   : > { %v1880_v58 = vpop.f32.mrb[4].mxu1 }
  0xf6   : > { %v610_v59 = vpop.f32.mrb[5].mxu1 }
  0xf7   : > { %v1881_v60 = vpop.f32.mrb[6].mxu1 }
  0xf8   : > { %v613_v61 = vpop.f32.mrb[7].mxu1 }
  0xfd   : > { %v2434_v62 = vpop.f32.mrb[8].mxu1 }
  0xfe   : > { %v2436_v63 = vpop.f32.mrb[9].mxu1 }
  0xff   : > { %v2438_v0 = vpop.f32.mrb[10].mxu1 }
 0x100   : > { %v2440_v1 = vpop.f32.mrb[11].mxu1 }
 0x105   : > { %v2442_v2 = vpop.f32.mrb[12].mxu1 }
 0x106   : > { %v2444_v3 = vpop.f32.mrb[13].mxu1 }
 0x107   : > { %v2446_v4 = vpop.f32.mrb[14].mxu1 }
 0x108   : > { %v2448_v5 = vpop.f32.mrb[15].mxu1 }
 0x10e   : > { %v1948_v6 = vpop.f32.mrb[0].mxu0 }
 0x10f   : > { %v1982_v7 = vadd.f32 %v1948_v6, %v1876_v54  ;;  %v1232_v8 = vpop.f32.mrb[1].mxu0 }
 0x110   : > { %v1983_v9 = vadd.f32 %v1232_v8, %v594_v55  ;;  %v1949_v10 = vpop.f32.mrb[2].mxu0 }
 0x111   : > { %vm1393_vm1 = vcmp.ge.f32.partialorder %v1982_v7, 0.0  ;;  %v1425_v11 = vmul.f32 0.1, %v1982_v7  ;;  %v1984_v13 = vadd.f32 %v1949_v10, %v1877_v56  ;;  %v1235_v14 = vpop.f32.mrb[3].mxu0  ;;  %v1498_v10 = vld [vmem:[%s2455_s13 + $0x58] sm:$0xff] }
 0x112   : > { %vm1391_vm2 = vcmp.ge.f32.partialorder %v1983_v9, 0.0  ;;  %v1423_v15 = vmul.f32 0.1, %v1983_v9  ;;  %v1985_v17 = vadd.f32 %v1235_v14, %v597_v57  ;;  %v1496_v14 = vld [vmem:[%s2455_s13 + $0x48] sm:$0xff] }
 0x113   : > { %v1457_v18 = vsel %vm1393_vm1, %v1982_v7, %v1425_v11  ;;  %vm1394_vm3 = vcmp.ge.f32.partialorder %v1984_v13, 0.0  ;;  %v1426_v19 = vmul.f32 0.1, %v1984_v13 }
 0x114   : > { %v1521_v21 = vadd.f32 %v1489_v12, %v1457_v18  ;;  %v1455_v22 = vsel %vm1391_vm2, %v1983_v9, %v1423_v15  ;;  %vm1392_vm4 = vcmp.ge.f32.partialorder %v1985_v17, 0.0  ;;  %v1424_v23 = vmul.f32 0.1, %v1985_v17 }
 0x115   : > { %v1519_v25 = vadd.f32 %v1487_v16, %v1455_v22  ;;  %v1458_v26 = vsel %vm1394_vm3, %v1984_v13, %v1426_v19 }
 0x116   : > { %1553 = vst.msk [vmem:[%s2463_s15 + $0x10] sm:$0xff] %vm511_vm0, %v1521_v21  ;;  %v1522_v27 = vadd.f32 %v1490_v20, %v1458_v26  ;;  %v1456_v28 = vsel %vm1392_vm4, %v1985_v17, %v1424_v23  ;;  %v1952_v29 = vpop.f32.mrb[4].mxu0 }
 0x117   : > { %1551 = vst.msk [vmem:[%s2463_s15] sm:$0xff] %vm511_vm0, %v1519_v25  ;;  %v1520_v30 = vadd.f32 %v1488_v24, %v1456_v28  ;;  %v1986_v31 = vadd.f32 %v1952_v29, %v1880_v58  ;;  %v1248_v32 = vpop.f32.mrb[5].mxu0  ;;  %v1501_v24 = vld [vmem:[%s2455_s13 + $0x70] sm:$0xff] }
 0x118   : > { %1554 = vst.msk [vmem:[%s2463_s15 + $0x18] sm:$0xff] %vm511_vm0, %v1522_v27  ;;  %v1987_v33 = vadd.f32 %v1248_v32, %v610_v59  ;;  %v1953_v34 = vpop.f32.mrb[6].mxu0 }
 0x119   : > { %1552 = vst.msk [vmem:[%s2463_s15 + $0x8] sm:$0xff] %vm511_vm0, %v1520_v30  ;;  %vm1397_vm5 = vcmp.ge.f32.partialorder %v1986_v31, 0.0  ;;  %v1429_v35 = vmul.f32 0.1, %v1986_v31  ;;  %v1988_v37 = vadd.f32 %v1953_v34, %v1881_v60  ;;  %v1251_v38 = vpop.f32.mrb[7].mxu0  ;;  %v1497_v60 = vld [vmem:[%s2455_s13 + $0x50] sm:$0xff] }
 0x11a   : > { %vm1395_vm6 = vcmp.ge.f32.partialorder %v1987_v33, 0.0  ;;  %v1427_v39 = vmul.f32 0.1, %v1987_v33  ;;  %v1989_v41 = vadd.f32 %v1251_v38, %v613_v61  ;;  %v1502_v30 = vld [vmem:[%s2455_s13 + $0x78] sm:$0xff]  ;;  %v1500_v34 = vld [vmem:[%s2455_s13 + $0x68] sm:$0xff] }
 0x11b   : > { %v1461_v42 = vsel %vm1397_vm5, %v1986_v31, %v1429_v35  ;;  %vm1398_vm7 = vcmp.ge.f32.partialorder %v1988_v37, 0.0  ;;  %v1430_v43 = vmul.f32 0.1, %v1988_v37 }
 0x11c   : > { %v1525_v45 = vadd.f32 %v1493_v36, %v1461_v42  ;;  %v1459_v46 = vsel %vm1395_vm6, %v1987_v33, %v1427_v39  ;;  %vm1396_vm8 = vcmp.ge.f32.partialorder %v1989_v41, 0.0  ;;  %v1428_v47 = vmul.f32 0.1, %v1989_v41 }
 0x11d   : > { %v1523_v49 = vadd.f32 %v1491_v40, %v1459_v46  ;;  %v1462_v50 = vsel %vm1398_vm7, %v1988_v37, %v1430_v43 }
 0x11e   : > { %1557 = vst.msk [vmem:[%s2463_s15 + $0x30] sm:$0xff] %vm511_vm0, %v1525_v45  ;;  %v1526_v51 = vadd.f32 %v1494_v44, %v1462_v50  ;;  %v1460_v52 = vsel %vm1396_vm8, %v1989_v41, %v1428_v47  ;;  %v1956_v53 = vpop.f32.mrb[8].mxu0 }
 0x11f   : > { %1555 = vst.msk [vmem:[%s2463_s15 + $0x20] sm:$0xff] %vm511_vm0, %v1523_v49  ;;  %v1524_v54 = vadd.f32 %v1492_v48, %v1460_v52  ;;  %v1990_v55 = vadd.f32 %v1956_v53, %v2434_v62  ;;  %v1264_v56 = vpop.f32.mrb[9].mxu0  ;;  %v1495_v62 = vld [vmem:[%s2455_s13 + $0x40] sm:$0xff]  ;;  %v1505_v48 = vld [vmem:[%s2455_s13 + $0x90] sm:$0xff] }
 0x120   : > { %1558 = vst.msk [vmem:[%s2463_s15 + $0x38] sm:$0xff] %vm511_vm0, %v1526_v51  ;;  %v1991_v57 = vadd.f32 %v1264_v56, %v2436_v63  ;;  %v1957_v58 = vpop.f32.mrb[10].mxu0  ;;  %v1503_v52 = vld [vmem:[%s2455_s13 + $0x80] sm:$0xff]  ;;  %v1506_v56 = vld [vmem:[%s2455_s13 + $0x98] sm:$0xff] }
 0x121   : > { %1556 = vst.msk [vmem:[%s2463_s15 + $0x28] sm:$0xff] %vm511_vm0, %v1524_v54  ;;  %vm1401_vm9 = vcmp.ge.f32.partialorder %v1990_v55, 0.0  ;;  %v1433_v59 = vmul.f32 0.1, %v1990_v55  ;;  %v1992_v61 = vadd.f32 %v1957_v58, %v2438_v0  ;;  %v1267_v6 = vpop.f32.mrb[11].mxu0 }
 0x122   : > { %vm1399_vm10 = vcmp.ge.f32.partialorder %v1991_v57, 0.0  ;;  %v1431_v7 = vmul.f32 0.1, %v1991_v57  ;;  %v1993_v8 = vadd.f32 %v1267_v6, %v2440_v1 }
 0x123   : > { %v1465_v9 = vsel %vm1401_vm9, %v1990_v55, %v1433_v59  ;;  %vm1402_vm11 = vcmp.ge.f32.partialorder %v1992_v61, 0.0  ;;  %v1434_v63 = vmul.f32 0.1, %v1992_v61 }
 0x124   : > { %v1529_v11 = vadd.f32 %v1497_v60, %v1465_v9  ;;  %v1463_v12 = vsel %vm1399_vm10, %v1991_v57, %v1431_v7  ;;  %vm1400_vm12 = vcmp.ge.f32.partialorder %v1993_v8, 0.0  ;;  %v1432_v13 = vmul.f32 0.1, %v1993_v8  ;;  %v1504_v60 = vld [vmem:[%s2455_s13 + $0x88] sm:$0xff] }
 0x125   : > { %v1527_v0 = vadd.f32 %v1495_v62, %v1463_v12  ;;  %v1466_v15 = vsel %vm1402_vm11, %v1992_v61, %v1434_v63 }
 0x126   : > { %1561 = vst.msk [vmem:[%s2463_s15 + $0x50] sm:$0xff] %vm511_vm0, %v1529_v11  ;;  %v1530_v16 = vadd.f32 %v1498_v10, %v1466_v15  ;;  %v1464_v17 = vsel %vm1400_vm12, %v1993_v8, %v1432_v13  ;;  %v1960_v1 = vpop.f32.mrb[12].mxu0 }
 0x127   : > { %1559 = vst.msk [vmem:[%s2463_s15 + $0x40] sm:$0xff] %vm511_vm0, %v1527_v0  ;;  %v1528_v18 = vadd.f32 %v1496_v14, %v1464_v17  ;;  %v1994_v19 = vadd.f32 %v1960_v1, %v2442_v2  ;;  %v1280_v20 = vpop.f32.mrb[13].mxu0  ;;  %v1499_v2 = vld [vmem:[%s2455_s13 + $0x60] sm:$0xff]  ;;  %v1509_v17 = vld [vmem:[%s2455_s13 + $0xb0] sm:$0xff] }
 0x128   : > { %1562 = vst.msk [vmem:[%s2463_s15 + $0x58] sm:$0xff] %vm511_vm0, %v1530_v16  ;;  %v1995_v21 = vadd.f32 %v1280_v20, %v2444_v3  ;;  %v1961_v22 = vpop.f32.mrb[14].mxu0  ;;  %v1507_v20 = vld [vmem:[%s2455_s13 + $0xa0] sm:$0xff] }
 0x129   : > { %1560 = vst.msk [vmem:[%s2463_s15 + $0x48] sm:$0xff] %vm511_vm0, %v1528_v18  ;;  %vm1405_vm13 = vcmp.ge.f32.partialorder %v1994_v19, 0.0  ;;  %v1437_v23 = vmul.f32 0.1, %v1994_v19  ;;  %v1996_v25 = vadd.f32 %v1961_v22, %v2446_v4  ;;  %v1283_v26 = vpop.f32.mrb[15].mxu0 }
 0x12a   : > { %vm1403_vm14 = vcmp.ge.f32.partialorder %v1995_v21, 0.0  ;;  %v1435_v27 = vmul.f32 0.1, %v1995_v21  ;;  %v1997_v28 = vadd.f32 %v1283_v26, %v2448_v5 }
 0x12b   : > { %v1469_v29 = vsel %vm1405_vm13, %v1994_v19, %v1437_v23  ;;  %vm1406_vm15 = vcmp.ge.f32.partialorder %v1996_v25, 0.0  ;;  %v1438_v3 = vmul.f32 0.1, %v1996_v25 }
 0x12c   : > { %v1533_v31 = vadd.f32 %v1501_v24, %v1469_v29  ;;  %v1467_v32 = vsel %vm1403_vm14, %v1995_v21, %v1435_v27  ;;  %vm1404_vm1 = vcmp.ge.f32.partialorder %v1997_v28, 0.0  ;;  %v1436_v33 = vmul.f32 0.1, %v1997_v28  ;;  %v1510_v24 = vld [vmem:[%s2455_s13 + $0xb8] sm:$0xff] }
 0x12d   : > { %v1531_v35 = vadd.f32 %v1499_v2, %v1467_v32  ;;  %v1470_v4 = vsel %vm1406_vm15, %v1996_v25, %v1438_v3  ;;  %v1928_v36 = vpop.f32.mrb[16].mxu1  ;;  %v1508_v2 = vld [vmem:[%s2455_s13 + $0xa8] sm:$0xff] }
 0x12e   : > { %1565 = vst.msk [vmem:[%s2463_s15 + $0x70] sm:$0xff] %vm511_vm0, %v1533_v31  ;;  %v1534_v37 = vadd.f32 %v1502_v30, %v1470_v4  ;;  %v1468_v5 = vsel %vm1404_vm1, %v1997_v28, %v1436_v33  ;;  %v1964_v38 = vpop.f32.mrb[16].mxu0  ;;  %v959_v39 = vpop.f32.mrb[17].mxu1 }
 0x12f   : > { %1563 = vst.msk [vmem:[%s2463_s15 + $0x60] sm:$0xff] %vm511_vm0, %v1531_v35  ;;  %v1532_v40 = vadd.f32 %v1500_v34, %v1468_v5  ;;  %v1998_v41 = vadd.f32 %v1964_v38, %v1928_v36  ;;  %v1296_v42 = vpop.f32.mrb[17].mxu0  ;;  %v1929_v43 = vpop.f32.mrb[18].mxu1 }
 0x130   : > { %1566 = vst.msk [vmem:[%s2463_s15 + $0x78] sm:$0xff] %vm511_vm0, %v1534_v37  ;;  %v1999_v44 = vadd.f32 %v1296_v42, %v959_v39  ;;  %v1965_v45 = vpop.f32.mrb[18].mxu0  ;;  %v962_v46 = vpop.f32.mrb[19].mxu1 }
 0x131   : > { %1564 = vst.msk [vmem:[%s2463_s15 + $0x68] sm:$0xff] %vm511_vm0, %v1532_v40  ;;  %vm1409_vm2 = vcmp.ge.f32.partialorder %v1998_v41, 0.0  ;;  %v1441_v47 = vmul.f32 0.1, %v1998_v41  ;;  %v2000_v49 = vadd.f32 %v1965_v45, %v1929_v43  ;;  %v1299_v50 = vpop.f32.mrb[19].mxu0  ;;  %v1513_v40 = vld [vmem:[%s2455_s13 + $0xd0] sm:$0xff] }
 0x132   : > { %vm1407_vm3 = vcmp.ge.f32.partialorder %v1999_v44, 0.0  ;;  %v1439_v51 = vmul.f32 0.1, %v1999_v44  ;;  %v2001_v53 = vadd.f32 %v1299_v50, %v962_v46 }
 0x133   : > { %v1473_v54 = vsel %vm1409_vm2, %v1998_v41, %v1441_v47  ;;  %vm1410_vm4 = vcmp.ge.f32.partialorder %v2000_v49, 0.0  ;;  %v1442_v55 = vmul.f32 0.1, %v2000_v49 }
 0x134   : > { %v1537_v57 = vadd.f32 %v1505_v48, %v1473_v54  ;;  %v1471_v58 = vsel %vm1407_vm3, %v1999_v44, %v1439_v51  ;;  %vm1408_vm5 = vcmp.ge.f32.partialorder %v2001_v53, 0.0  ;;  %v1440_v59 = vmul.f32 0.1, %v2001_v53  ;;  %v1511_v44 = vld [vmem:[%s2455_s13 + $0xc0] sm:$0xff]  ;;  %v1514_v48 = vld [vmem:[%s2455_s13 + $0xd8] sm:$0xff] }
 0x135   : > { %v1535_v61 = vadd.f32 %v1503_v52, %v1471_v58  ;;  %v1474_v6 = vsel %vm1410_vm4, %v2000_v49, %v1442_v55  ;;  %v1932_v7 = vpop.f32.mrb[20].mxu1  ;;  %v1512_v52 = vld [vmem:[%s2455_s13 + $0xc8] sm:$0xff] }
 0x136   : > { %1569 = vst.msk [vmem:[%s2463_s15 + $0x90] sm:$0xff] %vm511_vm0, %v1537_v57  ;;  %v1538_v62 = vadd.f32 %v1506_v56, %v1474_v6  ;;  %v1472_v8 = vsel %vm1408_vm5, %v2001_v53, %v1440_v59  ;;  %v1968_v9 = vpop.f32.mrb[20].mxu0  ;;  %v975_v63 = vpop.f32.mrb[21].mxu1 }
 0x137   : > { %1567 = vst.msk [vmem:[%s2463_s15 + $0x80] sm:$0xff] %vm511_vm0, %v1535_v61  ;;  %v1536_v10 = vadd.f32 %v1504_v60, %v1472_v8  ;;  %v2002_v11 = vadd.f32 %v1968_v9, %v1932_v7  ;;  %v1312_v12 = vpop.f32.mrb[21].mxu0  ;;  %v1933_v13 = vpop.f32.mrb[22].mxu1 }
 0x138   : > { %1570 = vst.msk [vmem:[%s2463_s15 + $0x98] sm:$0xff] %vm511_vm0, %v1538_v62  ;;  %v2003_v14 = vadd.f32 %v1312_v12, %v975_v63  ;;  %v1969_v0 = vpop.f32.mrb[22].mxu0  ;;  %v978_v15 = vpop.f32.mrb[23].mxu1 }
 0x139   : > { %1568 = vst.msk [vmem:[%s2463_s15 + $0x88] sm:$0xff] %vm511_vm0, %v1536_v10  ;;  %vm1413_vm6 = vcmp.ge.f32.partialorder %v2002_v11, 0.0  ;;  %v1445_v16 = vmul.f32 0.1, %v2002_v11  ;;  %v2004_v1 = vadd.f32 %v1969_v0, %v1933_v13  ;;  %v1315_v18 = vpop.f32.mrb[23].mxu0  ;;  %v1517_v10 = vld [vmem:[%s2455_s13 + $0xf0] sm:$0xff] }
 0x13a   : > { %vm1411_vm7 = vcmp.ge.f32.partialorder %v2003_v14, 0.0  ;;  %v1443_v19 = vmul.f32 0.1, %v2003_v14  ;;  %v2005_v21 = vadd.f32 %v1315_v18, %v978_v15 }
 0x13b   : > { %v1477_v22 = vsel %vm1413_vm6, %v2002_v11, %v1445_v16  ;;  %vm1414_vm8 = vcmp.ge.f32.partialorder %v2004_v1, 0.0  ;;  %v1446_v23 = vmul.f32 0.1, %v2004_v1 }
 0x13c   : > { %v1541_v25 = vadd.f32 %v1509_v17, %v1477_v22  ;;  %v1475_v26 = vsel %vm1411_vm7, %v2003_v14, %v1443_v19  ;;  %vm1412_vm9 = vcmp.ge.f32.partialorder %v2005_v21, 0.0  ;;  %v1444_v27 = vmul.f32 0.1, %v2005_v21  ;;  %v1515_v14 = vld [vmem:[%s2455_s13 + $0xe0] sm:$0xff]  ;;  %v1518_v17 = vld [vmem:[%s2455_s13 + $0xf8] sm:$0xff] }
 0x13d   : > { %v1539_v28 = vadd.f32 %v1507_v20, %v1475_v26  ;;  %v1478_v29 = vsel %vm1414_vm8, %v2004_v1, %v1446_v23  ;;  %v1936_v3 = vpop.f32.mrb[24].mxu1  ;;  %v1516_v20 = vld [vmem:[%s2455_s13 + $0xe8] sm:$0xff] }
 0x13e   : > { %1573 = vst.msk [vmem:[%s2463_s15 + $0xb0] sm:$0xff] %vm511_vm0, %v1541_v25  ;;  %v1542_v30 = vadd.f32 %v1510_v24, %v1478_v29  ;;  %v1476_v31 = vsel %vm1412_vm9, %v2005_v21, %v1444_v27  ;;  %v1972_v32 = vpop.f32.mrb[24].mxu0  ;;  %v991_v33 = vpop.f32.mrb[25].mxu1 }
 0x13f   : > { %1571 = vst.msk [vmem:[%s2463_s15 + $0xa0] sm:$0xff] %vm511_vm0, %v1539_v28  ;;  %v1540_v34 = vadd.f32 %v1508_v2, %v1476_v31  ;;  %v2006_v35 = vadd.f32 %v1972_v32, %v1936_v3  ;;  %v1328_v4 = vpop.f32.mrb[25].mxu0  ;;  %v1937_v36 = vpop.f32.mrb[26].mxu1 }
 0x140   : > { %1574 = vst.msk [vmem:[%s2463_s15 + $0xb8] sm:$0xff] %vm511_vm0, %v1542_v30  ;;  %v2007_v37 = vadd.f32 %v1328_v4, %v991_v33  ;;  %v1973_v5 = vpop.f32.mrb[26].mxu0  ;;  %v994_v38 = vpop.f32.mrb[27].mxu1 }
 0x141   : > { %1572 = vst.msk [vmem:[%s2463_s15 + $0xa8] sm:$0xff] %vm511_vm0, %v1540_v34  ;;  %vm1417_vm10 = vcmp.ge.f32.partialorder %v2006_v35, 0.0  ;;  %v1449_v39 = vmul.f32 0.1, %v2006_v35  ;;  %v2008_v41 = vadd.f32 %v1973_v5, %v1937_v36  ;;  %v1331_v42 = vpop.f32.mrb[27].mxu0 }
 0x142   : > { %vm1415_vm11 = vcmp.ge.f32.partialorder %v2007_v37, 0.0  ;;  %v1447_v43 = vmul.f32 0.1, %v2007_v37  ;;  %v2009_v45 = vadd.f32 %v1331_v42, %v994_v38 }
 0x143   : > { %v1481_v46 = vsel %vm1417_vm10, %v2006_v35, %v1449_v39  ;;  %vm1418_vm12 = vcmp.ge.f32.partialorder %v2008_v41, 0.0  ;;  %v1450_v47 = vmul.f32 0.1, %v2008_v41 }
 0x144   : > { %v1545_v49 = vadd.f32 %v1513_v40, %v1481_v46  ;;  %v1479_v50 = vsel %vm1415_vm11, %v2007_v37, %v1447_v43  ;;  %vm1416_vm13 = vcmp.ge.f32.partialorder %v2009_v45, 0.0  ;;  %v1448_v51 = vmul.f32 0.1, %v2009_v45 }
 0x145   : > { %v1543_v53 = vadd.f32 %v1511_v44, %v1479_v50  ;;  %v1482_v54 = vsel %vm1418_vm12, %v2008_v41, %v1450_v47  ;;  %v1940_v55 = vpop.f32.mrb[28].mxu1 }
 0x146   : > { %1577 = vst.msk [vmem:[%s2463_s15 + $0xd0] sm:$0xff] %vm511_vm0, %v1545_v49  ;;  %v1546_v56 = vadd.f32 %v1514_v48, %v1482_v54  ;;  %v1480_v57 = vsel %vm1416_vm13, %v2009_v45, %v1448_v51  ;;  %v1976_v58 = vpop.f32.mrb[28].mxu0  ;;  %v1007_v59 = vpop.f32.mrb[29].mxu1 }
 0x147   : > { %1575 = vst.msk [vmem:[%s2463_s15 + $0xc0] sm:$0xff] %vm511_vm0, %v1543_v53  ;;  %v1544_v60 = vadd.f32 %v1512_v52, %v1480_v57  ;;  %v2010_v61 = vadd.f32 %v1976_v58, %v1940_v55  ;;  %v1344_v6 = vpop.f32.mrb[29].mxu0  ;;  %v1941_v7 = vpop.f32.mrb[30].mxu1 }
 0x148   : > { %1578 = vst.msk [vmem:[%s2463_s15 + $0xd8] sm:$0xff] %vm511_vm0, %v1546_v56  ;;  %v2011_v62 = vadd.f32 %v1344_v6, %v1007_v59  ;;  %v1977_v8 = vpop.f32.mrb[30].mxu0  ;;  %v1010_v9 = vpop.f32.mrb[31].mxu1 }
 0x149   : > { %1576 = vst.msk [vmem:[%s2463_s15 + $0xc8] sm:$0xff] %vm511_vm0, %v1544_v60  ;;  %vm1421_vm14 = vcmp.ge.f32.partialorder %v2010_v61, 0.0  ;;  %v1453_v63 = vmul.f32 0.1, %v2010_v61  ;;  %v2012_v11 = vadd.f32 %v1977_v8, %v1941_v7  ;;  %v1347_v12 = vpop.f32.mrb[31].mxu0 }
 0x14a   : > { %vm1419_vm15 = vcmp.ge.f32.partialorder %v2011_v62, 0.0  ;;  %v1451_v13 = vmul.f32 0.1, %v2011_v62  ;;  %v2013_v0 = vadd.f32 %v1347_v12, %v1010_v9 }
 0x14b   : > { %v1485_v15 = vsel %vm1421_vm14, %v2010_v61, %v1453_v63  ;;  %vm1422_vm1 = vcmp.ge.f32.partialorder %v2012_v11, 0.0  ;;  %v1454_v16 = vmul.f32 0.1, %v2012_v11 }
 0x14c   : > { %v1549_v1 = vadd.f32 %v1517_v10, %v1485_v15  ;;  %v1483_v18 = vsel %vm1419_vm15, %v2011_v62, %v1451_v13  ;;  %vm1420_vm2 = vcmp.ge.f32.partialorder %v2013_v0, 0.0  ;;  %v1452_v19 = vmul.f32 0.1, %v2013_v0 }
 0x14d   : > { %v1547_v21 = vadd.f32 %v1515_v14, %v1483_v18  ;;  %v1486_v22 = vsel %vm1422_vm1, %v2012_v11, %v1454_v16 }
 0x14e   : > { %1581 = vst.msk [vmem:[%s2463_s15 + $0xf0] sm:$0xff] %vm511_vm0, %v1549_v1  ;;  %v1550_v23 = vadd.f32 %v1518_v17, %v1486_v22  ;;  %v1484_v24 = vsel %vm1420_vm2, %v2013_v0, %v1452_v19 }
 0x14f   : > { %1579 = vst.msk [vmem:[%s2463_s15 + $0xe0] sm:$0xff] %vm511_vm0, %v1547_v21  ;;  %v1548_v25 = vadd.f32 %v1516_v20, %v1484_v24 }
 0x150   : > { %1582 = vst.msk [vmem:[%s2463_s15 + $0xf8] sm:$0xff] %vm511_vm0, %v1550_v23 }
 0x151   : > { %1580 = vst.msk [vmem:[%s2463_s15 + $0xe8] sm:$0xff] %vm511_vm0, %v1548_v25 }
 0x152   : > { %2154 = shalt.err (!%p2151_p3)
}
 0x153   : > { %s2155_s29 = scalar_lea.hbm %s2564_s28, 4096  ;;  %s2159_s14 = scalar_lea.hbm %s2624_s7, 8192 }
 0x154   : > { %p2156_p4 = scmp.ne.s32.totalorder %s2564_s28, %s2155_s29  ;;  %p2160_p9 = scmp.lt.u32.totalorder %s2564_s28, %s2624_s7 }
 0x155   : > { %p2161_p10 = scmp.lt.u32.totalorder %s2159_s14, %s2155_s29  ;;  %p2163_p12 = scmp.lt.u32.totalorder %s2155_s29, %s2564_s28 }
 0x156   : > { %p2157_p7 = pnand %p2156_p4, %p2286_p5 }
 0x157   : > { %p2162_p11 = por %p2161_p10, %p2160_p9 }
 0x158   : > { %p2158_p8 = pneg %p2157_p7 }
 0x159   : > { %p2164_p13 = por %p2163_p12, %p2162_p11 }
 0x15b   : > { %p2165_p0 = pnand %p2164_p13, %p2158_p8 }
 0x15d   : > { %2168 = shalt.err (!%p2165_p0)
}
 0x15e   : > { %s2206_s18 = smov 128   ;;  %s2207_s19 = smov 8  }
 0x15f   : > { %2046 = dma.vmem_to_hbm [thread:$0]  (%p2286_p5), %s2566_s17, 4096, %s2564_s28, %s2576_s20, %s2206_s18, %s2206_s18, %s2207_s19  }
 0x160 PF: > { %p2052_p1 = scmp.ge.s32.totalorder %s2203_s27, 2  ;;  %s1612_s21 = sand.u32 1, %s2191_s24  }
 0x161   : > { %s1613_s23 = scalar_lea.sflag [#allocation3], %s1612_s21 }
 0x162   : > { %p2049_p2 = pnand %p2052_p1, %p2290_p6 }
 0x164   : > { %2186 = dma.done.wait (!%p2049_p2), %s1613_s23, 4096  }
 0x165   : > { %2188 = vsyncadd (!%p2049_p2), %s1613_s23, 4294963200  ;;  %p17_p3 = scmp.ge.s32.totalorder %s2273_s30, 4   ;;  %s2627_s24 = smov %s2195_s25 }
 0x166   : > { %s2628_s25 = smov %s2199_s26  ;;  %s2629_s26 = smov %s2284_s10 }
 0x167   : > { %s2630_s27 = smov %s2273_s30  ;;  %19 = sbr.rel (!%p17_p3) target bundleno = 3 (0x3), region = 92 }
 0x16e   :  { %1618 = vsyncpa [#allocation3], 1 }
 0x16f   :  { %1620 = vsyncpa [#allocation3 + $0x1], 1 }

// kernel: a_hv_fuse_forward.9
= control target key start
LH: loop header
LB: loop body
LE: loop exit
PB: predicated region body
PF: predicated region fallthrough
CT: control target
= control target key end

     0   :  { %s2517_s18 = smov 0   ;;  %s2884_s0 = inlined_call_operand.vmem [shape: bf16[5120,32], index: 0, kind: input, shape index: {}]   ;;  %s2885_s1 = inlined_call_operand.vmem [shape: bf16[5120,32], index: 1, kind: input, shape index: {}]   ;;  %s2886_s2 = inlined_call_operand.vmem [shape: bf16[32,32], index: 2, kind: input, shape index: {}]   ;;  %s2887_s3 = inlined_call_operand.vmem [shape: bf16[32,32], index: 3, kind: input, shape index: {}]   ;;  %s2888_s4 = inlined_call_operand.vmem [shape: f32[5120,32], index: 4, kind: input, shape index: {}]   ;;  %s2889_s5 = inlined_call_operand.vmem [shape: f32[5120,32], index: 5, kind: output, shape index: {}]  }
   0x1 LB: > { %s1988_s19 = sadd.s32 4294967295, %s2485_s18   ;;  %p1992_p0 = scmp.ge.s32.totalorder %s2485_s18, 1  ;;  %s2485_s18 = sphi %s2517_s18, %s15_s18  }
   0x2   : > { %p210_p1 = scmp.lt.s32.totalorder %s2485_s18, 11 }
   0x4   : > { %p211_p2 = pnand %p1992_p0, %p210_p1 }
   0x5   : > { %v2411_v0 = vld [vmem:[%s2887_s3] sm:$0xff] (!%p211_p2)   ;;  %s1993_s22 = sshll.u32 (!%p211_p2), %s1988_s19, 6  ;;  %v2413_v2 = vld [vmem:[%s2887_s3 + $0x8] sm:$0xff] (!%p211_p2)   ;;  %vm581_vm0 = vcmask (!%p211_p2), 261120  }
   0x6   : > { %214 = sbr.rel (%p211_p2) target bundleno = 362 (0x16a), region = 40  ;;  %v2412_v1 = vld [vmem:[%s2886_s2] sm:$0xff] (!%p211_p2)   ;;  %p249_p3 = scmp.lt.s32.totalorder (!%p211_p2), %s1993_s22, 639  ;;  %2203 = vmatprep.subr.bf16.mxu1 (!%p211_p2), %v2411_v0  ;;  %v2414_v3 = vld [vmem:[%s2886_s2 + $0x8] sm:$0xff] (!%p211_p2)  }
   0x7   : > { %2271 = vmatprep.subr.bf16.mxu0 (!%p211_p2), %v2412_v1  ;;  %2204 = vmatpush3.bf16.msra.mxu1 (!%p211_p2), %v2411_v0 }
   0x8   : > { %2272 = vmatpush3.bf16.msra.mxu0 (!%p211_p2), %v2412_v1  ;;  %2205 = vmatprep.subr.bf16.mxu1 (!%p211_p2), %v2413_v2 }
   0x9   : > { %2273 = vmatprep.subr.bf16.mxu0 (!%p211_p2), %v2414_v3 }
   0xb   : > { %2206 = vmatpush3.bf16.msra.mxu1 (!%p211_p2), %v2413_v2 }
   0xc   : > { %2274 = vmatpush3.bf16.msra.mxu0 (!%p211_p2), %v2414_v3 }
   0xd   : > { %s2891_s22 = smov (!%p249_p3, %s1993_s22), 639 }
   0xe   : > { %s1994_s29 = sshll.u32 %s2891_s22, 2  ;;  %s1998_s11 = sshll.u32 %s2891_s22, 3 }
   0xf   : > { %s2543_s7 = scalar_lea.vmem %s2885_s1, %s1994_s29  ;;  %s2548_s10 = scalar_lea.vmem %s2884_s0, %s1994_s29 }
  0x10   : > { %v2415_v4 = vld [vmem:[%s2543_s7] sm:$0xff]   ;;  %v2417_v6 = vld [vmem:[%s2543_s7 + $0x8] sm:$0xff]   ;;  %v2419_v8 = vld [vmem:[%s2543_s7 + $0x10] sm:$0xff]   ;;  %s2682_s14 = scalar_lea.vmem %s2888_s4, %s1998_s11  ;;  %s2689_s17 = scalar_lea.vmem %s2889_s5, %s1998_s11 }
  0x11   : > { %v2416_v5 = vld [vmem:[%s2548_s10] sm:$0xff]   ;;  %2207 = vmatprep.mubr.msk.bf16.mxu1 %vm581_vm0, %v2415_v4  ;;  %v2418_v7 = vld [vmem:[%s2548_s10 + $0x8] sm:$0xff]   ;;  %v2420_v9 = vld [vmem:[%s2548_s10 + $0x10] sm:$0xff]  }
  0x12   : > { %2275 = vmatprep.mubr.msk.bf16.mxu0 %vm581_vm0, %v2416_v5  ;;  %2208 = vmatmul.mubr.msk.bf16.vlgmr.msra.gmra.mrb[0].mxu1 %vm581_vm0, %v2417_v6  ;;  %v2421_v10 = vld [vmem:[%s2543_s7 + $0x18] sm:$0xff]   ;;  %v2423_v12 = vld [vmem:[%s2543_s7 + $0x20] sm:$0xff]   ;;  %v2425_v14 = vld [vmem:[%s2543_s7 + $0x28] sm:$0xff]  }
  0x13   : > { %2276 = vmatmul.mubr.msk.bf16.vlgmr.msra.gmra.mrb[0].mxu0 %vm581_vm0, %v2418_v7  ;;  %2211 = vmatprep.mubr.msk.bf16.mxu1 %vm581_vm0, %v2419_v8  ;;  %v2422_v11 = vld [vmem:[%s2548_s10 + $0x18] sm:$0xff]   ;;  %v2424_v13 = vld [vmem:[%s2548_s10 + $0x20] sm:$0xff]   ;;  %v2426_v15 = vld [vmem:[%s2548_s10 + $0x28] sm:$0xff]  }
  0x14   : > { %2279 = vmatprep.mubr.msk.bf16.mxu0 %vm581_vm0, %v2420_v9  ;;  %v2427_v16 = vld [vmem:[%s2543_s7 + $0x30] sm:$0xff]   ;;  %v2429_v18 = vld [vmem:[%s2543_s7 + $0x38] sm:$0xff]   ;;  %v2431_v20 = vld [vmem:[%s2543_s7 + $0x40] sm:$0xff]  }
  0x15   : > { %v2428_v17 = vld [vmem:[%s2548_s10 + $0x30] sm:$0xff]   ;;  %v2430_v19 = vld [vmem:[%s2548_s10 + $0x38] sm:$0xff]   ;;  %v2432_v21 = vld [vmem:[%s2548_s10 + $0x40] sm:$0xff]  }
  0x16   : > { %v2433_v22 = vld [vmem:[%s2543_s7 + $0x48] sm:$0xff]   ;;  %v2435_v24 = vld [vmem:[%s2543_s7 + $0x50] sm:$0xff]   ;;  %v2437_v26 = vld [vmem:[%s2543_s7 + $0x58] sm:$0xff]  }
  0x17   : > { %v2434_v23 = vld [vmem:[%s2548_s10 + $0x48] sm:$0xff]   ;;  %v2436_v25 = vld [vmem:[%s2548_s10 + $0x50] sm:$0xff]   ;;  %v2438_v27 = vld [vmem:[%s2548_s10 + $0x58] sm:$0xff]  }
  0x18   : > { %v2439_v28 = vld [vmem:[%s2543_s7 + $0x60] sm:$0xff]   ;;  %v2441_v30 = vld [vmem:[%s2543_s7 + $0x68] sm:$0xff]   ;;  %v2443_v32 = vld [vmem:[%s2543_s7 + $0x70] sm:$0xff]  }
  0x19   : > { %v2440_v29 = vld [vmem:[%s2548_s10 + $0x60] sm:$0xff]   ;;  %v2442_v31 = vld [vmem:[%s2548_s10 + $0x68] sm:$0xff]   ;;  %v2444_v33 = vld [vmem:[%s2548_s10 + $0x70] sm:$0xff]  }
  0x1a   : > { %2212 = vmatmul.mubr.msk.bf16.gmra.mrb[4].mxu1 %vm581_vm0, %v2421_v10  ;;  %v2445_v34 = vld [vmem:[%s2543_s7 + $0x78] sm:$0xff]   ;;  %v2447_v36 = vld [vmem:[%s2543_s7 + $0x80] sm:$0xff]   ;;  %v2449_v38 = vld [vmem:[%s2543_s7 + $0x88] sm:$0xff]  }
  0x1b   : > { %2280 = vmatmul.mubr.msk.bf16.gmra.mrb[4].mxu0 %vm581_vm0, %v2422_v11  ;;  %2215 = vmatprep.mubr.msk.bf16.mxu1 %vm581_vm0, %v2423_v12  ;;  %v2446_v35 = vld [vmem:[%s2548_s10 + $0x78] sm:$0xff]   ;;  %v2448_v37 = vld [vmem:[%s2548_s10 + $0x80] sm:$0xff]   ;;  %v2450_v39 = vld [vmem:[%s2548_s10 + $0x88] sm:$0xff]  }
  0x1c   : > { %2283 = vmatprep.mubr.msk.bf16.mxu0 %vm581_vm0, %v2424_v13  ;;  %v2451_v40 = vld [vmem:[%s2543_s7 + $0x90] sm:$0xff]   ;;  %v2453_v42 = vld [vmem:[%s2543_s7 + $0x98] sm:$0xff]   ;;  %v2455_v44 = vld [vmem:[%s2543_s7 + $0xa0] sm:$0xff]  }
  0x1d   : > { %v2452_v41 = vld [vmem:[%s2548_s10 + $0x90] sm:$0xff]   ;;  %v2454_v43 = vld [vmem:[%s2548_s10 + $0x98] sm:$0xff]   ;;  %v2456_v45 = vld [vmem:[%s2548_s10 + $0xa0] sm:$0xff]  }
  0x1e   : > { %v2457_v46 = vld [vmem:[%s2543_s7 + $0xa8] sm:$0xff]   ;;  %v2459_v48 = vld [vmem:[%s2543_s7 + $0xb0] sm:$0xff]   ;;  %v2461_v50 = vld [vmem:[%s2543_s7 + $0xb8] sm:$0xff]  }
  0x1f   : > { %v2458_v47 = vld [vmem:[%s2548_s10 + $0xa8] sm:$0xff]   ;;  %v2460_v49 = vld [vmem:[%s2548_s10 + $0xb0] sm:$0xff]   ;;  %v2462_v51 = vld [vmem:[%s2548_s10 + $0xb8] sm:$0xff]  }
  0x20   : > { %v2463_v52 = vld [vmem:[%s2543_s7 + $0xc0] sm:$0xff]   ;;  %v2465_v54 = vld [vmem:[%s2543_s7 + $0xc8] sm:$0xff]   ;;  %v2467_v56 = vld [vmem:[%s2543_s7 + $0xd0] sm:$0xff]  }
  0x21   : > { %v2464_v53 = vld [vmem:[%s2548_s10 + $0xc0] sm:$0xff]   ;;  %v2466_v55 = vld [vmem:[%s2548_s10 + $0xc8] sm:$0xff]   ;;  %v2468_v57 = vld [vmem:[%s2548_s10 + $0xd0] sm:$0xff]  }
  0x22   : > { %2216 = vmatmul.mubr.msk.bf16.gmra.mrb[8].mxu1 %vm581_vm0, %v2425_v14  ;;  %v2469_v58 = vld [vmem:[%s2543_s7 + $0xd8] sm:$0xff]   ;;  %v2471_v60 = vld [vmem:[%s2543_s7 + $0xe0] sm:$0xff]   ;;  %v2473_v62 = vld [vmem:[%s2543_s7 + $0xe8] sm:$0xff]  }
  0x23   : > { %2284 = vmatmul.mubr.msk.bf16.gmra.mrb[8].mxu0 %vm581_vm0, %v2426_v15  ;;  %2219 = vmatprep.mubr.msk.bf16.mxu1 %vm581_vm0, %v2427_v16  ;;  %v2470_v59 = vld [vmem:[%s2548_s10 + $0xd8] sm:$0xff]   ;;  %v2472_v61 = vld [vmem:[%s2548_s10 + $0xe0] sm:$0xff]   ;;  %v2474_v63 = vld [vmem:[%s2548_s10 + $0xe8] sm:$0xff]  }
  0x24   : > { %2287 = vmatprep.mubr.msk.bf16.mxu0 %vm581_vm0, %v2428_v17  ;;  %v2475_v0 = vld [vmem:[%s2543_s7 + $0xf0] sm:$0xff]   ;;  %v2477_v2 = vld [vmem:[%s2543_s7 + $0xf8] sm:$0xff]  }
  0x25   : > { %v2476_v1 = vld [vmem:[%s2548_s10 + $0xf0] sm:$0xff]   ;;  %v2478_v3 = vld [vmem:[%s2548_s10 + $0xf8] sm:$0xff]  }
  0x26   : > { %v1718_v14 = vld [vmem:[%s2682_s14 + $0x10] sm:$0xff] }
  0x2a   : > { %2220 = vmatmul.mubr.msk.bf16.gmra.mrb[12].mxu1 %vm581_vm0, %v2429_v18  ;;  %v1716_v18 = vld [vmem:[%s2682_s14] sm:$0xff] }
  0x2b   : > { %2288 = vmatmul.mubr.msk.bf16.gmra.mrb[12].mxu0 %vm581_vm0, %v2430_v19  ;;  %2223 = vmatprep.mubr.msk.bf16.mxu1 %vm581_vm0, %v2431_v20 }
  0x2c   : > { %2291 = vmatprep.mubr.msk.bf16.mxu0 %vm581_vm0, %v2432_v21 }
  0x32   : > { %2224 = vmatmul.mubr.msk.bf16.gmra.mrb[16].mxu1 %vm581_vm0, %v2433_v22  ;;  %v1719_v22 = vld [vmem:[%s2682_s14 + $0x18] sm:$0xff] }
  0x33   : > { %2292 = vmatmul.mubr.msk.bf16.gmra.mrb[16].mxu0 %vm581_vm0, %v2434_v23  ;;  %2227 = vmatprep.mubr.msk.bf16.mxu1 %vm581_vm0, %v2435_v24 }
  0x34   : > { %2295 = vmatprep.mubr.msk.bf16.mxu0 %vm581_vm0, %v2436_v25 }
  0x3a   : > { %2228 = vmatmul.mubr.msk.bf16.gmra.mrb[20].mxu1 %vm581_vm0, %v2437_v26  ;;  %v1717_v26 = vld [vmem:[%s2682_s14 + $0x8] sm:$0xff] }
  0x3b   : > { %2296 = vmatmul.mubr.msk.bf16.gmra.mrb[20].mxu0 %vm581_vm0, %v2438_v27  ;;  %2231 = vmatprep.mubr.msk.bf16.mxu1 %vm581_vm0, %v2439_v28 }
  0x3c   : > { %2299 = vmatprep.mubr.msk.bf16.mxu0 %vm581_vm0, %v2440_v29 }
  0x42   : > { %2232 = vmatmul.mubr.msk.bf16.gmra.mrb[24].mxu1 %vm581_vm0, %v2441_v30 }
  0x43   : > { %2300 = vmatmul.mubr.msk.bf16.gmra.mrb[24].mxu0 %vm581_vm0, %v2442_v31  ;;  %2235 = vmatprep.mubr.msk.bf16.mxu1 %vm581_vm0, %v2443_v32 }
  0x44   : > { %2303 = vmatprep.mubr.msk.bf16.mxu0 %vm581_vm0, %v2444_v33 }
  0x4a   : > { %2236 = vmatmul.mubr.msk.bf16.gmra.mrb[28].mxu1 %vm581_vm0, %v2445_v34 }
  0x4b   : > { %2304 = vmatmul.mubr.msk.bf16.gmra.mrb[28].mxu0 %vm581_vm0, %v2446_v35  ;;  %2239 = vmatprep.mubr.msk.bf16.mxu1 %vm581_vm0, %v2447_v36 }
  0x4c   : > { %2307 = vmatprep.mubr.msk.bf16.mxu0 %vm581_vm0, %v2448_v37 }
  0x52   : > { %2240 = vmatmul.mubr.msk.bf16.gmra.mrb[32].mxu1 %vm581_vm0, %v2449_v38 }
  0x53   : > { %2308 = vmatmul.mubr.msk.bf16.gmra.mrb[32].mxu0 %vm581_vm0, %v2450_v39  ;;  %2243 = vmatprep.mubr.msk.bf16.mxu1 %vm581_vm0, %v2451_v40 }
  0x54   : > { %2311 = vmatprep.mubr.msk.bf16.mxu0 %vm581_vm0, %v2452_v41 }
  0x5a   : > { %2244 = vmatmul.mubr.msk.bf16.gmra.mrb[36].mxu1 %vm581_vm0, %v2453_v42  ;;  %v1722_v42 = vld [vmem:[%s2682_s14 + $0x30] sm:$0xff] }
  0x5b   : > { %2312 = vmatmul.mubr.msk.bf16.gmra.mrb[36].mxu0 %vm581_vm0, %v2454_v43  ;;  %2247 = vmatprep.mubr.msk.bf16.mxu1 %vm581_vm0, %v2455_v44 }
  0x5c   : > { %2315 = vmatprep.mubr.msk.bf16.mxu0 %vm581_vm0, %v2456_v45 }
  0x62   : > { %2248 = vmatmul.mubr.msk.bf16.gmra.mrb[40].mxu1 %vm581_vm0, %v2457_v46  ;;  %v1720_v46 = vld [vmem:[%s2682_s14 + $0x20] sm:$0xff] }
  0x63   : > { %2316 = vmatmul.mubr.msk.bf16.gmra.mrb[40].mxu0 %vm581_vm0, %v2458_v47  ;;  %2251 = vmatprep.mubr.msk.bf16.mxu1 %vm581_vm0, %v2459_v48 }
  0x64   : > { %2319 = vmatprep.mubr.msk.bf16.mxu0 %vm581_vm0, %v2460_v49 }
  0x6a   : > { %2252 = vmatmul.mubr.msk.bf16.gmra.mrb[44].mxu1 %vm581_vm0, %v2461_v50  ;;  %v1723_v50 = vld [vmem:[%s2682_s14 + $0x38] sm:$0xff] }
  0x6b   : > { %2320 = vmatmul.mubr.msk.bf16.gmra.mrb[44].mxu0 %vm581_vm0, %v2462_v51  ;;  %2255 = vmatprep.mubr.msk.bf16.mxu1 %vm581_vm0, %v2463_v52 }
  0x6c   : > { %2323 = vmatprep.mubr.msk.bf16.mxu0 %vm581_vm0, %v2464_v53 }
  0x72   : > { %2256 = vmatmul.mubr.msk.bf16.gmra.mrb[48].mxu1 %vm581_vm0, %v2465_v54  ;;  %v1721_v54 = vld [vmem:[%s2682_s14 + $0x28] sm:$0xff] }
  0x73   : > { %2324 = vmatmul.mubr.msk.bf16.gmra.mrb[48].mxu0 %vm581_vm0, %v2466_v55  ;;  %2259 = vmatprep.mubr.msk.bf16.mxu1 %vm581_vm0, %v2467_v56 }
  0x74   : > { %2327 = vmatprep.mubr.msk.bf16.mxu0 %vm581_vm0, %v2468_v57 }
  0x7a   : > { %2260 = vmatmul.mubr.msk.bf16.gmra.mrb[52].mxu1 %vm581_vm0, %v2469_v58 }
  0x7b   : > { %2328 = vmatmul.mubr.msk.bf16.gmra.mrb[52].mxu0 %vm581_vm0, %v2470_v59  ;;  %2263 = vmatprep.mubr.msk.bf16.mxu1 %vm581_vm0, %v2471_v60 }
  0x7c   : > { %2331 = vmatprep.mubr.msk.bf16.mxu0 %vm581_vm0, %v2472_v61 }
  0x82   : > { %2264 = vmatmul.mubr.msk.bf16.gmra.mrb[56].mxu1 %vm581_vm0, %v2473_v62 }
  0x83   : > { %2332 = vmatmul.mubr.msk.bf16.gmra.mrb[56].mxu0 %vm581_vm0, %v2474_v63  ;;  %2267 = vmatprep.mubr.msk.bf16.mxu1 %vm581_vm0, %v2475_v0 }
  0x84   : > { %2335 = vmatprep.mubr.msk.bf16.mxu0 %vm581_vm0, %v2476_v1 }
  0x8a   : > { %2268 = vmatmul.mubr.msk.bf16.gmra.mrb[60].mxu1 %vm581_vm0, %v2477_v2 }
  0x8b   : > { %2336 = vmatmul.mubr.msk.bf16.gmra.mrb[60].mxu0 %vm581_vm0, %v2478_v3 }
  0xe5   : > { %v2209_v4 = vpop.f32.mrb[0].mxu1 }
  0xe6   : > { %v2277_v5 = vpop.f32.mrb[0].mxu0  ;;  %v712_v6 = vpop.f32.mrb[1].mxu1 }
  0xe7   : > { %v1278_v7 = vadd.f32 %v2277_v5, %v2209_v4  ;;  %v1269_v8 = vpop.f32.mrb[1].mxu0  ;;  %v2210_v9 = vpop.f32.mrb[2].mxu1 }
  0xe8   : > { %v1270_v10 = vadd.f32 %v1269_v8, %v712_v6  ;;  %v2278_v11 = vpop.f32.mrb[2].mxu0  ;;  %v715_v12 = vpop.f32.mrb[3].mxu1  ;;  %v1726_v6 = vld [vmem:[%s2682_s14 + $0x50] sm:$0xff] }
  0xe9   : > { %vm1526_vm1 = vcmp.ge.f32.partialorder %v1278_v7, 0.0  ;;  %v1590_v13 = vmul.f32 0.1, %v1278_v7  ;;  %v1281_v15 = vadd.f32 %v2278_v11, %v2210_v9  ;;  %v1272_v16 = vpop.f32.mrb[3].mxu0 }
  0xea   : > { %vm1524_vm2 = vcmp.ge.f32.partialorder %v1270_v10, 0.0  ;;  %v1588_v17 = vmul.f32 0.1, %v1270_v10  ;;  %v1273_v19 = vadd.f32 %v1272_v16, %v715_v12 }
  0xeb   : > { %v1654_v20 = vsel %vm1526_vm1, %v1278_v7, %v1590_v13  ;;  %vm1527_vm3 = vcmp.ge.f32.partialorder %v1281_v15, 0.0  ;;  %v1591_v21 = vmul.f32 0.1, %v1281_v15 }
  0xec   : > { %v1782_v23 = vadd.f32 %v1718_v14, %v1654_v20  ;;  %v1652_v24 = vsel %vm1524_vm2, %v1270_v10, %v1588_v17  ;;  %vm1525_vm4 = vcmp.ge.f32.partialorder %v1273_v19, 0.0  ;;  %v1589_v25 = vmul.f32 0.1, %v1273_v19  ;;  %v1724_v10 = vld [vmem:[%s2682_s14 + $0x40] sm:$0xff]  ;;  %v1727_v14 = vld [vmem:[%s2682_s14 + $0x58] sm:$0xff] }
  0xed   : > { %v1780_v27 = vadd.f32 %v1716_v18, %v1652_v24  ;;  %v1655_v28 = vsel %vm1527_vm3, %v1281_v15, %v1591_v21  ;;  %v2213_v29 = vpop.f32.mrb[4].mxu1  ;;  %v1725_v18 = vld [vmem:[%s2682_s14 + $0x48] sm:$0xff] }
  0xee   : > { %1846 = vst.msk [vmem:[%s2689_s17 + $0x10] sm:$0xff] %vm581_vm0, %v1782_v23  ;;  %v1783_v30 = vadd.f32 %v1719_v22, %v1655_v28  ;;  %v1653_v31 = vsel %vm1525_vm4, %v1273_v19, %v1589_v25  ;;  %v2281_v32 = vpop.f32.mrb[4].mxu0  ;;  %v728_v33 = vpop.f32.mrb[5].mxu1 }
  0xef   : > { %1844 = vst.msk [vmem:[%s2689_s17] sm:$0xff] %vm581_vm0, %v1780_v27  ;;  %v1781_v34 = vadd.f32 %v1717_v26, %v1653_v31  ;;  %v1294_v35 = vadd.f32 %v2281_v32, %v2213_v29  ;;  %v1285_v36 = vpop.f32.mrb[5].mxu0  ;;  %v2214_v37 = vpop.f32.mrb[6].mxu1 }
  0xf0   : > { %1847 = vst.msk [vmem:[%s2689_s17 + $0x18] sm:$0xff] %vm581_vm0, %v1783_v30  ;;  %v1286_v38 = vadd.f32 %v1285_v36, %v728_v33  ;;  %v2282_v39 = vpop.f32.mrb[6].mxu0  ;;  %v731_v40 = vpop.f32.mrb[7].mxu1 }
  0xf1   : > { %1845 = vst.msk [vmem:[%s2689_s17 + $0x8] sm:$0xff] %vm581_vm0, %v1781_v34  ;;  %vm1530_vm5 = vcmp.ge.f32.partialorder %v1294_v35, 0.0  ;;  %v1594_v41 = vmul.f32 0.1, %v1294_v35  ;;  %v1297_v43 = vadd.f32 %v2282_v39, %v2214_v37  ;;  %v1288_v44 = vpop.f32.mrb[7].mxu0  ;;  %v1730_v34 = vld [vmem:[%s2682_s14 + $0x70] sm:$0xff] }
  0xf2   : > { %vm1528_vm6 = vcmp.ge.f32.partialorder %v1286_v38, 0.0  ;;  %v1592_v45 = vmul.f32 0.1, %v1286_v38  ;;  %v1289_v47 = vadd.f32 %v1288_v44, %v731_v40 }
  0xf3   : > { %v1658_v48 = vsel %vm1530_vm5, %v1294_v35, %v1594_v41  ;;  %vm1531_vm7 = vcmp.ge.f32.partialorder %v1297_v43, 0.0  ;;  %v1595_v49 = vmul.f32 0.1, %v1297_v43 }
  0xf4   : > { %v1786_v51 = vadd.f32 %v1722_v42, %v1658_v48  ;;  %v1656_v52 = vsel %vm1528_vm6, %v1286_v38, %v1592_v45  ;;  %vm1529_vm8 = vcmp.ge.f32.partialorder %v1289_v47, 0.0  ;;  %v1593_v53 = vmul.f32 0.1, %v1289_v47  ;;  %v1728_v38 = vld [vmem:[%s2682_s14 + $0x60] sm:$0xff]  ;;  %v1731_v42 = vld [vmem:[%s2682_s14 + $0x78] sm:$0xff] }
  0xf5   : > { %v1784_v55 = vadd.f32 %v1720_v46, %v1656_v52  ;;  %v1659_v56 = vsel %vm1531_vm7, %v1297_v43, %v1595_v49  ;;  %v2217_v57 = vpop.f32.mrb[8].mxu1  ;;  %v1729_v46 = vld [vmem:[%s2682_s14 + $0x68] sm:$0xff] }
  0xf6   : > { %1850 = vst.msk [vmem:[%s2689_s17 + $0x30] sm:$0xff] %vm581_vm0, %v1786_v51  ;;  %v1787_v58 = vadd.f32 %v1723_v50, %v1659_v56  ;;  %v1657_v59 = vsel %vm1529_vm8, %v1289_v47, %v1593_v53  ;;  %v2285_v60 = vpop.f32.mrb[8].mxu0  ;;  %v744_v61 = vpop.f32.mrb[9].mxu1 }
  0xf7   : > { %1848 = vst.msk [vmem:[%s2689_s17 + $0x20] sm:$0xff] %vm581_vm0, %v1784_v55  ;;  %v1785_v62 = vadd.f32 %v1721_v54, %v1657_v59  ;;  %v1310_v63 = vadd.f32 %v2285_v60, %v2217_v57  ;;  %v1301_v0 = vpop.f32.mrb[9].mxu0  ;;  %v2218_v1 = vpop.f32.mrb[10].mxu1 }
  0xf8   : > { %1851 = vst.msk [vmem:[%s2689_s17 + $0x38] sm:$0xff] %vm581_vm0, %v1787_v58  ;;  %v1302_v2 = vadd.f32 %v1301_v0, %v744_v61  ;;  %v2286_v3 = vpop.f32.mrb[10].mxu0  ;;  %v747_v4 = vpop.f32.mrb[11].mxu1 }
  0xf9   : > { %1849 = vst.msk [vmem:[%s2689_s17 + $0x28] sm:$0xff] %vm581_vm0, %v1785_v62  ;;  %vm1534_vm9 = vcmp.ge.f32.partialorder %v1310_v63, 0.0  ;;  %v1598_v5 = vmul.f32 0.1, %v1310_v63  ;;  %v1313_v7 = vadd.f32 %v2286_v3, %v2218_v1  ;;  %v1304_v8 = vpop.f32.mrb[11].mxu0  ;;  %v1734_v62 = vld [vmem:[%s2682_s14 + $0x90] sm:$0xff] }
  0xfa   : > { %vm1532_vm10 = vcmp.ge.f32.partialorder %v1302_v2, 0.0  ;;  %v1596_v9 = vmul.f32 0.1, %v1302_v2  ;;  %v1305_v11 = vadd.f32 %v1304_v8, %v747_v4 }
  0xfb   : > { %v1662_v12 = vsel %vm1534_vm9, %v1310_v63, %v1598_v5  ;;  %vm1535_vm11 = vcmp.ge.f32.partialorder %v1313_v7, 0.0  ;;  %v1599_v13 = vmul.f32 0.1, %v1313_v7 }
  0xfc   : > { %v1790_v15 = vadd.f32 %v1726_v6, %v1662_v12  ;;  %v1660_v16 = vsel %vm1532_vm10, %v1302_v2, %v1596_v9  ;;  %vm1533_vm12 = vcmp.ge.f32.partialorder %v1305_v11, 0.0  ;;  %v1597_v17 = vmul.f32 0.1, %v1305_v11  ;;  %v1732_v2 = vld [vmem:[%s2682_s14 + $0x80] sm:$0xff]  ;;  %v1735_v6 = vld [vmem:[%s2682_s14 + $0x98] sm:$0xff] }
  0xfd   : > { %v1788_v19 = vadd.f32 %v1724_v10, %v1660_v16  ;;  %v1663_v20 = vsel %vm1535_vm11, %v1313_v7, %v1599_v13  ;;  %v2221_v21 = vpop.f32.mrb[12].mxu1  ;;  %v1733_v10 = vld [vmem:[%s2682_s14 + $0x88] sm:$0xff] }
  0xfe   : > { %1854 = vst.msk [vmem:[%s2689_s17 + $0x50] sm:$0xff] %vm581_vm0, %v1790_v15  ;;  %v1791_v22 = vadd.f32 %v1727_v14, %v1663_v20  ;;  %v1661_v23 = vsel %vm1533_vm12, %v1305_v11, %v1597_v17  ;;  %v2289_v24 = vpop.f32.mrb[12].mxu0  ;;  %v760_v25 = vpop.f32.mrb[13].mxu1 }
  0xff   : > { %1852 = vst.msk [vmem:[%s2689_s17 + $0x40] sm:$0xff] %vm581_vm0, %v1788_v19  ;;  %v1789_v26 = vadd.f32 %v1725_v18, %v1661_v23  ;;  %v1326_v27 = vadd.f32 %v2289_v24, %v2221_v21  ;;  %v1317_v28 = vpop.f32.mrb[13].mxu0  ;;  %v2222_v29 = vpop.f32.mrb[14].mxu1 }
 0x100   : > { %1855 = vst.msk [vmem:[%s2689_s17 + $0x58] sm:$0xff] %vm581_vm0, %v1791_v22  ;;  %v1318_v30 = vadd.f32 %v1317_v28, %v760_v25  ;;  %v2290_v31 = vpop.f32.mrb[14].mxu0  ;;  %v763_v32 = vpop.f32.mrb[15].mxu1 }
 0x101   : > { %1853 = vst.msk [vmem:[%s2689_s17 + $0x48] sm:$0xff] %vm581_vm0, %v1789_v26  ;;  %vm1538_vm13 = vcmp.ge.f32.partialorder %v1326_v27, 0.0  ;;  %v1602_v33 = vmul.f32 0.1, %v1326_v27  ;;  %v1329_v35 = vadd.f32 %v2290_v31, %v2222_v29  ;;  %v1320_v36 = vpop.f32.mrb[15].mxu0  ;;  %v1738_v26 = vld [vmem:[%s2682_s14 + $0xb0] sm:$0xff] }
 0x102   : > { %vm1536_vm14 = vcmp.ge.f32.partialorder %v1318_v30, 0.0  ;;  %v1600_v37 = vmul.f32 0.1, %v1318_v30  ;;  %v1321_v39 = vadd.f32 %v1320_v36, %v763_v32 }
 0x103   : > { %v1666_v40 = vsel %vm1538_vm13, %v1326_v27, %v1602_v33  ;;  %vm1539_vm15 = vcmp.ge.f32.partialorder %v1329_v35, 0.0  ;;  %v1603_v41 = vmul.f32 0.1, %v1329_v35 }
 0x104   : > { %v1794_v43 = vadd.f32 %v1730_v34, %v1666_v40  ;;  %v1664_v44 = vsel %vm1536_vm14, %v1318_v30, %v1600_v37  ;;  %vm1537_vm1 = vcmp.ge.f32.partialorder %v1321_v39, 0.0  ;;  %v1601_v45 = vmul.f32 0.1, %v1321_v39  ;;  %v1736_v30 = vld [vmem:[%s2682_s14 + $0xa0] sm:$0xff]  ;;  %v1739_v34 = vld [vmem:[%s2682_s14 + $0xb8] sm:$0xff] }
 0x105   : > { %v1792_v47 = vadd.f32 %v1728_v38, %v1664_v44  ;;  %v1667_v48 = vsel %vm1539_vm15, %v1329_v35, %v1603_v41  ;;  %v2225_v49 = vpop.f32.mrb[16].mxu1  ;;  %v1737_v38 = vld [vmem:[%s2682_s14 + $0xa8] sm:$0xff] }
 0x106   : > { %1858 = vst.msk [vmem:[%s2689_s17 + $0x70] sm:$0xff] %vm581_vm0, %v1794_v43  ;;  %v1795_v50 = vadd.f32 %v1731_v42, %v1667_v48  ;;  %v1665_v51 = vsel %vm1537_vm1, %v1321_v39, %v1601_v45  ;;  %v2293_v52 = vpop.f32.mrb[16].mxu0  ;;  %v776_v53 = vpop.f32.mrb[17].mxu1 }
 0x107   : > { %1856 = vst.msk [vmem:[%s2689_s17 + $0x60] sm:$0xff] %vm581_vm0, %v1792_v47  ;;  %v1793_v54 = vadd.f32 %v1729_v46, %v1665_v51  ;;  %v1342_v55 = vadd.f32 %v2293_v52, %v2225_v49  ;;  %v1333_v56 = vpop.f32.mrb[17].mxu0  ;;  %v2226_v57 = vpop.f32.mrb[18].mxu1 }
 0x108   : > { %1859 = vst.msk [vmem:[%s2689_s17 + $0x78] sm:$0xff] %vm581_vm0, %v1795_v50  ;;  %v1334_v58 = vadd.f32 %v1333_v56, %v776_v53  ;;  %v2294_v59 = vpop.f32.mrb[18].mxu0  ;;  %v779_v60 = vpop.f32.mrb[19].mxu1 }
 0x109   : > { %1857 = vst.msk [vmem:[%s2689_s17 + $0x68] sm:$0xff] %vm581_vm0, %v1793_v54  ;;  %vm1542_vm2 = vcmp.ge.f32.partialorder %v1342_v55, 0.0  ;;  %v1606_v61 = vmul.f32 0.1, %v1342_v55  ;;  %v1345_v63 = vadd.f32 %v2294_v59, %v2226_v57  ;;  %v1336_v0 = vpop.f32.mrb[19].mxu0  ;;  %v1742_v54 = vld [vmem:[%s2682_s14 + $0xd0] sm:$0xff] }
 0x10a   : > { %vm1540_vm3 = vcmp.ge.f32.partialorder %v1334_v58, 0.0  ;;  %v1604_v1 = vmul.f32 0.1, %v1334_v58  ;;  %v1337_v3 = vadd.f32 %v1336_v0, %v779_v60 }
 0x10b   : > { %v1670_v4 = vsel %vm1542_vm2, %v1342_v55, %v1606_v61  ;;  %vm1543_vm4 = vcmp.ge.f32.partialorder %v1345_v63, 0.0  ;;  %v1607_v5 = vmul.f32 0.1, %v1345_v63 }
 0x10c   : > { %v1798_v7 = vadd.f32 %v1734_v62, %v1670_v4  ;;  %v1668_v8 = vsel %vm1540_vm3, %v1334_v58, %v1604_v1  ;;  %vm1541_vm5 = vcmp.ge.f32.partialorder %v1337_v3, 0.0  ;;  %v1605_v9 = vmul.f32 0.1, %v1337_v3  ;;  %v1740_v58 = vld [vmem:[%s2682_s14 + $0xc0] sm:$0xff]  ;;  %v1743_v62 = vld [vmem:[%s2682_s14 + $0xd8] sm:$0xff] }
 0x10d   : > { %v1796_v11 = vadd.f32 %v1732_v2, %v1668_v8  ;;  %v1671_v12 = vsel %vm1543_vm4, %v1345_v63, %v1607_v5  ;;  %v2229_v13 = vpop.f32.mrb[20].mxu1  ;;  %v1741_v2 = vld [vmem:[%s2682_s14 + $0xc8] sm:$0xff] }
 0x10e   : > { %1862 = vst.msk [vmem:[%s2689_s17 + $0x90] sm:$0xff] %vm581_vm0, %v1798_v7  ;;  %v1799_v14 = vadd.f32 %v1735_v6, %v1671_v12  ;;  %v1669_v15 = vsel %vm1541_vm5, %v1337_v3, %v1605_v9  ;;  %v2297_v16 = vpop.f32.mrb[20].mxu0  ;;  %v792_v17 = vpop.f32.mrb[21].mxu1 }
 0x10f   : > { %1860 = vst.msk [vmem:[%s2689_s17 + $0x80] sm:$0xff] %vm581_vm0, %v1796_v11  ;;  %v1797_v18 = vadd.f32 %v1733_v10, %v1669_v15  ;;  %v1358_v19 = vadd.f32 %v2297_v16, %v2229_v13  ;;  %v1349_v20 = vpop.f32.mrb[21].mxu0  ;;  %v2230_v21 = vpop.f32.mrb[22].mxu1 }
 0x110   : > { %1863 = vst.msk [vmem:[%s2689_s17 + $0x98] sm:$0xff] %vm581_vm0, %v1799_v14  ;;  %v1350_v22 = vadd.f32 %v1349_v20, %v792_v17  ;;  %v2298_v23 = vpop.f32.mrb[22].mxu0  ;;  %v795_v24 = vpop.f32.mrb[23].mxu1 }
 0x111   : > { %1861 = vst.msk [vmem:[%s2689_s17 + $0x88] sm:$0xff] %vm581_vm0, %v1797_v18  ;;  %vm1546_vm6 = vcmp.ge.f32.partialorder %v1358_v19, 0.0  ;;  %v1610_v25 = vmul.f32 0.1, %v1358_v19  ;;  %v1361_v27 = vadd.f32 %v2298_v23, %v2230_v21  ;;  %v1352_v28 = vpop.f32.mrb[23].mxu0  ;;  %v1746_v18 = vld [vmem:[%s2682_s14 + $0xf0] sm:$0xff] }
 0x112   : > { %vm1544_vm7 = vcmp.ge.f32.partialorder %v1350_v22, 0.0  ;;  %v1608_v29 = vmul.f32 0.1, %v1350_v22  ;;  %v1353_v31 = vadd.f32 %v1352_v28, %v795_v24 }
 0x113   : > { %v1674_v32 = vsel %vm1546_vm6, %v1358_v19, %v1610_v25  ;;  %vm1547_vm8 = vcmp.ge.f32.partialorder %v1361_v27, 0.0  ;;  %v1611_v33 = vmul.f32 0.1, %v1361_v27 }
 0x114   : > { %v1802_v35 = vadd.f32 %v1738_v26, %v1674_v32  ;;  %v1672_v36 = vsel %vm1544_vm7, %v1350_v22, %v1608_v29  ;;  %vm1545_vm9 = vcmp.ge.f32.partialorder %v1353_v31, 0.0  ;;  %v1609_v37 = vmul.f32 0.1, %v1353_v31  ;;  %v1744_v22 = vld [vmem:[%s2682_s14 + $0xe0] sm:$0xff]  ;;  %v1747_v26 = vld [vmem:[%s2682_s14 + $0xf8] sm:$0xff] }
 0x115   : > { %v1800_v39 = vadd.f32 %v1736_v30, %v1672_v36  ;;  %v1675_v40 = vsel %vm1547_vm8, %v1361_v27, %v1611_v33  ;;  %v2233_v41 = vpop.f32.mrb[24].mxu1  ;;  %v1745_v30 = vld [vmem:[%s2682_s14 + $0xe8] sm:$0xff] }
 0x116   : > { %1866 = vst.msk [vmem:[%s2689_s17 + $0xb0] sm:$0xff] %vm581_vm0, %v1802_v35  ;;  %v1803_v42 = vadd.f32 %v1739_v34, %v1675_v40  ;;  %v1673_v43 = vsel %vm1545_vm9, %v1353_v31, %v1609_v37  ;;  %v2301_v44 = vpop.f32.mrb[24].mxu0  ;;  %v808_v45 = vpop.f32.mrb[25].mxu1 }
 0x117   : > { %1864 = vst.msk [vmem:[%s2689_s17 + $0xa0] sm:$0xff] %vm581_vm0, %v1800_v39  ;;  %v1801_v46 = vadd.f32 %v1737_v38, %v1673_v43  ;;  %v1374_v47 = vadd.f32 %v2301_v44, %v2233_v41  ;;  %v1365_v48 = vpop.f32.mrb[25].mxu0  ;;  %v2234_v49 = vpop.f32.mrb[26].mxu1 }
 0x118   : > { %1867 = vst.msk [vmem:[%s2689_s17 + $0xb8] sm:$0xff] %vm581_vm0, %v1803_v42  ;;  %v1366_v50 = vadd.f32 %v1365_v48, %v808_v45  ;;  %v2302_v51 = vpop.f32.mrb[26].mxu0  ;;  %v811_v52 = vpop.f32.mrb[27].mxu1 }
 0x119   : > { %1865 = vst.msk [vmem:[%s2689_s17 + $0xa8] sm:$0xff] %vm581_vm0, %v1801_v46  ;;  %vm1550_vm10 = vcmp.ge.f32.partialorder %v1374_v47, 0.0  ;;  %v1614_v53 = vmul.f32 0.1, %v1374_v47  ;;  %v1377_v55 = vadd.f32 %v2302_v51, %v2234_v49  ;;  %v1368_v56 = vpop.f32.mrb[27].mxu0  ;;  %v1750_v46 = vld [vmem:[%s2682_s14 + $0x110] sm:$0xff] }
 0x11a   : > { %vm1548_vm11 = vcmp.ge.f32.partialorder %v1366_v50, 0.0  ;;  %v1612_v57 = vmul.f32 0.1, %v1366_v50  ;;  %v1369_v59 = vadd.f32 %v1368_v56, %v811_v52 }
 0x11b   : > { %v1678_v60 = vsel %vm1550_vm10, %v1374_v47, %v1614_v53  ;;  %vm1551_vm12 = vcmp.ge.f32.partialorder %v1377_v55, 0.0  ;;  %v1615_v61 = vmul.f32 0.1, %v1377_v55 }
 0x11c   : > { %v1806_v63 = vadd.f32 %v1742_v54, %v1678_v60  ;;  %v1676_v0 = vsel %vm1548_vm11, %v1366_v50, %v1612_v57  ;;  %vm1549_vm13 = vcmp.ge.f32.partialorder %v1369_v59, 0.0  ;;  %v1613_v1 = vmul.f32 0.1, %v1369_v59  ;;  %v1748_v50 = vld [vmem:[%s2682_s14 + $0x100] sm:$0xff]  ;;  %v1751_v54 = vld [vmem:[%s2682_s14 + $0x118] sm:$0xff] }
 0x11d   : > { %v1804_v3 = vadd.f32 %v1740_v58, %v1676_v0  ;;  %v1679_v4 = vsel %vm1551_vm12, %v1377_v55, %v1615_v61  ;;  %v2237_v5 = vpop.f32.mrb[28].mxu1  ;;  %v1749_v58 = vld [vmem:[%s2682_s14 + $0x108] sm:$0xff] }
 0x11e   : > { %1870 = vst.msk [vmem:[%s2689_s17 + $0xd0] sm:$0xff] %vm581_vm0, %v1806_v63  ;;  %v1807_v6 = vadd.f32 %v1743_v62, %v1679_v4  ;;  %v1677_v7 = vsel %vm1549_vm13, %v1369_v59, %v1613_v1  ;;  %v2305_v8 = vpop.f32.mrb[28].mxu0  ;;  %v824_v9 = vpop.f32.mrb[29].mxu1 }
 0x11f   : > { %1868 = vst.msk [vmem:[%s2689_s17 + $0xc0] sm:$0xff] %vm581_vm0, %v1804_v3  ;;  %v1805_v10 = vadd.f32 %v1741_v2, %v1677_v7  ;;  %v1390_v11 = vadd.f32 %v2305_v8, %v2237_v5  ;;  %v1381_v12 = vpop.f32.mrb[29].mxu0  ;;  %v2238_v13 = vpop.f32.mrb[30].mxu1 }
 0x120   : > { %1871 = vst.msk [vmem:[%s2689_s17 + $0xd8] sm:$0xff] %vm581_vm0, %v1807_v6  ;;  %v1382_v14 = vadd.f32 %v1381_v12, %v824_v9  ;;  %v2306_v15 = vpop.f32.mrb[30].mxu0  ;;  %v827_v16 = vpop.f32.mrb[31].mxu1 }
 0x121   : > { %1869 = vst.msk [vmem:[%s2689_s17 + $0xc8] sm:$0xff] %vm581_vm0, %v1805_v10  ;;  %vm1554_vm14 = vcmp.ge.f32.partialorder %v1390_v11, 0.0  ;;  %v1618_v17 = vmul.f32 0.1, %v1390_v11  ;;  %v1393_v19 = vadd.f32 %v2306_v15, %v2238_v13  ;;  %v1384_v20 = vpop.f32.mrb[31].mxu0  ;;  %v1754_v10 = vld [vmem:[%s2682_s14 + $0x130] sm:$0xff] }
 0x122   : > { %vm1552_vm15 = vcmp.ge.f32.partialorder %v1382_v14, 0.0  ;;  %v1616_v21 = vmul.f32 0.1, %v1382_v14  ;;  %v1385_v23 = vadd.f32 %v1384_v20, %v827_v16 }
 0x123   : > { %v1682_v24 = vsel %vm1554_vm14, %v1390_v11, %v1618_v17  ;;  %vm1555_vm1 = vcmp.ge.f32.partialorder %v1393_v19, 0.0  ;;  %v1619_v25 = vmul.f32 0.1, %v1393_v19 }
 0x124   : > { %v1810_v27 = vadd.f32 %v1746_v18, %v1682_v24  ;;  %v1680_v28 = vsel %vm1552_vm15, %v1382_v14, %v1616_v21  ;;  %vm1553_vm2 = vcmp.ge.f32.partialorder %v1385_v23, 0.0  ;;  %v1617_v29 = vmul.f32 0.1, %v1385_v23  ;;  %v1752_v14 = vld [vmem:[%s2682_s14 + $0x120] sm:$0xff]  ;;  %v1755_v18 = vld [vmem:[%s2682_s14 + $0x138] sm:$0xff] }
 0x125   : > { %v1808_v31 = vadd.f32 %v1744_v22, %v1680_v28  ;;  %v1683_v32 = vsel %vm1555_vm1, %v1393_v19, %v1619_v25  ;;  %v2241_v33 = vpop.f32.mrb[32].mxu1  ;;  %v1753_v22 = vld [vmem:[%s2682_s14 + $0x128] sm:$0xff] }
 0x126   : > { %1874 = vst.msk [vmem:[%s2689_s17 + $0xf0] sm:$0xff] %vm581_vm0, %v1810_v27  ;;  %v1811_v34 = vadd.f32 %v1747_v26, %v1683_v32  ;;  %v1681_v35 = vsel %vm1553_vm2, %v1385_v23, %v1617_v29  ;;  %v2309_v36 = vpop.f32.mrb[32].mxu0  ;;  %v840_v37 = vpop.f32.mrb[33].mxu1 }
 0x127   : > { %1872 = vst.msk [vmem:[%s2689_s17 + $0xe0] sm:$0xff] %vm581_vm0, %v1808_v31  ;;  %v1809_v38 = vadd.f32 %v1745_v30, %v1681_v35  ;;  %v1406_v39 = vadd.f32 %v2309_v36, %v2241_v33  ;;  %v1397_v40 = vpop.f32.mrb[33].mxu0  ;;  %v2242_v41 = vpop.f32.mrb[34].mxu1 }
 0x128   : > { %1875 = vst.msk [vmem:[%s2689_s17 + $0xf8] sm:$0xff] %vm581_vm0, %v1811_v34  ;;  %v1398_v42 = vadd.f32 %v1397_v40, %v840_v37  ;;  %v2310_v43 = vpop.f32.mrb[34].mxu0  ;;  %v843_v44 = vpop.f32.mrb[35].mxu1 }
 0x129   : > { %1873 = vst.msk [vmem:[%s2689_s17 + $0xe8] sm:$0xff] %vm581_vm0, %v1809_v38  ;;  %vm1558_vm3 = vcmp.ge.f32.partialorder %v1406_v39, 0.0  ;;  %v1622_v45 = vmul.f32 0.1, %v1406_v39  ;;  %v1409_v47 = vadd.f32 %v2310_v43, %v2242_v41  ;;  %v1400_v48 = vpop.f32.mrb[35].mxu0  ;;  %v1758_v38 = vld [vmem:[%s2682_s14 + $0x150] sm:$0xff] }
 0x12a   : > { %vm1556_vm4 = vcmp.ge.f32.partialorder %v1398_v42, 0.0  ;;  %v1620_v49 = vmul.f32 0.1, %v1398_v42  ;;  %v1401_v51 = vadd.f32 %v1400_v48, %v843_v44 }
 0x12b   : > { %v1686_v52 = vsel %vm1558_vm3, %v1406_v39, %v1622_v45  ;;  %vm1559_vm5 = vcmp.ge.f32.partialorder %v1409_v47, 0.0  ;;  %v1623_v53 = vmul.f32 0.1, %v1409_v47 }
 0x12c   : > { %v1814_v55 = vadd.f32 %v1750_v46, %v1686_v52  ;;  %v1684_v56 = vsel %vm1556_vm4, %v1398_v42, %v1620_v49  ;;  %vm1557_vm6 = vcmp.ge.f32.partialorder %v1401_v51, 0.0  ;;  %v1621_v57 = vmul.f32 0.1, %v1401_v51  ;;  %v1756_v42 = vld [vmem:[%s2682_s14 + $0x140] sm:$0xff]  ;;  %v1759_v46 = vld [vmem:[%s2682_s14 + $0x158] sm:$0xff] }
 0x12d   : > { %v1812_v59 = vadd.f32 %v1748_v50, %v1684_v56  ;;  %v1687_v60 = vsel %vm1559_vm5, %v1409_v47, %v1623_v53  ;;  %v2245_v61 = vpop.f32.mrb[36].mxu1  ;;  %v1757_v50 = vld [vmem:[%s2682_s14 + $0x148] sm:$0xff] }
 0x12e   : > { %1878 = vst.msk [vmem:[%s2689_s17 + $0x110] sm:$0xff] %vm581_vm0, %v1814_v55  ;;  %v1815_v62 = vadd.f32 %v1751_v54, %v1687_v60  ;;  %v1685_v63 = vsel %vm1557_vm6, %v1401_v51, %v1621_v57  ;;  %v2313_v0 = vpop.f32.mrb[36].mxu0  ;;  %v856_v1 = vpop.f32.mrb[37].mxu1 }
 0x12f   : > { %1876 = vst.msk [vmem:[%s2689_s17 + $0x100] sm:$0xff] %vm581_vm0, %v1812_v59  ;;  %v1813_v2 = vadd.f32 %v1749_v58, %v1685_v63  ;;  %v1422_v3 = vadd.f32 %v2313_v0, %v2245_v61  ;;  %v1413_v4 = vpop.f32.mrb[37].mxu0  ;;  %v2246_v5 = vpop.f32.mrb[38].mxu1 }
 0x130   : > { %1879 = vst.msk [vmem:[%s2689_s17 + $0x118] sm:$0xff] %vm581_vm0, %v1815_v62  ;;  %v1414_v6 = vadd.f32 %v1413_v4, %v856_v1  ;;  %v2314_v7 = vpop.f32.mrb[38].mxu0  ;;  %v859_v8 = vpop.f32.mrb[39].mxu1 }
 0x131   : > { %1877 = vst.msk [vmem:[%s2689_s17 + $0x108] sm:$0xff] %vm581_vm0, %v1813_v2  ;;  %vm1562_vm7 = vcmp.ge.f32.partialorder %v1422_v3, 0.0  ;;  %v1626_v9 = vmul.f32 0.1, %v1422_v3  ;;  %v1425_v11 = vadd.f32 %v2314_v7, %v2246_v5  ;;  %v1416_v12 = vpop.f32.mrb[39].mxu0  ;;  %v1762_v2 = vld [vmem:[%s2682_s14 + $0x170] sm:$0xff] }
 0x132   : > { %vm1560_vm8 = vcmp.ge.f32.partialorder %v1414_v6, 0.0  ;;  %v1624_v13 = vmul.f32 0.1, %v1414_v6  ;;  %v1417_v15 = vadd.f32 %v1416_v12, %v859_v8 }
 0x133   : > { %v1690_v16 = vsel %vm1562_vm7, %v1422_v3, %v1626_v9  ;;  %vm1563_vm9 = vcmp.ge.f32.partialorder %v1425_v11, 0.0  ;;  %v1627_v17 = vmul.f32 0.1, %v1425_v11 }
 0x134   : > { %v1818_v19 = vadd.f32 %v1754_v10, %v1690_v16  ;;  %v1688_v20 = vsel %vm1560_vm8, %v1414_v6, %v1624_v13  ;;  %vm1561_vm10 = vcmp.ge.f32.partialorder %v1417_v15, 0.0  ;;  %v1625_v21 = vmul.f32 0.1, %v1417_v15  ;;  %v1760_v6 = vld [vmem:[%s2682_s14 + $0x160] sm:$0xff]  ;;  %v1763_v10 = vld [vmem:[%s2682_s14 + $0x178] sm:$0xff] }
 0x135   : > { %v1816_v23 = vadd.f32 %v1752_v14, %v1688_v20  ;;  %v1691_v24 = vsel %vm1563_vm9, %v1425_v11, %v1627_v17  ;;  %v2249_v25 = vpop.f32.mrb[40].mxu1  ;;  %v1761_v14 = vld [vmem:[%s2682_s14 + $0x168] sm:$0xff] }
 0x136   : > { %1882 = vst.msk [vmem:[%s2689_s17 + $0x130] sm:$0xff] %vm581_vm0, %v1818_v19  ;;  %v1819_v26 = vadd.f32 %v1755_v18, %v1691_v24  ;;  %v1689_v27 = vsel %vm1561_vm10, %v1417_v15, %v1625_v21  ;;  %v2317_v28 = vpop.f32.mrb[40].mxu0  ;;  %v872_v29 = vpop.f32.mrb[41].mxu1 }
 0x137   : > { %1880 = vst.msk [vmem:[%s2689_s17 + $0x120] sm:$0xff] %vm581_vm0, %v1816_v23  ;;  %v1817_v30 = vadd.f32 %v1753_v22, %v1689_v27  ;;  %v1438_v31 = vadd.f32 %v2317_v28, %v2249_v25  ;;  %v1429_v32 = vpop.f32.mrb[41].mxu0  ;;  %v2250_v33 = vpop.f32.mrb[42].mxu1 }
 0x138   : > { %1883 = vst.msk [vmem:[%s2689_s17 + $0x138] sm:$0xff] %vm581_vm0, %v1819_v26  ;;  %v1430_v34 = vadd.f32 %v1429_v32, %v872_v29  ;;  %v2318_v35 = vpop.f32.mrb[42].mxu0  ;;  %v875_v36 = vpop.f32.mrb[43].mxu1 }
 0x139   : > { %1881 = vst.msk [vmem:[%s2689_s17 + $0x128] sm:$0xff] %vm581_vm0, %v1817_v30  ;;  %vm1566_vm11 = vcmp.ge.f32.partialorder %v1438_v31, 0.0  ;;  %v1630_v37 = vmul.f32 0.1, %v1438_v31  ;;  %v1441_v39 = vadd.f32 %v2318_v35, %v2250_v33  ;;  %v1432_v40 = vpop.f32.mrb[43].mxu0  ;;  %v1766_v30 = vld [vmem:[%s2682_s14 + $0x190] sm:$0xff] }
 0x13a   : > { %vm1564_vm12 = vcmp.ge.f32.partialorder %v1430_v34, 0.0  ;;  %v1628_v41 = vmul.f32 0.1, %v1430_v34  ;;  %v1433_v43 = vadd.f32 %v1432_v40, %v875_v36 }
 0x13b   : > { %v1694_v44 = vsel %vm1566_vm11, %v1438_v31, %v1630_v37  ;;  %vm1567_vm13 = vcmp.ge.f32.partialorder %v1441_v39, 0.0  ;;  %v1631_v45 = vmul.f32 0.1, %v1441_v39 }
 0x13c   : > { %v1822_v47 = vadd.f32 %v1758_v38, %v1694_v44  ;;  %v1692_v48 = vsel %vm1564_vm12, %v1430_v34, %v1628_v41  ;;  %vm1565_vm14 = vcmp.ge.f32.partialorder %v1433_v43, 0.0  ;;  %v1629_v49 = vmul.f32 0.1, %v1433_v43  ;;  %v1764_v34 = vld [vmem:[%s2682_s14 + $0x180] sm:$0xff]  ;;  %v1767_v38 = vld [vmem:[%s2682_s14 + $0x198] sm:$0xff] }
 0x13d   : > { %v1820_v51 = vadd.f32 %v1756_v42, %v1692_v48  ;;  %v1695_v52 = vsel %vm1567_vm13, %v1441_v39, %v1631_v45  ;;  %v2253_v53 = vpop.f32.mrb[44].mxu1  ;;  %v1765_v42 = vld [vmem:[%s2682_s14 + $0x188] sm:$0xff] }
 0x13e   : > { %1886 = vst.msk [vmem:[%s2689_s17 + $0x150] sm:$0xff] %vm581_vm0, %v1822_v47  ;;  %v1823_v54 = vadd.f32 %v1759_v46, %v1695_v52  ;;  %v1693_v55 = vsel %vm1565_vm14, %v1433_v43, %v1629_v49  ;;  %v2321_v56 = vpop.f32.mrb[44].mxu0  ;;  %v888_v57 = vpop.f32.mrb[45].mxu1 }
 0x13f   : > { %1884 = vst.msk [vmem:[%s2689_s17 + $0x140] sm:$0xff] %vm581_vm0, %v1820_v51  ;;  %v1821_v58 = vadd.f32 %v1757_v50, %v1693_v55  ;;  %v1454_v59 = vadd.f32 %v2321_v56, %v2253_v53  ;;  %v1445_v60 = vpop.f32.mrb[45].mxu0  ;;  %v2254_v61 = vpop.f32.mrb[46].mxu1 }
 0x140   : > { %1887 = vst.msk [vmem:[%s2689_s17 + $0x158] sm:$0xff] %vm581_vm0, %v1823_v54  ;;  %v1446_v62 = vadd.f32 %v1445_v60, %v888_v57  ;;  %v2322_v63 = vpop.f32.mrb[46].mxu0  ;;  %v891_v0 = vpop.f32.mrb[47].mxu1 }
 0x141   : > { %1885 = vst.msk [vmem:[%s2689_s17 + $0x148] sm:$0xff] %vm581_vm0, %v1821_v58  ;;  %vm1570_vm15 = vcmp.ge.f32.partialorder %v1454_v59, 0.0  ;;  %v1634_v1 = vmul.f32 0.1, %v1454_v59  ;;  %v1457_v3 = vadd.f32 %v2322_v63, %v2254_v61  ;;  %v1448_v4 = vpop.f32.mrb[47].mxu0  ;;  %v1770_v58 = vld [vmem:[%s2682_s14 + $0x1b0] sm:$0xff] }
 0x142   : > { %vm1568_vm1 = vcmp.ge.f32.partialorder %v1446_v62, 0.0  ;;  %v1632_v5 = vmul.f32 0.1, %v1446_v62  ;;  %v1449_v7 = vadd.f32 %v1448_v4, %v891_v0 }
 0x143   : > { %v1698_v8 = vsel %vm1570_vm15, %v1454_v59, %v1634_v1  ;;  %vm1571_vm2 = vcmp.ge.f32.partialorder %v1457_v3, 0.0  ;;  %v1635_v9 = vmul.f32 0.1, %v1457_v3 }
 0x144   : > { %v1826_v11 = vadd.f32 %v1762_v2, %v1698_v8  ;;  %v1696_v12 = vsel %vm1568_vm1, %v1446_v62, %v1632_v5  ;;  %vm1569_vm3 = vcmp.ge.f32.partialorder %v1449_v7, 0.0  ;;  %v1633_v13 = vmul.f32 0.1, %v1449_v7  ;;  %v1768_v62 = vld [vmem:[%s2682_s14 + $0x1a0] sm:$0xff]  ;;  %v1771_v2 = vld [vmem:[%s2682_s14 + $0x1b8] sm:$0xff] }
 0x145   : > { %v1824_v15 = vadd.f32 %v1760_v6, %v1696_v12  ;;  %v1699_v16 = vsel %vm1571_vm2, %v1457_v3, %v1635_v9  ;;  %v2257_v17 = vpop.f32.mrb[48].mxu1  ;;  %v1769_v6 = vld [vmem:[%s2682_s14 + $0x1a8] sm:$0xff] }
 0x146   : > { %1890 = vst.msk [vmem:[%s2689_s17 + $0x170] sm:$0xff] %vm581_vm0, %v1826_v11  ;;  %v1827_v18 = vadd.f32 %v1763_v10, %v1699_v16  ;;  %v1697_v19 = vsel %vm1569_vm3, %v1449_v7, %v1633_v13  ;;  %v2325_v20 = vpop.f32.mrb[48].mxu0  ;;  %v904_v21 = vpop.f32.mrb[49].mxu1 }
 0x147   : > { %1888 = vst.msk [vmem:[%s2689_s17 + $0x160] sm:$0xff] %vm581_vm0, %v1824_v15  ;;  %v1825_v22 = vadd.f32 %v1761_v14, %v1697_v19  ;;  %v1470_v23 = vadd.f32 %v2325_v20, %v2257_v17  ;;  %v1461_v24 = vpop.f32.mrb[49].mxu0  ;;  %v2258_v25 = vpop.f32.mrb[50].mxu1 }
 0x148   : > { %1891 = vst.msk [vmem:[%s2689_s17 + $0x178] sm:$0xff] %vm581_vm0, %v1827_v18  ;;  %v1462_v26 = vadd.f32 %v1461_v24, %v904_v21  ;;  %v2326_v27 = vpop.f32.mrb[50].mxu0  ;;  %v907_v28 = vpop.f32.mrb[51].mxu1 }
 0x149   : > { %1889 = vst.msk [vmem:[%s2689_s17 + $0x168] sm:$0xff] %vm581_vm0, %v1825_v22  ;;  %vm1574_vm4 = vcmp.ge.f32.partialorder %v1470_v23, 0.0  ;;  %v1638_v29 = vmul.f32 0.1, %v1470_v23  ;;  %v1473_v31 = vadd.f32 %v2326_v27, %v2258_v25  ;;  %v1464_v32 = vpop.f32.mrb[51].mxu0  ;;  %v1774_v22 = vld [vmem:[%s2682_s14 + $0x1d0] sm:$0xff] }
 0x14a   : > { %vm1572_vm5 = vcmp.ge.f32.partialorder %v1462_v26, 0.0  ;;  %v1636_v33 = vmul.f32 0.1, %v1462_v26  ;;  %v1465_v35 = vadd.f32 %v1464_v32, %v907_v28 }
 0x14b   : > { %v1702_v36 = vsel %vm1574_vm4, %v1470_v23, %v1638_v29  ;;  %vm1575_vm6 = vcmp.ge.f32.partialorder %v1473_v31, 0.0  ;;  %v1639_v37 = vmul.f32 0.1, %v1473_v31 }
 0x14c   : > { %v1830_v39 = vadd.f32 %v1766_v30, %v1702_v36  ;;  %v1700_v40 = vsel %vm1572_vm5, %v1462_v26, %v1636_v33  ;;  %vm1573_vm7 = vcmp.ge.f32.partialorder %v1465_v35, 0.0  ;;  %v1637_v41 = vmul.f32 0.1, %v1465_v35  ;;  %v1772_v26 = vld [vmem:[%s2682_s14 + $0x1c0] sm:$0xff]  ;;  %v1775_v30 = vld [vmem:[%s2682_s14 + $0x1d8] sm:$0xff] }
 0x14d   : > { %v1828_v43 = vadd.f32 %v1764_v34, %v1700_v40  ;;  %v1703_v44 = vsel %vm1575_vm6, %v1473_v31, %v1639_v37  ;;  %v2261_v45 = vpop.f32.mrb[52].mxu1  ;;  %v1773_v34 = vld [vmem:[%s2682_s14 + $0x1c8] sm:$0xff] }
 0x14e   : > { %1894 = vst.msk [vmem:[%s2689_s17 + $0x190] sm:$0xff] %vm581_vm0, %v1830_v39  ;;  %v1831_v46 = vadd.f32 %v1767_v38, %v1703_v44  ;;  %v1701_v47 = vsel %vm1573_vm7, %v1465_v35, %v1637_v41  ;;  %v2329_v48 = vpop.f32.mrb[52].mxu0  ;;  %v920_v49 = vpop.f32.mrb[53].mxu1 }
 0x14f   : > { %1892 = vst.msk [vmem:[%s2689_s17 + $0x180] sm:$0xff] %vm581_vm0, %v1828_v43  ;;  %v1829_v50 = vadd.f32 %v1765_v42, %v1701_v47  ;;  %v1486_v51 = vadd.f32 %v2329_v48, %v2261_v45  ;;  %v1477_v52 = vpop.f32.mrb[53].mxu0  ;;  %v2262_v53 = vpop.f32.mrb[54].mxu1 }
 0x150   : > { %1895 = vst.msk [vmem:[%s2689_s17 + $0x198] sm:$0xff] %vm581_vm0, %v1831_v46  ;;  %v1478_v54 = vadd.f32 %v1477_v52, %v920_v49  ;;  %v2330_v55 = vpop.f32.mrb[54].mxu0  ;;  %v923_v56 = vpop.f32.mrb[55].mxu1 }
 0x151   : > { %1893 = vst.msk [vmem:[%s2689_s17 + $0x188] sm:$0xff] %vm581_vm0, %v1829_v50  ;;  %vm1578_vm8 = vcmp.ge.f32.partialorder %v1486_v51, 0.0  ;;  %v1642_v57 = vmul.f32 0.1, %v1486_v51  ;;  %v1489_v59 = vadd.f32 %v2330_v55, %v2262_v53  ;;  %v1480_v60 = vpop.f32.mrb[55].mxu0  ;;  %v1778_v50 = vld [vmem:[%s2682_s14 + $0x1f0] sm:$0xff] }
 0x152   : > { %vm1576_vm9 = vcmp.ge.f32.partialorder %v1478_v54, 0.0  ;;  %v1640_v61 = vmul.f32 0.1, %v1478_v54  ;;  %v1481_v63 = vadd.f32 %v1480_v60, %v923_v56 }
 0x153   : > { %v1706_v0 = vsel %vm1578_vm8, %v1486_v51, %v1642_v57  ;;  %vm1579_vm10 = vcmp.ge.f32.partialorder %v1489_v59, 0.0  ;;  %v1643_v1 = vmul.f32 0.1, %v1489_v59 }
 0x154   : > { %v1834_v3 = vadd.f32 %v1770_v58, %v1706_v0  ;;  %v1704_v4 = vsel %vm1576_vm9, %v1478_v54, %v1640_v61  ;;  %vm1577_vm11 = vcmp.ge.f32.partialorder %v1481_v63, 0.0  ;;  %v1641_v5 = vmul.f32 0.1, %v1481_v63  ;;  %v1776_v54 = vld [vmem:[%s2682_s14 + $0x1e0] sm:$0xff]  ;;  %v1779_v58 = vld [vmem:[%s2682_s14 + $0x1f8] sm:$0xff] }
 0x155   : > { %v1832_v7 = vadd.f32 %v1768_v62, %v1704_v4  ;;  %v1707_v8 = vsel %vm1579_vm10, %v1489_v59, %v1643_v1  ;;  %v2265_v9 = vpop.f32.mrb[56].mxu1  ;;  %v1777_v62 = vld [vmem:[%s2682_s14 + $0x1e8] sm:$0xff] }
 0x156   : > { %1898 = vst.msk [vmem:[%s2689_s17 + $0x1b0] sm:$0xff] %vm581_vm0, %v1834_v3  ;;  %v1835_v10 = vadd.f32 %v1771_v2, %v1707_v8  ;;  %v1705_v11 = vsel %vm1577_vm11, %v1481_v63, %v1641_v5  ;;  %v2333_v12 = vpop.f32.mrb[56].mxu0  ;;  %v936_v13 = vpop.f32.mrb[57].mxu1 }
 0x157   : > { %1896 = vst.msk [vmem:[%s2689_s17 + $0x1a0] sm:$0xff] %vm581_vm0, %v1832_v7  ;;  %v1833_v14 = vadd.f32 %v1769_v6, %v1705_v11  ;;  %v1502_v15 = vadd.f32 %v2333_v12, %v2265_v9  ;;  %v1493_v16 = vpop.f32.mrb[57].mxu0  ;;  %v2266_v17 = vpop.f32.mrb[58].mxu1 }
 0x158   : > { %1899 = vst.msk [vmem:[%s2689_s17 + $0x1b8] sm:$0xff] %vm581_vm0, %v1835_v10  ;;  %v1494_v18 = vadd.f32 %v1493_v16, %v936_v13  ;;  %v2334_v19 = vpop.f32.mrb[58].mxu0  ;;  %v939_v20 = vpop.f32.mrb[59].mxu1 }
 0x159   : > { %1897 = vst.msk [vmem:[%s2689_s17 + $0x1a8] sm:$0xff] %vm581_vm0, %v1833_v14  ;;  %vm1582_vm12 = vcmp.ge.f32.partialorder %v1502_v15, 0.0  ;;  %v1646_v21 = vmul.f32 0.1, %v1502_v15  ;;  %v1505_v23 = vadd.f32 %v2334_v19, %v2266_v17  ;;  %v1496_v24 = vpop.f32.mrb[59].mxu0 }
 0x15a   : > { %vm1580_vm13 = vcmp.ge.f32.partialorder %v1494_v18, 0.0  ;;  %v1644_v25 = vmul.f32 0.1, %v1494_v18  ;;  %v1497_v27 = vadd.f32 %v1496_v24, %v939_v20 }
 0x15b   : > { %v1710_v28 = vsel %vm1582_vm12, %v1502_v15, %v1646_v21  ;;  %vm1583_vm14 = vcmp.ge.f32.partialorder %v1505_v23, 0.0  ;;  %v1647_v29 = vmul.f32 0.1, %v1505_v23 }
 0x15c   : > { %v1838_v31 = vadd.f32 %v1774_v22, %v1710_v28  ;;  %v1708_v32 = vsel %vm1580_vm13, %v1494_v18, %v1644_v25  ;;  %vm1581_vm15 = vcmp.ge.f32.partialorder %v1497_v27, 0.0  ;;  %v1645_v33 = vmul.f32 0.1, %v1497_v27 }
 0x15d   : > { %v1836_v35 = vadd.f32 %v1772_v26, %v1708_v32  ;;  %v1711_v36 = vsel %vm1583_vm14, %v1505_v23, %v1647_v29  ;;  %v2269_v37 = vpop.f32.mrb[60].mxu1 }
 0x15e   : > { %1902 = vst.msk [vmem:[%s2689_s17 + $0x1d0] sm:$0xff] %vm581_vm0, %v1838_v31  ;;  %v1839_v38 = vadd.f32 %v1775_v30, %v1711_v36  ;;  %v1709_v39 = vsel %vm1581_vm15, %v1497_v27, %v1645_v33  ;;  %v2337_v40 = vpop.f32.mrb[60].mxu0  ;;  %v952_v41 = vpop.f32.mrb[61].mxu1 }
 0x15f   : > { %1900 = vst.msk [vmem:[%s2689_s17 + $0x1c0] sm:$0xff] %vm581_vm0, %v1836_v35  ;;  %v1837_v42 = vadd.f32 %v1773_v34, %v1709_v39  ;;  %v1518_v43 = vadd.f32 %v2337_v40, %v2269_v37  ;;  %v1509_v44 = vpop.f32.mrb[61].mxu0  ;;  %v2270_v45 = vpop.f32.mrb[62].mxu1 }
 0x160   : > { %1903 = vst.msk [vmem:[%s2689_s17 + $0x1d8] sm:$0xff] %vm581_vm0, %v1839_v38  ;;  %v1510_v46 = vadd.f32 %v1509_v44, %v952_v41  ;;  %v2338_v47 = vpop.f32.mrb[62].mxu0  ;;  %v955_v48 = vpop.f32.mrb[63].mxu1 }
 0x161   : > { %1901 = vst.msk [vmem:[%s2689_s17 + $0x1c8] sm:$0xff] %vm581_vm0, %v1837_v42  ;;  %vm1586_vm1 = vcmp.ge.f32.partialorder %v1518_v43, 0.0  ;;  %v1650_v49 = vmul.f32 0.1, %v1518_v43  ;;  %v1521_v51 = vadd.f32 %v2338_v47, %v2270_v45  ;;  %v1512_v52 = vpop.f32.mrb[63].mxu0 }
 0x162   : > { %vm1584_vm2 = vcmp.ge.f32.partialorder %v1510_v46, 0.0  ;;  %v1648_v53 = vmul.f32 0.1, %v1510_v46  ;;  %v1513_v55 = vadd.f32 %v1512_v52, %v955_v48 }
 0x163   : > { %v1714_v56 = vsel %vm1586_vm1, %v1518_v43, %v1650_v49  ;;  %vm1587_vm3 = vcmp.ge.f32.partialorder %v1521_v51, 0.0  ;;  %v1651_v57 = vmul.f32 0.1, %v1521_v51 }
 0x164   : > { %v1842_v59 = vadd.f32 %v1778_v50, %v1714_v56  ;;  %v1712_v60 = vsel %vm1584_vm2, %v1510_v46, %v1648_v53  ;;  %vm1585_vm4 = vcmp.ge.f32.partialorder %v1513_v55, 0.0  ;;  %v1649_v61 = vmul.f32 0.1, %v1513_v55 }
 0x165   : > { %v1840_v63 = vadd.f32 %v1776_v54, %v1712_v60  ;;  %v1715_v0 = vsel %vm1587_vm3, %v1521_v51, %v1651_v57 }
 0x166   : > { %1906 = vst.msk [vmem:[%s2689_s17 + $0x1f0] sm:$0xff] %vm581_vm0, %v1842_v59  ;;  %v1843_v1 = vadd.f32 %v1779_v58, %v1715_v0  ;;  %v1713_v2 = vsel %vm1585_vm4, %v1513_v55, %v1649_v61 }
 0x167   : > { %1904 = vst.msk [vmem:[%s2689_s17 + $0x1e0] sm:$0xff] %vm581_vm0, %v1840_v63  ;;  %v1841_v3 = vadd.f32 %v1777_v62, %v1713_v2 }
 0x168   : > { %1907 = vst.msk [vmem:[%s2689_s17 + $0x1f8] sm:$0xff] %vm581_vm0, %v1843_v1 }
 0x169   : > { %1905 = vst.msk [vmem:[%s2689_s17 + $0x1e8] sm:$0xff] %vm581_vm0, %v1841_v3 }
 0x16a PF: > { %s15_s18 = sadd.s32 1, %s2485_s18  }
 0x16b   : > { %p12_p4 = scmp.ge.s32.totalorder %s15_s18, 12  }
 0x16d   :  { %14 = sbr.rel (!%p12_p4) target bundleno = 1 (0x1), region = 76 }

</bundles_post_ra>
